<compile_context>
chip_gen: v5e
topology: v5e:2x2
jax: 0.10.0
libtpu: 0.0.40
codegen_flags: <defaults>
</compile_context>

<pallas_src>
import functools
import math

import jax
import jax.numpy as jnp
from jax.experimental import pallas as pl
from jax.experimental.pallas import tpu as pltpu


def _round_up(x, m):
    return ((x + m - 1) // m) * m


def _pick_row_tile(m):
    return next((t for t in (1024, 512, 256, 128, 64, 32, 16, 8) if m % t == 0), m)


def _pick_tile(dim, candidates):
    """Pick the candidate tile minimizing padding; tie-break to the larger tile."""
    best_t, best_p = None, None
    for t in candidates:
        p = _round_up(dim, t)
        if best_p is None or p < best_p or (p == best_p and t > best_t):
            best_t, best_p = t, p
    return best_t


def _vmem_limit_bytes():
    """Per-generation scoped-VMEM budget (v5e/v6e: ~100 MiB, v7x: ~48 MiB)."""
    cap = 64 * 1024 * 1024   # conservative fallback (safe on every generation)
    try:
        info = pltpu.get_tpu_info()
        cap = int(getattr(info, "vmem_capacity_bytes", cap))
    except Exception:
        pass
    return int(min(max(cap - 16 * 1024 * 1024, 32 * 1024 * 1024),
                   100 * 1024 * 1024))


_VMEM_LIMIT = _vmem_limit_bytes()


# ----------------------------------------------------------------------------
# Tiled GEMM + bias, bf16 activation output, fused BatchNorm batch statistics
# ----------------------------------------------------------------------------

def _gemm_bias_stats_kernel(a_ref, b_ref, bias_ref, o_ref, sum_ref, sq_ref,
                            acc_ref):
    k = pl.program_id(2)

    @pl.when(k == 0)
    def _():
        acc_ref[...] = jnp.zeros_like(acc_ref)

    acc_ref[...] += jnp.dot(a_ref[...], b_ref[...],
                            preferred_element_type=jnp.float32)

    @pl.when(k == pl.num_programs(2) - 1)
    def _():
        y = acc_ref[...] + bias_ref[...]
        o_ref[...] = y.astype(o_ref.dtype)            # bf16 activation store
        sum_ref[0] = jnp.sum(y, axis=0, keepdims=True)  # stats from f32 acc
        sq_ref[0] = jnp.sum(y * y, axis=0, keepdims=True)


def conv_gemm_bn_stats(a, w, bias, *, extra_cols=0):
    """y = a @ w + bias (bf16, columns padded to lane granularity, extra_cols
    spare zero columns appended before padding) plus per-column mean/var.

    a: (M, K), w: (K, N), bias: (N,).
    Returns (y (M, Np) bf16, Np, mean (N,), var (N,)).
    """
    M, K = a.shape
    _, N = w.shape
    tn = _pick_tile(N + extra_cols, (256, 128))
    tk = _pick_tile(K, (512, 256))
    Np = _round_up(N + extra_cols, tn)
    Kp = _round_up(K, tk)
    tm = min(1024, _round_up(M, 8))
    Mp = _round_up(M, tm)
    Mt, Nt, Kt = Mp // tm, Np // tn, Kp // tk

    a_p = jnp.pad(a, ((0, Mp - M), (0, Kp - K))).astype(jnp.bfloat16)
    w_p = jnp.pad(w, ((0, Kp - K), (0, Np - N))).astype(jnp.bfloat16)
    b_p = jnp.pad(bias.astype(jnp.float32), (0, Np - N)).reshape(1, Np)

    y, psum, psq = pl.pallas_call(
        _gemm_bias_stats_kernel,
        out_shape=(
            jax.ShapeDtypeStruct((Mp, Np), jnp.bfloat16),
            jax.ShapeDtypeStruct((Mt, 1, Np), jnp.float32),
            jax.ShapeDtypeStruct((Mt, 1, Np), jnp.float32),
        ),
        grid=(Mt, Nt, Kt),
        in_specs=[
            pl.BlockSpec((tm, tk), lambda i, j, k: (i, k)),
            pl.BlockSpec((tk, tn), lambda i, j, k: (k, j)),
            pl.BlockSpec((1, tn), lambda i, j, k: (0, j)),
        ],
        out_specs=(
            pl.BlockSpec((tm, tn), lambda i, j, k: (i, j)),
            pl.BlockSpec((1, 1, tn), lambda i, j, k: (i, 0, j)),
            pl.BlockSpec((1, 1, tn), lambda i, j, k: (i, 0, j)),
        ),
        scratch_shapes=[pltpu.VMEM((tm, tn), jnp.float32)],
        compiler_params=pltpu.CompilerParams(
            dimension_semantics=("parallel", "parallel", "arbitrary"),
            vmem_limit_bytes=_VMEM_LIMIT),
    )(a_p, w_p, b_p)

    col_sum = jnp.sum(psum.reshape(Mt, Np), axis=0)
    col_sq = jnp.sum(psq.reshape(Mt, Np), axis=0)
    n_pad_rows = Mp - M
    if n_pad_rows:  # padded a-rows contribute `bias` to the stats: correct it
        col_sum = col_sum - n_pad_rows * b_p[0]
        col_sq = col_sq - n_pad_rows * b_p[0] * b_p[0]
    mean = col_sum[:N] / M
    var = col_sq[:N] / M - mean * mean
    if Mp != M:
        y = y[:M]
    return y, Np, mean, var


# ----------------------------------------------------------------------------
# conv1 BN+ReLU: consumes bf16 padded activation, writes only the real
# channels (bf16) so no XLA slice copy is needed downstream.
# ----------------------------------------------------------------------------

def _ssrelu_kernel(x_ref, s_ref, t_ref, o_ref):
    c = o_ref.shape[-1]
    x = x_ref[:, :c].astype(jnp.float32)
    o_ref[...] = jnp.maximum(x * s_ref[...] + t_ref[...], 0.0).astype(o_ref.dtype)


def scale_shift_relu(x, scale, shift, out_cols):
    M, Cp = x.shape
    tm = _pick_row_tile(M)
    return pl.pallas_call(
        _ssrelu_kernel,
        out_shape=jax.ShapeDtypeStruct((M, out_cols), jnp.bfloat16),
        grid=(M // tm,),
        in_specs=[
            pl.BlockSpec((tm, Cp), lambda i: (i, 0)),
            pl.BlockSpec((1, out_cols), lambda i: (0, 0)),
            pl.BlockSpec((1, out_cols), lambda i: (0, 0)),
        ],
        out_specs=pl.BlockSpec((tm, out_cols), lambda i: (i, 0)),
        compiler_params=pltpu.CompilerParams(
            dimension_semantics=("parallel",),
            vmem_limit_bytes=_VMEM_LIMIT),
    )(x, scale.reshape(1, out_cols), shift.reshape(1, out_cols))


# ----------------------------------------------------------------------------
# Fused conv2-BN+ReLU -> scatter_mean -> (+ positional embedding, cls at row 0)
#   counts come from the same one-hot matmul: the spare padded channel has
#   scale=0 / shift=1 so relu(0*y + 1) == 1 acts as the "ones column".
#   Token row 0 never matches any segment (segments scatter to rows 1..S) and
#   picks up cls_token + cls_pos from the pos input, so the token sequence is
#   emitted already assembled.
# ----------------------------------------------------------------------------

def _scatter_pos_kernel(seg_ref, y_ref, s_ref, t_ref, pos_ref, o_ref, *,
                        d_model):
    seg = seg_ref[0]                                           # (1, P) int32
    feats = jnp.maximum(y_ref[0].astype(jnp.float32) * s_ref[...] + t_ref[...],
                        0.0).astype(jnp.bfloat16)              # (P, Np) bf16
    P = feats.shape[0]
    Ntok = o_ref.shape[1]
    tok_iota = jax.lax.broadcasted_iota(jnp.int32, (Ntok, P), 0)
    onehot = (tok_iota == seg + 1).astype(jnp.bfloat16)        # (Ntok, P)
    agg = jnp.dot(onehot, feats, preferred_element_type=jnp.float32)
    counts = agg[:, d_model:d_model + 1]
    inv = pl.reciprocal(jnp.maximum(counts, 1.0), approx=True)
    o_ref[0] = agg[:, :d_model] * inv + pos_ref[0]


def scatter_mean_bn_pos(seg_flat, y2, s_full, t_full, pos_full, d_model):
    # TODO(synk): for production P, fold batch into the token axis to fatten
    # the skinny (Ntok, P) @ (P, Np) MXU matmul.
    B, _, P = seg_flat.shape
    Np = y2.shape[-1]
    N_tok = pos_full.shape[1]
    return pl.pallas_call(
        functools.partial(_scatter_pos_kernel, d_model=d_model),
        out_shape=jax.ShapeDtypeStruct((B, N_tok, d_model), jnp.float32),
        grid=(B,),
        in_specs=[
            pl.BlockSpec((1, 1, P), lambda b: (b, 0, 0)),
            pl.BlockSpec((1, P, Np), lambda b: (b, 0, 0)),
            pl.BlockSpec((1, Np), lambda b: (0, 0)),
            pl.BlockSpec((1, Np), lambda b: (0, 0)),
            pl.BlockSpec((1, N_tok, d_model), lambda b: (b, 0, 0)),
        ],
        out_specs=pl.BlockSpec((1, N_tok, d_model), lambda b: (b, 0, 0)),
        compiler_params=pltpu.CompilerParams(
            dimension_semantics=("parallel",),
            vmem_limit_bytes=_VMEM_LIMIT),
    )(seg_flat, y2, s_full, t_full, pos_full)


# ----------------------------------------------------------------------------
# Fused ViT stack: grid (batch_chunks [parallel], depth [arbitrary]),
# token state resident in a per-chunk VMEM scratch, final LayerNorm +
# classification head in the last-depth epilogue.
# ----------------------------------------------------------------------------

def _ln2d(x, g, b, eps=1e-6):   # timm ViT LayerNorm uses eps=1e-6
    mu = jnp.mean(x, axis=-1, keepdims=True)
    xc = x - mu
    var = jnp.mean(xc * xc, axis=-1, keepdims=True)
    return xc * jax.lax.rsqrt(var + eps) * g + b


def _vit_stack_kernel(emb_ref, ln1g, ln1b, qkvw, qkvb, projw, projb,
                      ln2g, ln2b, fc1w, fc1b, fc2w, fc2b,
                      normg, normb, headw, headb, o_ref, x_scr, cat_scr, *,
                      num_heads, n_valid):
    d = pl.program_id(1)
    depth = pl.num_programs(1)
    Bc, N, D = x_scr.shape

    @pl.when(d == 0)
    def _():
        x_scr[...] = emb_ref[...]      # cls token already at row 0

    x2 = x_scr[...].reshape(Bc * N, D)

    # ---- attention branch ----
    h = _ln2d(x2, ln1g[0], ln1b[0])
    qkv = jnp.dot(h.astype(jnp.bfloat16), qkvw[0],
                  preferred_element_type=jnp.float32) + qkvb[0]    # (Bc*N, 3D)
    q = qkv[:, 0:D]
    k = qkv[:, D:2 * D]
    v = qkv[:, 2 * D:3 * D]
    hd = D // num_heads
    scale = float(hd) ** -0.5

    kmask = None
    if n_valid < N:   # mask padded token columns so they never attend
        kmask = jax.lax.broadcasted_iota(jnp.int32, (1, 1, N), 2) < n_valid

    for hh in range(num_heads):
        lo = hh * hd
        qh = q[:, lo:lo + hd].reshape(Bc, N, hd)
        kh = k[:, lo:lo + hd].reshape(Bc, N, hd)
        vh = v[:, lo:lo + hd].reshape(Bc, N, hd)
        logits = jnp.einsum("bnd,bmd->bnm",
                            qh.astype(jnp.bfloat16), kh.astype(jnp.bfloat16),
                            preferred_element_type=jnp.float32) * scale
        if kmask is not None:
            logits = jnp.where(kmask, logits, jnp.float32(-1e30))
        m = jnp.max(logits, axis=-1, keepdims=True)
        e = jnp.exp(logits - m)
        p = e * pl.reciprocal(jnp.sum(e, axis=-1, keepdims=True), approx=True)
        oh = jnp.einsum("bnm,bmd->bnd",
                        p.astype(jnp.bfloat16), vh.astype(jnp.bfloat16),
                        preferred_element_type=jnp.float32)        # (Bc, N, hd)
        # stage the head output instead of accumulating skinny K=hd projections
        cat_scr[:, lo:lo + hd] = oh.reshape(Bc * N, hd)

    attn = jnp.dot(cat_scr[...].astype(jnp.bfloat16), projw[0],
                   preferred_element_type=jnp.float32) + projb[0]  # one K=D GEMM
    x2 = x2 + attn

    # ---- MLP branch ----
    h2 = _ln2d(x2, ln2g[0], ln2b[0])
    h2 = jnp.dot(h2.astype(jnp.bfloat16), fc1w[0],
                 preferred_element_type=jnp.float32) + fc1b[0]
    h2 = jax.nn.gelu(h2, approximate=True)   # TODO(synk): exact erf GELU
    h2 = jnp.dot(h2.astype(jnp.bfloat16), fc2w[0],
                 preferred_element_type=jnp.float32) + fc2b[0]
    x2 = x2 + h2

    x_scr[...] = x2.reshape(Bc, N, D)

    @pl.when(d == depth - 1)
    def _():
        cls_rows = x2.reshape(Bc, N, D)[:, 0, :]                   # (Bc, D)
        y = _ln2d(cls_rows, normg[...], normb[...])
        o_ref[0] = (jnp.dot(y.astype(jnp.bfloat16), headw[...],
                            preferred_element_type=jnp.float32)
                    + headb[...])


def vit_forward(tokens, blocks, norm_g, norm_b, head_w, head_b, *,
                num_heads, n_valid):
    B, N_tok, D = tokens.shape
    depth = blocks["qkv_w"].shape[0]
    num_classes = head_w.shape[1]
    # Split batch into chunks on a leading "parallel" axis so v7x's second
    # TensorCore gets work (no effect on single-TC v5e/v6e correctness).
    chunks = 2 if (B >= 2 and B % 2 == 0) else 1
    Bc = B // chunks

    def const_spec(a):
        n = a.ndim
        return pl.BlockSpec(a.shape, lambda c, d, n=n: (0,) * n)

    def blk_spec(a):
        n = a.ndim
        return pl.BlockSpec((1,) + a.shape[1:],
                            lambda c, d, n=n: (d,) + (0,) * (n - 1))

    args = [
        tokens.astype(jnp.float32),
        blocks["ln1_g"], blocks["ln1_b"],
        blocks["qkv_w"].astype(jnp.bfloat16), blocks["qkv_b"],
        blocks["proj_w"].astype(jnp.bfloat16), blocks["proj_b"],
        blocks["ln2_g"], blocks["ln2_b"],
        blocks["fc1_w"].astype(jnp.bfloat16), blocks["fc1_b"],
        blocks["fc2_w"].astype(jnp.bfloat16), blocks["fc2_b"],
        norm_g.reshape(1, D), norm_b.reshape(1, D),
        head_w.astype(jnp.bfloat16), head_b.reshape(1, num_classes),
    ]
    in_specs = [pl.BlockSpec((Bc, N_tok, D), lambda c, d: (c, 0, 0))]
    in_specs += [blk_spec(a) for a in args[1:13]]
    in_specs += [const_spec(a) for a in args[13:]]

    out = pl.pallas_call(
        functools.partial(_vit_stack_kernel, num_heads=num_heads,
                          n_valid=n_valid),
        out_shape=jax.ShapeDtypeStruct((chunks, Bc, num_classes), jnp.float32),
        grid=(chunks, depth),
        in_specs=in_specs,
        out_specs=pl.BlockSpec((1, Bc, num_classes), lambda c, d: (c, 0, 0)),
        scratch_shapes=[pltpu.VMEM((Bc, N_tok, D), jnp.float32),
                        pltpu.VMEM((Bc * N_tok, D), jnp.float32)],
        compiler_params=pltpu.CompilerParams(
            dimension_semantics=("parallel", "arbitrary"),
            vmem_limit_bytes=_VMEM_LIMIT),
    )(*args)
    return out.reshape(B, num_classes)


# ----------------------------------------------------------------------------
# Plain-JAX glue: NHWC im2col, Voronoi tokenizer approximation, params
# ----------------------------------------------------------------------------

def im2col_nhwc(x, kh, kw, stride, pad):
    """x: (B, H, W, C) -> rows (B*Ho*Wo, kh*kw*C) in (kh, kw, C) ordering."""
    B, H, W, C = x.shape
    xp = jnp.pad(x, ((0, 0), (pad, pad), (pad, pad), (0, 0)))
    Ho = (H + 2 * pad - kh) // stride + 1
    Wo = (W + 2 * pad - kw) // stride + 1
    cols = []
    for i in range(kh):
        for j in range(kw):
            cols.append(xp[:, i:i + stride * Ho:stride,
                           j:j + stride * Wo:stride, :])
    col = jnp.stack(cols, axis=3)                 # (B, Ho, Wo, kh*kw, C)
    return col.reshape(B * Ho * Wo, kh * kw * C), Ho, Wo


def voronoi_tokenizer(img, max_segments):
    """Approximate VoronoiPropagation: grid-seeded nearest-centroid segments."""
    B, C, H, W = img.shape
    g = int(math.ceil(math.sqrt(max_segments)))
    xs = (jnp.arange(g, dtype=jnp.float32) + 0.5) * (W / g)
    ys = (jnp.arange(g, dtype=jnp.float32) + 0.5) * (H / g)
    cx, cy = jnp.meshgrid(xs, ys, indexing="xy")
    coords = jnp.stack([cx.reshape(-1), cy.reshape(-1)], axis=-1)[:max_segments]
    centroid_coords = jnp.broadcast_to(coords[None], (B, max_segments, 2))
    py, px = jnp.meshgrid(jnp.arange(H, dtype=jnp.float32),
                          jnp.arange(W, dtype=jnp.float32), indexing="ij")
    d2 = ((px.reshape(-1, 1) - coords[None, :, 0]) ** 2
          + (py.reshape(-1, 1) - coords[None, :, 1]) ** 2)
    segments = jnp.argmin(d2, axis=1).astype(jnp.int32).reshape(H, W)
    segments = jnp.broadcast_to(segments[None], (B, H, W))
    return centroid_coords, segments


def init_params(key, num_channels, max_segments, embed_dim, depth, num_heads,
                num_classes):
    D = embed_dim
    ks = jax.random.split(key, 16)
    kb = jax.random.split(ks[15], 8)

    def nrm(k, shape, std=0.02):
        return jax.random.normal(k, shape, jnp.float32) * std

    return dict(
        conv1_w=nrm(ks[0], (64, num_channels, 7, 7)),
        conv1_b=jnp.zeros((64,), jnp.float32),
        bn1_g=jnp.ones((64,), jnp.float32),
        bn1_b=jnp.zeros((64,), jnp.float32),
        conv2_w=nrm(ks[1], (D, 64, 3, 3)),
        conv2_b=jnp.zeros((D,), jnp.float32),
        bn2_g=jnp.ones((D,), jnp.float32),
        bn2_b=jnp.zeros((D,), jnp.float32),
        pos_w=nrm(ks[2], (2, D)),
        pos_b=jnp.zeros((D,), jnp.float32),
        cls_token=nrm(ks[3], (1, 1, D)),
        cls_pos=nrm(ks[4], (1, 1, D)),
        norm_g=jnp.ones((D,), jnp.float32),
        norm_b=jnp.zeros((D,), jnp.float32),
        head_w=nrm(ks[5], (D, num_classes)),
        head_b=jnp.zeros((num_classes,), jnp.float32),
        blocks=dict(
            ln1_g=jnp.ones((depth, 1, D), jnp.float32),
            ln1_b=jnp.zeros((depth, 1, D), jnp.float32),
            qkv_w=nrm(kb[0], (depth, D, 3 * D)),
            qkv_b=jnp.zeros((depth, 1, 3 * D), jnp.float32),
            proj_w=nrm(kb[1], (depth, D, D)),
            proj_b=jnp.zeros((depth, 1, D), jnp.float32),
            ln2_g=jnp.ones((depth, 1, D), jnp.float32),
            ln2_b=jnp.zeros((depth, 1, D), jnp.float32),
            fc1_w=nrm(kb[2], (depth, D, 4 * D)),
            fc1_b=jnp.zeros((depth, 1, 4 * D), jnp.float32),
            fc2_w=nrm(kb[3], (depth, 4 * D, D)),
            fc2_b=jnp.zeros((depth, 1, D), jnp.float32),
        ),
    )


# ----------------------------------------------------------------------------
# Full forward pass
# ----------------------------------------------------------------------------

def model_forward(params, img, *, max_segments, embed_dim, num_heads):
    B, C, H, W = img.shape
    D = embed_dim
    eps_bn = 1e-5

    centroid_coords, segments = voronoi_tokenizer(img, max_segments)
    x_nhwc = jnp.transpose(img, (0, 2, 3, 1))            # small, done once

    # ---- conv 7x7/s2 -> BN(batch stats) -> ReLU (bf16 activations) ----
    col1, H1, W1 = im2col_nhwc(x_nhwc, 7, 7, 2, 3)
    w1 = jnp.transpose(params["conv1_w"], (2, 3, 1, 0)).reshape(-1, 64)
    y1, _, m1, v1 = conv_gemm_bn_stats(col1, w1, params["conv1_b"])
    s1 = params["bn1_g"] * jax.lax.rsqrt(v1 + eps_bn)
    t1 = params["bn1_b"] - m1 * s1
    feat1 = scale_shift_relu(y1, s1, t1, 64).reshape(B, H1, W1, 64)  # bf16 NHWC

    # ---- conv 3x3/s2 (+1 spare "counts" channel allocated inside the GEMM;
    #      BN+ReLU fused into the scatter kernel below) ----
    col2, Hf, Wf = im2col_nhwc(feat1, 3, 3, 2, 1)
    w2 = jnp.transpose(params["conv2_w"], (2, 3, 1, 0)).reshape(-1, D)
    y2, Np2, m2, v2 = conv_gemm_bn_stats(col2, w2, params["conv2_b"],
                                         extra_cols=1)
    s2 = params["bn2_g"] * jax.lax.rsqrt(v2 + eps_bn)
    t2 = params["bn2_b"] - m2 * s2
    s2_full = jnp.zeros((Np2,), jnp.float32).at[:D].set(s2)
    t2_full = jnp.zeros((Np2,), jnp.float32).at[:D].set(t2).at[D].set(1.0)

    # ---- nearest-neighbor downsample of segment map to (Hf, Wf) ----
    row_idx = (jnp.arange(Hf) * H // Hf).astype(jnp.int32)
    col_idx = (jnp.arange(Wf) * W // Wf).astype(jnp.int32)
    seg_ds = segments[:, row_idx][:, :, col_idx]
    P = Hf * Wf
    seg_flat = seg_ds.reshape(B, 1, P).astype(jnp.int32)

    # ---- positional embedding of normalized centroids (VPU broadcast),
    #      cls token (+cls pos) packed at row 0, padded to a multiple of 8 ----
    N_tok = _round_up(max_segments + 1, 8)
    cn = centroid_coords.astype(jnp.float32) / jnp.array(
        [float(W), float(H)], jnp.float32)
    pos = (cn[..., 0:1] * params["pos_w"][0]
           + cn[..., 1:2] * params["pos_w"][1] + params["pos_b"])
    n_use = min(pos.shape[1], max_segments)
    cls_tok = (params["cls_token"] + params["cls_pos"]).reshape(1, 1, D)
    pos_full = jnp.zeros((B, N_tok, D), jnp.float32)
    pos_full = pos_full.at[:, 0:1, :].set(jnp.broadcast_to(cls_tok, (B, 1, D)))
    pos_full = pos_full.at[:, 1:1 + n_use, :].set(pos[:, :n_use, :])

    # ---- fused BN+ReLU -> scatter_mean -> +pos (token sequence with cls) ----
    y2_b = y2.reshape(B, P, Np2)
    tokens = scatter_mean_bn_pos(seg_flat, y2_b, s2_full.reshape(1, Np2),
                                 t2_full.reshape(1, Np2), pos_full, D)

    # ---- fused ViT stack + final LayerNorm + head ----
    logits = vit_forward(tokens, params["blocks"], params["norm_g"],
                         params["norm_b"], params["head_w"], params["head_b"],
                         num_heads=num_heads, n_valid=max_segments + 1)
    return logits


# ----------------------------------------------------------------------------
# Main
# ----------------------------------------------------------------------------

if __name__ == "__main__":
    B, C, H, W = 2, 3, 32, 32
    max_segments = 15          # -> 16 tokens with the cls token
    embed_dim = 32
    num_heads = 4
    depth = 2
    num_classes = 10

    key = jax.random.PRNGKey(0)
    k_img, k_param = jax.random.split(key)
    img = jax.random.normal(k_img, (B, C, H, W), jnp.float32)
    params = init_params(k_param, C, max_segments, embed_dim, depth,
                         num_heads, num_classes)

    fwd = jax.jit(functools.partial(model_forward, max_segments=max_segments,
                                    embed_dim=embed_dim, num_heads=num_heads))
    logits = jax.block_until_ready(fwd(params, img))
    assert logits.shape == (B, num_classes)
    assert bool(jnp.all(jnp.isfinite(logits)))
    print("KERNEL_OK")
</pallas_src>

<mosaic_0001>
module attributes {stable_mosaic.version = 11 : i64} {
  func.func @_ssrelu_kernel(%arg0: i32, %arg1: memref<512x128xbf16, #tpu.memory_space<vmem>>, %arg2: memref<1x64xf32, #tpu.memory_space<vmem>>, %arg3: memref<1x64xf32, #tpu.memory_space<vmem>>, %arg4: memref<512x64xbf16, #tpu.memory_space<vmem>>) attributes {dimension_semantics = [#tpu.dimension_semantics<parallel>], iteration_bounds = array<i64: 1>, scalar_prefetch = 0 : i64, scratch_operands = 0 : i64, tpu.core_type = #tpu.core_type<tc>, window_params = [{transform_indices = @transform_0, window_bounds = array<i64: 512, 128>}, {pipeline_mode = #tpu.pipeline_mode<synchronous>, transform_indices = @transform_1, window_bounds = array<i64: 1, 64>}, {pipeline_mode = #tpu.pipeline_mode<synchronous>, transform_indices = @transform_2, window_bounds = array<i64: 1, 64>}, {transform_indices = @transform_3, window_bounds = array<i64: 512, 64>}]} {
    %c0 = arith.constant 0 : index
    %c0_0 = arith.constant 0 : index
    %0 = vector.load %arg1[%c0, %c0_0] : memref<512x128xbf16, #tpu.memory_space<vmem>>, vector<512x64xbf16>
    %1 = arith.extf %0 : vector<512x64xbf16> to vector<512x64xf32>
    %c0_1 = arith.constant 0 : index
    %c0_2 = arith.constant 0 : index
    %2 = vector.load %arg2[%c0_1, %c0_2] : memref<1x64xf32, #tpu.memory_space<vmem>>, vector<1x64xf32>
    %3 = vector.broadcast %2 : vector<1x64xf32> to vector<512x64xf32>
    %4 = arith.mulf %1, %3 : vector<512x64xf32>
    %c0_3 = arith.constant 0 : index
    %c0_4 = arith.constant 0 : index
    %5 = vector.load %arg3[%c0_3, %c0_4] : memref<1x64xf32, #tpu.memory_space<vmem>>, vector<1x64xf32>
    %6 = vector.broadcast %5 : vector<1x64xf32> to vector<512x64xf32>
    %7 = arith.addf %4, %6 : vector<512x64xf32>
    %cst = arith.constant 0.000000e+00 : f32
    %8 = vector.broadcast %cst : f32 to vector<512x64xf32>
    %9 = arith.maximumf %7, %8 : vector<512x64xf32>
    %10 = arith.truncf %9 : vector<512x64xf32> to vector<512x64xbf16>
    %c0_5 = arith.constant 0 : index
    %c0_6 = arith.constant 0 : index
    %11 = vector.load %arg4[%c0_5, %c0_6] : memref<512x64xbf16, #tpu.memory_space<vmem>>, vector<512x64xbf16>
    tpu.vector_store %arg4[%c0_5, %c0_6], %10 {strides = array<i32>} : memref<512x64xbf16, #tpu.memory_space<vmem>>, vector<512x64xbf16>,
    return
  }
  func.func @transform_0(%arg0: i32) -> (i32, i32) {
    %c0_i32 = arith.constant 0 : i32
    %c0_i32_0 = arith.constant 0 : i32
    return %arg0, %c0_i32 : i32, i32
  }
  func.func @transform_1(%arg0: i32) -> (i32, i32) {
    %c0_i32 = arith.constant 0 : i32
    %c0_i32_0 = arith.constant 0 : i32
    %c0_i32_1 = arith.constant 0 : i32
    return %c0_i32, %c0_i32_0 : i32, i32
  }
  func.func @transform_2(%arg0: i32) -> (i32, i32) {
    %c0_i32 = arith.constant 0 : i32
    %c0_i32_0 = arith.constant 0 : i32
    %c0_i32_1 = arith.constant 0 : i32
    return %c0_i32, %c0_i32_0 : i32, i32
  }
  func.func @transform_3(%arg0: i32) -> (i32, i32) {
    %c0_i32 = arith.constant 0 : i32
    %c0_i32_0 = arith.constant 0 : i32
    return %arg0, %c0_i32 : i32, i32
  }
}

module attributes {stable_mosaic.version = 11 : i64} {
  func.func @_gemm_bias_stats_kernel(%arg0: i32, %arg1: i32, %arg2: i32, %arg3: memref<512x256xbf16, #tpu.memory_space<vmem>>, %arg4: memref<256x128xbf16, #tpu.memory_space<vmem>>, %arg5: memref<1x128xf32, #tpu.memory_space<vmem>>, %arg6: memref<512x128xbf16, #tpu.memory_space<vmem>>, %arg7: memref<1x1x128xf32, #tpu.memory_space<vmem>>, %arg8: memref<1x1x128xf32, #tpu.memory_space<vmem>>, %arg9: memref<512x128xf32, #tpu.memory_space<vmem>>) attributes {dimension_semantics = [#tpu.dimension_semantics<parallel>, #tpu.dimension_semantics<parallel>, #tpu.dimension_semantics<arbitrary>], iteration_bounds = array<i64: 1, 1, 1>, scalar_prefetch = 0 : i64, scratch_operands = 1 : i64, tpu.core_type = #tpu.core_type<tc>, window_params = [{transform_indices = @transform_0, window_bounds = array<i64: 512, 256>}, {transform_indices = @transform_1, window_bounds = array<i64: 256, 128>}, {transform_indices = @transform_2, window_bounds = array<i64: 1, 128>}, {transform_indices = @transform_3, window_bounds = array<i64: 512, 128>}, {transform_indices = @transform_4, window_bounds = array<i64: 1, 1, 128>}, {transform_indices = @transform_5, window_bounds = array<i64: 1, 1, 128>}]} {
    %c0_i32 = arith.constant 0 : i32
    %0 = arith.cmpi eq, %arg2, %c0_i32 : i32
    %1 = arith.extui %0 : i1 to i32
    %c0_i32_0 = arith.constant 0 : i32
    %2 = arith.cmpi ne, %1, %c0_i32_0 : i32
    scf.if %2 {
      %cst_10 = arith.constant 0.000000e+00 : f32
      %12 = vector.broadcast %cst_10 : f32 to vector<512x128xf32>
      %c0_11 = arith.constant 0 : index
      %c0_12 = arith.constant 0 : index
      %13 = vector.load %arg9[%c0_11, %c0_12] : memref<512x128xf32, #tpu.memory_space<vmem>>, vector<512x128xf32>
      tpu.vector_store %arg9[%c0_11, %c0_12], %12 {strides = array<i32>} : memref<512x128xf32, #tpu.memory_space<vmem>>, vector<512x128xf32>,
    } else {
    }
    %c0 = arith.constant 0 : index
    %c0_1 = arith.constant 0 : index
    %3 = vector.load %arg9[%c0, %c0_1] : memref<512x128xf32, #tpu.memory_space<vmem>>, vector<512x128xf32>
    %c0_2 = arith.constant 0 : index
    %c0_3 = arith.constant 0 : index
    %4 = vector.load %arg3[%c0_2, %c0_3] : memref<512x256xbf16, #tpu.memory_space<vmem>>, vector<512x256xbf16>
    %c0_4 = arith.constant 0 : index
    %c0_5 = arith.constant 0 : index
    %5 = vector.load %arg4[%c0_4, %c0_5] : memref<256x128xbf16, #tpu.memory_space<vmem>>, vector<256x128xbf16>
    %cst = arith.constant dense<0.000000e+00> : vector<512x128xf32>
    %6 = tpu.matmul %4, %5, %cst {dimension_numbers = #tpu.dot_dimension_numbers<[1], [0], [0], [1], [0, 0, 1, 1], [], []>} : vector<512x256xbf16>, vector<256x128xbf16>, vector<512x128xf32> -> vector<512x128xf32>
    %7 = arith.addf %3, %6 : vector<512x128xf32>
    %c0_6 = arith.constant 0 : index
    %c0_7 = arith.constant 0 : index
    %8 = vector.load %arg9[%c0_6, %c0_7] : memref<512x128xf32, #tpu.memory_space<vmem>>, vector<512x128xf32>
    tpu.vector_store %arg9[%c0_6, %c0_7], %7 {strides = array<i32>} : memref<512x128xf32, #tpu.memory_space<vmem>>, vector<512x128xf32>,
    %c0_i32_8 = arith.constant 0 : i32
    %9 = arith.cmpi eq, %arg2, %c0_i32_8 : i32
    %10 = arith.extui %9 : i1 to i32
    %c0_i32_9 = arith.constant 0 : i32
    %11 = arith.cmpi ne, %10, %c0_i32_9 : i32
    scf.if %11 {
      %c0_10 = arith.constant 0 : index
      %c0_11 = arith.constant 0 : index
      %12 = vector.load %arg9[%c0_10, %c0_11] : memref<512x128xf32, #tpu.memory_space<vmem>>, vector<512x128xf32>
      %c0_12 = arith.constant 0 : index
      %c0_13 = arith.constant 0 : index
      %13 = vector.load %arg5[%c0_12, %c0_13] : memref<1x128xf32, #tpu.memory_space<vmem>>, vector<1x128xf32>
      %14 = vector.broadcast %13 : vector<1x128xf32> to vector<512x128xf32>
      %15 = arith.addf %12, %14 : vector<512x128xf32>
      %16 = arith.truncf %15 : vector<512x128xf32> to vector<512x128xbf16>
      %c0_14 = arith.constant 0 : index
      %c0_15 = arith.constant 0 : index
      %17 = vector.load %arg6[%c0_14, %c0_15] : memref<512x128xbf16, #tpu.memory_space<vmem>>, vector<512x128xbf16>
      tpu.vector_store %arg6[%c0_14, %c0_15], %16 {strides = array<i32>} : memref<512x128xbf16, #tpu.memory_space<vmem>>, vector<512x128xbf16>,
      %cst_16 = arith.constant dense<0.000000e+00> : vector<128xf32>
      %18 = vector.multi_reduction <add>, %15, %cst_16 [0] : vector<512x128xf32> to vector<128xf32>
      %19 = vector.shape_cast %18 : vector<128xf32> to vector<1x128xf32>
      %c0_17 = arith.constant 0 : index
      %c0_18 = arith.constant 0 : index
      %c0_19 = arith.constant 0 : index
      %20 = vector.load %arg7[%c0_17, %c0_18, %c0_19] : memref<1x1x128xf32, #tpu.memory_space<vmem>>, vector<1x1x128xf32>
      %21 = vector.shape_cast %20 : vector<1x1x128xf32> to vector<1x128xf32>
      %22 = vector.shape_cast %19 : vector<1x128xf32> to vector<1x1x128xf32>
      tpu.vector_store %arg7[%c0_17, %c0_18, %c0_19], %22 {strides = array<i32>} : memref<1x1x128xf32, #tpu.memory_space<vmem>>, vector<1x1x128xf32>,
      %23 = arith.mulf %15, %15 : vector<512x128xf32>
      %cst_20 = arith.constant dense<0.000000e+00> : vector<128xf32>
      %24 = vector.multi_reduction <add>, %23, %cst_20 [0] : vector<512x128xf32> to vector<128xf32>
      %25 = vector.shape_cast %24 : vector<128xf32> to vector<1x128xf32>
      %c0_21 = arith.constant 0 : index
      %c0_22 = arith.constant 0 : index
      %c0_23 = arith.constant 0 : index
      %26 = vector.load %arg8[%c0_21, %c0_22, %c0_23] : memref<1x1x128xf32, #tpu.memory_space<vmem>>, vector<1x1x128xf32>
      %27 = vector.shape_cast %26 : vector<1x1x128xf32> to vector<1x128xf32>
      %28 = vector.shape_cast %25 : vector<1x128xf32> to vector<1x1x128xf32>
      tpu.vector_store %arg8[%c0_21, %c0_22, %c0_23], %28 {strides = array<i32>} : memref<1x1x128xf32, #tpu.memory_space<vmem>>, vector<1x1x128xf32>,
    } else {
    }
    return
  }
  func.func @transform_0(%arg0: i32, %arg1: i32, %arg2: i32) -> (i32, i32) {
    %c0_i32 = arith.constant 0 : i32
    return %arg0, %arg2 : i32, i32
  }
  func.func @transform_1(%arg0: i32, %arg1: i32, %arg2: i32) -> (i32, i32) {
    %c0_i32 = arith.constant 0 : i32
    return %arg2, %arg1 : i32, i32
  }
  func.func @transform_2(%arg0: i32, %arg1: i32, %arg2: i32) -> (i32, i32) {
    %c0_i32 = arith.constant 0 : i32
    %c0_i32_0 = arith.constant 0 : i32
    return %c0_i32, %arg1 : i32, i32
  }
  func.func @transform_3(%arg0: i32, %arg1: i32, %arg2: i32) -> (i32, i32) {
    %c0_i32 = arith.constant 0 : i32
    return %arg0, %arg1 : i32, i32
  }
  func.func @transform_4(%arg0: i32, %arg1: i32, %arg2: i32) -> (i32, i32, i32) {
    %c0_i32 = arith.constant 0 : i32
    %c0_i32_0 = arith.constant 0 : i32
    return %arg0, %c0_i32, %arg1 : i32, i32, i32
  }
  func.func @transform_5(%arg0: i32, %arg1: i32, %arg2: i32) -> (i32, i32, i32) {
    %c0_i32 = arith.constant 0 : i32
    %c0_i32_0 = arith.constant 0 : i32
    return %arg0, %c0_i32, %arg1 : i32, i32, i32
  }
}

module attributes {stable_mosaic.version = 11 : i64} {
  func.func @_gemm_bias_stats_kernel(%arg0: i32, %arg1: i32, %arg2: i32, %arg3: memref<128x256xbf16, #tpu.memory_space<vmem>>, %arg4: memref<256x128xbf16, #tpu.memory_space<vmem>>, %arg5: memref<1x128xf32, #tpu.memory_space<vmem>>, %arg6: memref<128x128xbf16, #tpu.memory_space<vmem>>, %arg7: memref<1x1x128xf32, #tpu.memory_space<vmem>>, %arg8: memref<1x1x128xf32, #tpu.memory_space<vmem>>, %arg9: memref<128x128xf32, #tpu.memory_space<vmem>>) attributes {dimension_semantics = [#tpu.dimension_semantics<parallel>, #tpu.dimension_semantics<parallel>, #tpu.dimension_semantics<arbitrary>], iteration_bounds = array<i64: 1, 1, 3>, scalar_prefetch = 0 : i64, scratch_operands = 1 : i64, tpu.core_type = #tpu.core_type<tc>, window_params = [{transform_indices = @transform_0, window_bounds = array<i64: 128, 256>}, {transform_indices = @transform_1, window_bounds = array<i64: 256, 128>}, {transform_indices = @transform_2, window_bounds = array<i64: 1, 128>}, {transform_indices = @transform_3, window_bounds = array<i64: 128, 128>}, {transform_indices = @transform_4, window_bounds = array<i64: 1, 1, 128>}, {transform_indices = @transform_5, window_bounds = array<i64: 1, 1, 128>}]} {
    %c0_i32 = arith.constant 0 : i32
    %0 = arith.cmpi eq, %arg2, %c0_i32 : i32
    %1 = arith.extui %0 : i1 to i32
    %c0_i32_0 = arith.constant 0 : i32
    %2 = arith.cmpi ne, %1, %c0_i32_0 : i32
    scf.if %2 {
      %cst_9 = arith.constant 0.000000e+00 : f32
      %12 = vector.broadcast %cst_9 : f32 to vector<128x128xf32>
      %c0_10 = arith.constant 0 : index
      %c0_11 = arith.constant 0 : index
      %13 = vector.load %arg9[%c0_10, %c0_11] : memref<128x128xf32, #tpu.memory_space<vmem>>, vector<128x128xf32>
      tpu.vector_store %arg9[%c0_10, %c0_11], %12 {strides = array<i32>} : memref<128x128xf32, #tpu.memory_space<vmem>>, vector<128x128xf32>,
    } else {
    }
    %c0 = arith.constant 0 : index
    %c0_1 = arith.constant 0 : index
    %3 = vector.load %arg9[%c0, %c0_1] : memref<128x128xf32, #tpu.memory_space<vmem>>, vector<128x128xf32>
    %c0_2 = arith.constant 0 : index
    %c0_3 = arith.constant 0 : index
    %4 = vector.load %arg3[%c0_2, %c0_3] : memref<128x256xbf16, #tpu.memory_space<vmem>>, vector<128x256xbf16>
    %c0_4 = arith.constant 0 : index
    %c0_5 = arith.constant 0 : index
    %5 = vector.load %arg4[%c0_4, %c0_5] : memref<256x128xbf16, #tpu.memory_space<vmem>>, vector<256x128xbf16>
    %cst = arith.constant dense<0.000000e+00> : vector<128x128xf32>
    %6 = tpu.matmul %4, %5, %cst {dimension_numbers = #tpu.dot_dimension_numbers<[1], [0], [0], [1], [0, 0, 1, 1], [], []>} : vector<128x256xbf16>, vector<256x128xbf16>, vector<128x128xf32> -> vector<128x128xf32>
    %7 = arith.addf %3, %6 : vector<128x128xf32>
    %c0_6 = arith.constant 0 : index
    %c0_7 = arith.constant 0 : index
    %8 = vector.load %arg9[%c0_6, %c0_7] : memref<128x128xf32, #tpu.memory_space<vmem>>, vector<128x128xf32>
    tpu.vector_store %arg9[%c0_6, %c0_7], %7 {strides = array<i32>} : memref<128x128xf32, #tpu.memory_space<vmem>>, vector<128x128xf32>,
    %c2_i32 = arith.constant 2 : i32
    %9 = arith.cmpi eq, %arg2, %c2_i32 : i32
    %10 = arith.extui %9 : i1 to i32
    %c0_i32_8 = arith.constant 0 : i32
    %11 = arith.cmpi ne, %10, %c0_i32_8 : i32
    scf.if %11 {
      %c0_9 = arith.constant 0 : index
      %c0_10 = arith.constant 0 : index
      %12 = vector.load %arg9[%c0_9, %c0_10] : memref<128x128xf32, #tpu.memory_space<vmem>>, vector<128x128xf32>
      %c0_11 = arith.constant 0 : index
      %c0_12 = arith.constant 0 : index
      %13 = vector.load %arg5[%c0_11, %c0_12] : memref<1x128xf32, #tpu.memory_space<vmem>>, vector<1x128xf32>
      %14 = vector.broadcast %13 : vector<1x128xf32> to vector<128x128xf32>
      %15 = arith.addf %12, %14 : vector<128x128xf32>
      %16 = arith.truncf %15 : vector<128x128xf32> to vector<128x128xbf16>
      %c0_13 = arith.constant 0 : index
      %c0_14 = arith.constant 0 : index
      %17 = vector.load %arg6[%c0_13, %c0_14] : memref<128x128xbf16, #tpu.memory_space<vmem>>, vector<128x128xbf16>
      tpu.vector_store %arg6[%c0_13, %c0_14], %16 {strides = array<i32>} : memref<128x128xbf16, #tpu.memory_space<vmem>>, vector<128x128xbf16>,
      %cst_15 = arith.constant dense<0.000000e+00> : vector<128xf32>
      %18 = vector.multi_reduction <add>, %15, %cst_15 [0] : vector<128x128xf32> to vector<128xf32>
      %19 = vector.shape_cast %18 : vector<128xf32> to vector<1x128xf32>
      %c0_16 = arith.constant 0 : index
      %c0_17 = arith.constant 0 : index
      %c0_18 = arith.constant 0 : index
      %20 = vector.load %arg7[%c0_16, %c0_17, %c0_18] : memref<1x1x128xf32, #tpu.memory_space<vmem>>, vector<1x1x128xf32>
      %21 = vector.shape_cast %20 : vector<1x1x128xf32> to vector<1x128xf32>
      %22 = vector.shape_cast %19 : vector<1x128xf32> to vector<1x1x128xf32>
      tpu.vector_store %arg7[%c0_16, %c0_17, %c0_18], %22 {strides = array<i32>} : memref<1x1x128xf32, #tpu.memory_space<vmem>>, vector<1x1x128xf32>,
      %23 = arith.mulf %15, %15 : vector<128x128xf32>
      %cst_19 = arith.constant dense<0.000000e+00> : vector<128xf32>
      %24 = vector.multi_reduction <add>, %23, %cst_19 [0] : vector<128x128xf32> to vector<128xf32>
      %25 = vector.shape_cast %24 : vector<128xf32> to vector<1x128xf32>
      %c0_20 = arith.constant 0 : index
      %c0_21 = arith.constant 0 : index
      %c0_22 = arith.constant 0 : index
      %26 = vector.load %arg8[%c0_20, %c0_21, %c0_22] : memref<1x1x128xf32, #tpu.memory_space<vmem>>, vector<1x1x128xf32>
      %27 = vector.shape_cast %26 : vector<1x1x128xf32> to vector<1x128xf32>
      %28 = vector.shape_cast %25 : vector<1x128xf32> to vector<1x1x128xf32>
      tpu.vector_store %arg8[%c0_20, %c0_21, %c0_22], %28 {strides = array<i32>} : memref<1x1x128xf32, #tpu.memory_space<vmem>>, vector<1x1x128xf32>,
    } else {
    }
    return
  }
  func.func @transform_0(%arg0: i32, %arg1: i32, %arg2: i32) -> (i32, i32) {
    %c0_i32 = arith.constant 0 : i32
    return %arg0, %arg2 : i32, i32
  }
  func.func @transform_1(%arg0: i32, %arg1: i32, %arg2: i32) -> (i32, i32) {
    %c0_i32 = arith.constant 0 : i32
    return %arg2, %arg1 : i32, i32
  }
  func.func @transform_2(%arg0: i32, %arg1: i32, %arg2: i32) -> (i32, i32) {
    %c0_i32 = arith.constant 0 : i32
    %c0_i32_0 = arith.constant 0 : i32
    return %c0_i32, %arg1 : i32, i32
  }
  func.func @transform_3(%arg0: i32, %arg1: i32, %arg2: i32) -> (i32, i32) {
    %c0_i32 = arith.constant 0 : i32
    return %arg0, %arg1 : i32, i32
  }
  func.func @transform_4(%arg0: i32, %arg1: i32, %arg2: i32) -> (i32, i32, i32) {
    %c0_i32 = arith.constant 0 : i32
    %c0_i32_0 = arith.constant 0 : i32
    return %arg0, %c0_i32, %arg1 : i32, i32, i32
  }
  func.func @transform_5(%arg0: i32, %arg1: i32, %arg2: i32) -> (i32, i32, i32) {
    %c0_i32 = arith.constant 0 : i32
    %c0_i32_0 = arith.constant 0 : i32
    return %arg0, %c0_i32, %arg1 : i32, i32, i32
  }
}

module attributes {stable_mosaic.version = 11 : i64} {
  func.func @_scatter_pos_kernel(%arg0: i32, %arg1: memref<1x1x64xi32, #tpu.memory_space<vmem>>, %arg2: memref<1x64x128xbf16, #tpu.memory_space<vmem>>, %arg3: memref<1x128xf32, #tpu.memory_space<vmem>>, %arg4: memref<1x128xf32, #tpu.memory_space<vmem>>, %arg5: memref<1x16x32xf32, #tpu.memory_space<vmem>>, %arg6: memref<1x16x32xf32, #tpu.memory_space<vmem>>) attributes {dimension_semantics = [#tpu.dimension_semantics<parallel>], iteration_bounds = array<i64: 2>, scalar_prefetch = 0 : i64, scratch_operands = 0 : i64, tpu.core_type = #tpu.core_type<tc>, window_params = [{transform_indices = @transform_0, window_bounds = array<i64: 1, 1, 64>}, {transform_indices = @transform_1, window_bounds = array<i64: 1, 64, 128>}, {pipeline_mode = #tpu.pipeline_mode<synchronous>, transform_indices = @transform_2, window_bounds = array<i64: 1, 128>}, {pipeline_mode = #tpu.pipeline_mode<synchronous>, transform_indices = @transform_3, window_bounds = array<i64: 1, 128>}, {transform_indices = @transform_4, window_bounds = array<i64: 1, 16, 32>}, {transform_indices = @transform_5, window_bounds = array<i64: 1, 16, 32>}]} {
    %c0 = arith.constant 0 : index
    %c0_0 = arith.constant 0 : index
    %c0_1 = arith.constant 0 : index
    %0 = vector.load %arg1[%c0, %c0_0, %c0_1] : memref<1x1x64xi32, #tpu.memory_space<vmem>>, vector<1x1x64xi32>
    %1 = vector.shape_cast %0 : vector<1x1x64xi32> to vector<1x64xi32>
    %c0_2 = arith.constant 0 : index
    %c0_3 = arith.constant 0 : index
    %c0_4 = arith.constant 0 : index
    %2 = vector.load %arg2[%c0_2, %c0_3, %c0_4] : memref<1x64x128xbf16, #tpu.memory_space<vmem>>, vector<1x64x128xbf16>
    %3 = vector.shape_cast %2 : vector<1x64x128xbf16> to vector<64x128xbf16>
    %4 = arith.extf %3 : vector<64x128xbf16> to vector<64x128xf32>
    %c0_5 = arith.constant 0 : index
    %c0_6 = arith.constant 0 : index
    %5 = vector.load %arg3[%c0_5, %c0_6] : memref<1x128xf32, #tpu.memory_space<vmem>>, vector<1x128xf32>
    %6 = vector.broadcast %5 : vector<1x128xf32> to vector<64x128xf32>
    %7 = arith.mulf %4, %6 : vector<64x128xf32>
    %c0_7 = arith.constant 0 : index
    %c0_8 = arith.constant 0 : index
    %8 = vector.load %arg4[%c0_7, %c0_8] : memref<1x128xf32, #tpu.memory_space<vmem>>, vector<1x128xf32>
    %9 = vector.broadcast %8 : vector<1x128xf32> to vector<64x128xf32>
    %10 = arith.addf %7, %9 : vector<64x128xf32>
    %cst = arith.constant 0.000000e+00 : f32
    %11 = vector.broadcast %cst : f32 to vector<64x128xf32>
    %12 = arith.maximumf %10, %11 : vector<64x128xf32>
    %13 = arith.truncf %12 : vector<64x128xf32> to vector<64x128xbf16>
    %14 = tpu.iota {dimensions = array<i32: 0>} : vector<16x64xi32>
    %c1_i32 = arith.constant 1 : i32
    %15 = vector.broadcast %c1_i32 : i32 to vector<1x64xi32>
    %16 = arith.addi %1, %15 : vector<1x64xi32>
    %17 = vector.broadcast %16 : vector<1x64xi32> to vector<16x64xi32>
    %18 = arith.cmpi eq, %14, %17 : vector<16x64xi32>
    %19 = arith.extui %18 : vector<16x64xi1> to vector<16x64xi32>
    %20 = arith.sitofp %19 : vector<16x64xi32> to vector<16x64xf32>
    %21 = arith.truncf %20 : vector<16x64xf32> to vector<16x64xbf16>
    %cst_9 = arith.constant dense<0.000000e+00> : vector<16x128xf32>
    %22 = tpu.matmul %21, %13, %cst_9 {dimension_numbers = #tpu.dot_dimension_numbers<[1], [0], [0], [1], [0, 0, 1, 1], [], []>} : vector<16x64xbf16>, vector<64x128xbf16>, vector<16x128xf32> -> vector<16x128xf32>
    %23 = vector.extract_strided_slice %22 {offsets = [0, 32], sizes = [16, 1], strides = [1, 1]} : vector<16x128xf32> to vector<16x1xf32>
    %cst_10 = arith.constant 1.000000e+00 : f32
    %24 = vector.broadcast %cst_10 : f32 to vector<16x1xf32>
    %25 = arith.maximumf %23, %24 : vector<16x1xf32>
    %26 = tpu.reciprocal %25 {approx = true} : vector<16x1xf32> -> vector<16x1xf32>
    %27 = vector.extract_strided_slice %22 {offsets = [0, 0], sizes = [16, 32], strides = [1, 1]} : vector<16x128xf32> to vector<16x32xf32>
    %28 = vector.broadcast %26 : vector<16x1xf32> to vector<16x32xf32>
    %29 = arith.mulf %27, %28 : vector<16x32xf32>
    %c0_11 = arith.constant 0 : index
    %c0_12 = arith.constant 0 : index
    %c0_13 = arith.constant 0 : index
    %30 = vector.load %arg5[%c0_11, %c0_12, %c0_13] : memref<1x16x32xf32, #tpu.memory_space<vmem>>, vector<1x16x32xf32>
    %31 = vector.shape_cast %30 : vector<1x16x32xf32> to vector<16x32xf32>
    %32 = arith.addf %29, %31 : vector<16x32xf32>
    %c0_14 = arith.constant 0 : index
    %c0_15 = arith.constant 0 : index
    %c0_16 = arith.constant 0 : index
    %33 = vector.load %arg6[%c0_14, %c0_15, %c0_16] : memref<1x16x32xf32, #tpu.memory_space<vmem>>, vector<1x16x32xf32>
    %34 = vector.shape_cast %33 : vector<1x16x32xf32> to vector<16x32xf32>
    %35 = vector.shape_cast %32 : vector<16x32xf32> to vector<1x16x32xf32>
    tpu.vector_store %arg6[%c0_14, %c0_15, %c0_16], %35 {strides = array<i32>} : memref<1x16x32xf32, #tpu.memory_space<vmem>>, vector<1x16x32xf32>,
    return
  }
  func.func @transform_0(%arg0: i32) -> (i32, i32, i32) {
    %c0_i32 = arith.constant 0 : i32
    %c0_i32_0 = arith.constant 0 : i32
    %c0_i32_1 = arith.constant 0 : i32
    return %arg0, %c0_i32, %c0_i32_0 : i32, i32, i32
  }
  func.func @transform_1(%arg0: i32) -> (i32, i32, i32) {
    %c0_i32 = arith.constant 0 : i32
    %c0_i32_0 = arith.constant 0 : i32
    %c0_i32_1 = arith.constant 0 : i32
    return %arg0, %c0_i32, %c0_i32_0 : i32, i32, i32
  }
  func.func @transform_2(%arg0: i32) -> (i32, i32) {
    %c0_i32 = arith.constant 0 : i32
    %c0_i32_0 = arith.constant 0 : i32
    %c0_i32_1 = arith.constant 0 : i32
    return %c0_i32, %c0_i32_0 : i32, i32
  }
  func.func @transform_3(%arg0: i32) -> (i32, i32) {
    %c0_i32 = arith.constant 0 : i32
    %c0_i32_0 = arith.constant 0 : i32
    %c0_i32_1 = arith.constant 0 : i32
    return %c0_i32, %c0_i32_0 : i32, i32
  }
  func.func @transform_4(%arg0: i32) -> (i32, i32, i32) {
    %c0_i32 = arith.constant 0 : i32
    %c0_i32_0 = arith.constant 0 : i32
    %c0_i32_1 = arith.constant 0 : i32
    return %arg0, %c0_i32, %c0_i32_0 : i32, i32, i32
  }
  func.func @transform_5(%arg0: i32) -> (i32, i32, i32) {
    %c0_i32 = arith.constant 0 : i32
    %c0_i32_0 = arith.constant 0 : i32
    %c0_i32_1 = arith.constant 0 : i32
    return %arg0, %c0_i32, %c0_i32_0 : i32, i32, i32
  }
}

module attributes {stable_mosaic.version = 11 : i64} {
  func.func @_vit_stack_kernel(%arg0: i32, %arg1: i32, %arg2: memref<1x16x32xf32, #tpu.memory_space<vmem>>, %arg3: memref<1x1x32xf32, #tpu.memory_space<vmem>>, %arg4: memref<1x1x32xf32, #tpu.memory_space<vmem>>, %arg5: memref<1x32x96xbf16, #tpu.memory_space<vmem>>, %arg6: memref<1x1x96xf32, #tpu.memory_space<vmem>>, %arg7: memref<1x32x32xbf16, #tpu.memory_space<vmem>>, %arg8: memref<1x1x32xf32, #tpu.memory_space<vmem>>, %arg9: memref<1x1x32xf32, #tpu.memory_space<vmem>>, %arg10: memref<1x1x32xf32, #tpu.memory_space<vmem>>, %arg11: memref<1x32x128xbf16, #tpu.memory_space<vmem>>, %arg12: memref<1x1x128xf32, #tpu.memory_space<vmem>>, %arg13: memref<1x128x32xbf16, #tpu.memory_space<vmem>>, %arg14: memref<1x1x32xf32, #tpu.memory_space<vmem>>, %arg15: memref<1x32xf32, #tpu.memory_space<vmem>>, %arg16: memref<1x32xf32, #tpu.memory_space<vmem>>, %arg17: memref<32x10xbf16, #tpu.memory_space<vmem>>, %arg18: memref<1x10xf32, #tpu.memory_space<vmem>>, %arg19: memref<1x1x10xf32, #tpu.memory_space<vmem>>, %arg20: memref<1x16x32xf32, #tpu.memory_space<vmem>>, %arg21: memref<16x32xf32, #tpu.memory_space<vmem>>) attributes {dimension_semantics = [#tpu.dimension_semantics<parallel>, #tpu.dimension_semantics<arbitrary>], iteration_bounds = array<i64: 2, 2>, scalar_prefetch = 0 : i64, scratch_operands = 2 : i64, tpu.core_type = #tpu.core_type<tc>, window_params = [{transform_indices = @transform_0, window_bounds = array<i64: 1, 16, 32>}, {transform_indices = @transform_1, window_bounds = array<i64: 1, 1, 32>}, {transform_indices = @transform_2, window_bounds = array<i64: 1, 1, 32>}, {transform_indices = @transform_3, window_bounds = array<i64: 1, 32, 96>}, {transform_indices = @transform_4, window_bounds = array<i64: 1, 1, 96>}, {transform_indices = @transform_5, window_bounds = array<i64: 1, 32, 32>}, {transform_indices = @transform_6, window_bounds = array<i64: 1, 1, 32>}, {transform_indices = @transform_7, window_bounds = array<i64: 1, 1, 32>}, {transform_indices = @transform_8, window_bounds = array<i64: 1, 1, 32>}, {transform_indices = @transform_9, window_bounds = array<i64: 1, 32, 128>}, {transform_indices = @transform_10, window_bounds = array<i64: 1, 1, 128>}, {transform_indices = @transform_11, window_bounds = array<i64: 1, 128, 32>}, {transform_indices = @transform_12, window_bounds = array<i64: 1, 1, 32>}, {pipeline_mode = #tpu.pipeline_mode<synchronous>, transform_indices = @transform_13, window_bounds = array<i64: 1, 32>}, {pipeline_mode = #tpu.pipeline_mode<synchronous>, transform_indices = @transform_14, window_bounds = array<i64: 1, 32>}, {pipeline_mode = #tpu.pipeline_mode<synchronous>, transform_indices = @transform_15, window_bounds = array<i64: 32, 10>}, {pipeline_mode = #tpu.pipeline_mode<synchronous>, transform_indices = @transform_16, window_bounds = array<i64: 1, 10>}, {transform_indices = @transform_17, window_bounds = array<i64: 1, 1, 10>}]} {
    %c0_i32 = arith.constant 0 : i32
    %0 = arith.cmpi eq, %arg1, %c0_i32 : i32
    %1 = arith.extui %0 : i1 to i32
    %c0_i32_0 = arith.constant 0 : i32
    %2 = arith.cmpi ne, %1, %c0_i32_0 : i32
    scf.if %2 {
      %c0_87 = arith.constant 0 : index
      %c0_88 = arith.constant 0 : index
      %c0_89 = arith.constant 0 : index
      %213 = vector.load %arg2[%c0_87, %c0_88, %c0_89] : memref<1x16x32xf32, #tpu.memory_space<vmem>>, vector<1x16x32xf32>
      %c0_90 = arith.constant 0 : index
      %c0_91 = arith.constant 0 : index
      %c0_92 = arith.constant 0 : index
      %214 = vector.load %arg20[%c0_90, %c0_91, %c0_92] : memref<1x16x32xf32, #tpu.memory_space<vmem>>, vector<1x16x32xf32>
      tpu.vector_store %arg20[%c0_90, %c0_91, %c0_92], %213 {strides = array<i32>} : memref<1x16x32xf32, #tpu.memory_space<vmem>>, vector<1x16x32xf32>,
    } else {
    }
    %c0 = arith.constant 0 : index
    %c0_1 = arith.constant 0 : index
    %c0_2 = arith.constant 0 : index
    %3 = vector.load %arg20[%c0, %c0_1, %c0_2] : memref<1x16x32xf32, #tpu.memory_space<vmem>>, vector<1x16x32xf32>
    %4 = vector.shape_cast %3 : vector<1x16x32xf32> to vector<16x32xf32>
    %c0_3 = arith.constant 0 : index
    %c0_4 = arith.constant 0 : index
    %c0_5 = arith.constant 0 : index
    %5 = vector.load %arg3[%c0_3, %c0_4, %c0_5] : memref<1x1x32xf32, #tpu.memory_space<vmem>>, vector<1x1x32xf32>
    %6 = vector.shape_cast %5 : vector<1x1x32xf32> to vector<1x32xf32>
    %c0_6 = arith.constant 0 : index
    %c0_7 = arith.constant 0 : index
    %c0_8 = arith.constant 0 : index
    %7 = vector.load %arg4[%c0_6, %c0_7, %c0_8] : memref<1x1x32xf32, #tpu.memory_space<vmem>>, vector<1x1x32xf32>
    %8 = vector.shape_cast %7 : vector<1x1x32xf32> to vector<1x32xf32>
    %cst = arith.constant dense<0.000000e+00> : vector<16xf32>
    %9 = vector.multi_reduction <add>, %4, %cst [1] : vector<16x32xf32> to vector<16xf32>
    %10 = vector.shape_cast %9 : vector<16xf32> to vector<16x1xf32>
    %cst_9 = arith.constant 3.200000e+01 : f32
    %11 = vector.broadcast %cst_9 : f32 to vector<16x1xf32>
    %12 = arith.divf %10, %11 : vector<16x1xf32>
    %13 = vector.broadcast %12 : vector<16x1xf32> to vector<16x32xf32>
    %14 = arith.subf %4, %13 : vector<16x32xf32>
    %15 = arith.mulf %14, %14 : vector<16x32xf32>
    %cst_10 = arith.constant dense<0.000000e+00> : vector<16xf32>
    %16 = vector.multi_reduction <add>, %15, %cst_10 [1] : vector<16x32xf32> to vector<16xf32>
    %17 = vector.shape_cast %16 : vector<16xf32> to vector<16x1xf32>
    %cst_11 = arith.constant 3.200000e+01 : f32
    %18 = vector.broadcast %cst_11 : f32 to vector<16x1xf32>
    %19 = arith.divf %17, %18 : vector<16x1xf32>
    %cst_12 = arith.constant 9.99999997E-7 : f32
    %20 = vector.broadcast %cst_12 : f32 to vector<16x1xf32>
    %21 = arith.addf %19, %20 : vector<16x1xf32>
    %22 = math.rsqrt %21 : vector<16x1xf32>
    %23 = vector.broadcast %22 : vector<16x1xf32> to vector<16x32xf32>
    %24 = arith.mulf %14, %23 : vector<16x32xf32>
    %25 = vector.broadcast %6 : vector<1x32xf32> to vector<16x32xf32>
    %26 = arith.mulf %24, %25 : vector<16x32xf32>
    %27 = vector.broadcast %8 : vector<1x32xf32> to vector<16x32xf32>
    %28 = arith.addf %26, %27 : vector<16x32xf32>
    %29 = arith.truncf %28 : vector<16x32xf32> to vector<16x32xbf16>
    %c0_13 = arith.constant 0 : index
    %c0_14 = arith.constant 0 : index
    %c0_15 = arith.constant 0 : index
    %30 = vector.load %arg5[%c0_13, %c0_14, %c0_15] : memref<1x32x96xbf16, #tpu.memory_space<vmem>>, vector<1x32x96xbf16>
    %31 = vector.shape_cast %30 : vector<1x32x96xbf16> to vector<32x96xbf16>
    %cst_16 = arith.constant dense<0.000000e+00> : vector<16x96xf32>
    %32 = tpu.matmul %29, %31, %cst_16 {dimension_numbers = #tpu.dot_dimension_numbers<[1], [0], [0], [1], [0, 0, 1, 1], [], []>} : vector<16x32xbf16>, vector<32x96xbf16>, vector<16x96xf32> -> vector<16x96xf32>
    %c0_17 = arith.constant 0 : index
    %c0_18 = arith.constant 0 : index
    %c0_19 = arith.constant 0 : index
    %33 = vector.load %arg6[%c0_17, %c0_18, %c0_19] : memref<1x1x96xf32, #tpu.memory_space<vmem>>, vector<1x1x96xf32>
    %34 = vector.shape_cast %33 : vector<1x1x96xf32> to vector<1x96xf32>
    %35 = vector.broadcast %34 : vector<1x96xf32> to vector<16x96xf32>
    %36 = arith.addf %32, %35 : vector<16x96xf32>
    %37 = vector.extract_strided_slice %36 {offsets = [0, 0], sizes = [16, 32], strides = [1, 1]} : vector<16x96xf32> to vector<16x32xf32>
    %38 = vector.extract_strided_slice %36 {offsets = [0, 32], sizes = [16, 32], strides = [1, 1]} : vector<16x96xf32> to vector<16x32xf32>
    %39 = vector.extract_strided_slice %36 {offsets = [0, 64], sizes = [16, 32], strides = [1, 1]} : vector<16x96xf32> to vector<16x32xf32>
    %40 = vector.extract_strided_slice %37 {offsets = [0, 0], sizes = [16, 8], strides = [1, 1]} : vector<16x32xf32> to vector<16x8xf32>
    %41 = vector.shape_cast %40 : vector<16x8xf32> to vector<1x16x8xf32>
    %42 = vector.extract_strided_slice %38 {offsets = [0, 0], sizes = [16, 8], strides = [1, 1]} : vector<16x32xf32> to vector<16x8xf32>
    %43 = vector.shape_cast %42 : vector<16x8xf32> to vector<1x16x8xf32>
    %44 = vector.extract_strided_slice %39 {offsets = [0, 0], sizes = [16, 8], strides = [1, 1]} : vector<16x32xf32> to vector<16x8xf32>
    %45 = vector.shape_cast %44 : vector<16x8xf32> to vector<1x16x8xf32>
    %46 = arith.truncf %41 : vector<1x16x8xf32> to vector<1x16x8xbf16>
    %47 = arith.truncf %43 : vector<1x16x8xf32> to vector<1x16x8xbf16>
    "tpu.trace_start"() <{level = 10 : i32, message = "bnd,bmd->bnm"}> : () -> ()
    %cst_20 = arith.constant dense<0.000000e+00> : vector<1x16x16xf32>
    %48 = tpu.matmul %46, %47, %cst_20 {dimension_numbers = #tpu.dot_dimension_numbers<[2], [2], [1], [1], [0, 0, 0, 1, 1, 1], [0], [0]>} : vector<1x16x8xbf16>, vector<1x16x8xbf16>, vector<1x16x16xf32> -> vector<1x16x16xf32>
    "tpu.trace_stop"() : () -> ()
    %cst_21 = arith.constant 0.353553385 : f32
    %49 = vector.broadcast %cst_21 : f32 to vector<1x16x16xf32>
    %50 = arith.mulf %48, %49 : vector<1x16x16xf32>
    %cst_22 = arith.constant dense<0xFF800000> : vector<1x16xf32>
    %51 = vector.multi_reduction <maximumf>, %50, %cst_22 [2] : vector<1x16x16xf32> to vector<1x16xf32>
    %52 = vector.shape_cast %51 : vector<1x16xf32> to vector<1x16x1xf32>
    %53 = vector.broadcast %52 : vector<1x16x1xf32> to vector<1x16x16xf32>
    %54 = arith.subf %50, %53 : vector<1x16x16xf32>
    %55 = math.exp %54 : vector<1x16x16xf32>
    %cst_23 = arith.constant dense<0.000000e+00> : vector<1x16xf32>
    %56 = vector.multi_reduction <add>, %55, %cst_23 [2] : vector<1x16x16xf32> to vector<1x16xf32>
    %57 = vector.shape_cast %56 : vector<1x16xf32> to vector<1x16x1xf32>
    %58 = tpu.reciprocal %57 {approx = true} : vector<1x16x1xf32> -> vector<1x16x1xf32>
    %59 = vector.broadcast %58 : vector<1x16x1xf32> to vector<1x16x16xf32>
    %60 = arith.mulf %55, %59 : vector<1x16x16xf32>
    %61 = arith.truncf %60 : vector<1x16x16xf32> to vector<1x16x16xbf16>
    %62 = arith.truncf %45 : vector<1x16x8xf32> to vector<1x16x8xbf16>
    "tpu.trace_start"() <{level = 10 : i32, message = "bnm,bmd->bnd"}> : () -> ()
    %cst_24 = arith.constant dense<0.000000e+00> : vector<1x16x8xf32>
    %63 = tpu.matmul %61, %62, %cst_24 {dimension_numbers = #tpu.dot_dimension_numbers<[2], [1], [1], [2], [0, 0, 0, 1, 1, 2], [0], [0]>} : vector<1x16x16xbf16>, vector<1x16x8xbf16>, vector<1x16x8xf32> -> vector<1x16x8xf32>
    "tpu.trace_stop"() : () -> ()
    %64 = vector.shape_cast %63 : vector<1x16x8xf32> to vector<16x8xf32>
    %c0_25 = arith.constant 0 : index
    %c0_26 = arith.constant 0 : index
    %65 = vector.load %arg21[%c0_25, %c0_26] : memref<16x32xf32, #tpu.memory_space<vmem>>, vector<16x8xf32>
    tpu.vector_store %arg21[%c0_25, %c0_26], %64 {strides = array<i32>} : memref<16x32xf32, #tpu.memory_space<vmem>>, vector<16x8xf32>,
    %66 = vector.extract_strided_slice %37 {offsets = [0, 8], sizes = [16, 8], strides = [1, 1]} : vector<16x32xf32> to vector<16x8xf32>
    %67 = vector.shape_cast %66 : vector<16x8xf32> to vector<1x16x8xf32>
    %68 = vector.extract_strided_slice %38 {offsets = [0, 8], sizes = [16, 8], strides = [1, 1]} : vector<16x32xf32> to vector<16x8xf32>
    %69 = vector.shape_cast %68 : vector<16x8xf32> to vector<1x16x8xf32>
    %70 = vector.extract_strided_slice %39 {offsets = [0, 8], sizes = [16, 8], strides = [1, 1]} : vector<16x32xf32> to vector<16x8xf32>
    %71 = vector.shape_cast %70 : vector<16x8xf32> to vector<1x16x8xf32>
    %72 = arith.truncf %67 : vector<1x16x8xf32> to vector<1x16x8xbf16>
    %73 = arith.truncf %69 : vector<1x16x8xf32> to vector<1x16x8xbf16>
    "tpu.trace_start"() <{level = 10 : i32, message = "bnd,bmd->bnm"}> : () -> ()
    %cst_27 = arith.constant dense<0.000000e+00> : vector<1x16x16xf32>
    %74 = tpu.matmul %72, %73, %cst_27 {dimension_numbers = #tpu.dot_dimension_numbers<[2], [2], [1], [1], [0, 0, 0, 1, 1, 1], [0], [0]>} : vector<1x16x8xbf16>, vector<1x16x8xbf16>, vector<1x16x16xf32> -> vector<1x16x16xf32>
    "tpu.trace_stop"() : () -> ()
    %cst_28 = arith.constant 0.353553385 : f32
    %75 = vector.broadcast %cst_28 : f32 to vector<1x16x16xf32>
    %76 = arith.mulf %74, %75 : vector<1x16x16xf32>
    %cst_29 = arith.constant dense<0xFF800000> : vector<1x16xf32>
    %77 = vector.multi_reduction <maximumf>, %76, %cst_29 [2] : vector<1x16x16xf32> to vector<1x16xf32>
    %78 = vector.shape_cast %77 : vector<1x16xf32> to vector<1x16x1xf32>
    %79 = vector.broadcast %78 : vector<1x16x1xf32> to vector<1x16x16xf32>
    %80 = arith.subf %76, %79 : vector<1x16x16xf32>
    %81 = math.exp %80 : vector<1x16x16xf32>
    %cst_30 = arith.constant dense<0.000000e+00> : vector<1x16xf32>
    %82 = vector.multi_reduction <add>, %81, %cst_30 [2] : vector<1x16x16xf32> to vector<1x16xf32>
    %83 = vector.shape_cast %82 : vector<1x16xf32> to vector<1x16x1xf32>
    %84 = tpu.reciprocal %83 {approx = true} : vector<1x16x1xf32> -> vector<1x16x1xf32>
    %85 = vector.broadcast %84 : vector<1x16x1xf32> to vector<1x16x16xf32>
    %86 = arith.mulf %81, %85 : vector<1x16x16xf32>
    %87 = arith.truncf %86 : vector<1x16x16xf32> to vector<1x16x16xbf16>
    %88 = arith.truncf %71 : vector<1x16x8xf32> to vector<1x16x8xbf16>
    "tpu.trace_start"() <{level = 10 : i32, message = "bnm,bmd->bnd"}> : () -> ()
    %cst_31 = arith.constant dense<0.000000e+00> : vector<1x16x8xf32>
    %89 = tpu.matmul %87, %88, %cst_31 {dimension_numbers = #tpu.dot_dimension_numbers<[2], [1], [1], [2], [0, 0, 0, 1, 1, 2], [0], [0]>} : vector<1x16x16xbf16>, vector<1x16x8xbf16>, vector<1x16x8xf32> -> vector<1x16x8xf32>
    "tpu.trace_stop"() : () -> ()
    %90 = vector.shape_cast %89 : vector<1x16x8xf32> to vector<16x8xf32>
    %c0_32 = arith.constant 0 : index
    %c8 = arith.constant 8 : index
    %91 = vector.load %arg21[%c0_32, %c8] : memref<16x32xf32, #tpu.memory_space<vmem>>, vector<16x8xf32>
    tpu.vector_store %arg21[%c0_32, %c8], %90 {strides = array<i32>} : memref<16x32xf32, #tpu.memory_space<vmem>>, vector<16x8xf32>,
    %92 = vector.extract_strided_slice %37 {offsets = [0, 16], sizes = [16, 8], strides = [1, 1]} : vector<16x32xf32> to vector<16x8xf32>
    %93 = vector.shape_cast %92 : vector<16x8xf32> to vector<1x16x8xf32>
    %94 = vector.extract_strided_slice %38 {offsets = [0, 16], sizes = [16, 8], strides = [1, 1]} : vector<16x32xf32> to vector<16x8xf32>
    %95 = vector.shape_cast %94 : vector<16x8xf32> to vector<1x16x8xf32>
    %96 = vector.extract_strided_slice %39 {offsets = [0, 16], sizes = [16, 8], strides = [1, 1]} : vector<16x32xf32> to vector<16x8xf32>
    %97 = vector.shape_cast %96 : vector<16x8xf32> to vector<1x16x8xf32>
    %98 = arith.truncf %93 : vector<1x16x8xf32> to vector<1x16x8xbf16>
    %99 = arith.truncf %95 : vector<1x16x8xf32> to vector<1x16x8xbf16>
    "tpu.trace_start"() <{level = 10 : i32, message = "bnd,bmd->bnm"}> : () -> ()
    %cst_33 = arith.constant dense<0.000000e+00> : vector<1x16x16xf32>
    %100 = tpu.matmul %98, %99, %cst_33 {dimension_numbers = #tpu.dot_dimension_numbers<[2], [2], [1], [1], [0, 0, 0, 1, 1, 1], [0], [0]>} : vector<1x16x8xbf16>, vector<1x16x8xbf16>, vector<1x16x16xf32> -> vector<1x16x16xf32>
    "tpu.trace_stop"() : () -> ()
    %cst_34 = arith.constant 0.353553385 : f32
    %101 = vector.broadcast %cst_34 : f32 to vector<1x16x16xf32>
    %102 = arith.mulf %100, %101 : vector<1x16x16xf32>
    %cst_35 = arith.constant dense<0xFF800000> : vector<1x16xf32>
    %103 = vector.multi_reduction <maximumf>, %102, %cst_35 [2] : vector<1x16x16xf32> to vector<1x16xf32>
    %104 = vector.shape_cast %103 : vector<1x16xf32> to vector<1x16x1xf32>
    %105 = vector.broadcast %104 : vector<1x16x1xf32> to vector<1x16x16xf32>
    %106 = arith.subf %102, %105 : vector<1x16x16xf32>
    %107 = math.exp %106 : vector<1x16x16xf32>
    %cst_36 = arith.constant dense<0.000000e+00> : vector<1x16xf32>
    %108 = vector.multi_reduction <add>, %107, %cst_36 [2] : vector<1x16x16xf32> to vector<1x16xf32>
    %109 = vector.shape_cast %108 : vector<1x16xf32> to vector<1x16x1xf32>
    %110 = tpu.reciprocal %109 {approx = true} : vector<1x16x1xf32> -> vector<1x16x1xf32>
    %111 = vector.broadcast %110 : vector<1x16x1xf32> to vector<1x16x16xf32>
    %112 = arith.mulf %107, %111 : vector<1x16x16xf32>
    %113 = arith.truncf %112 : vector<1x16x16xf32> to vector<1x16x16xbf16>
    %114 = arith.truncf %97 : vector<1x16x8xf32> to vector<1x16x8xbf16>
    "tpu.trace_start"() <{level = 10 : i32, message = "bnm,bmd->bnd"}> : () -> ()
    %cst_37 = arith.constant dense<0.000000e+00> : vector<1x16x8xf32>
    %115 = tpu.matmul %113, %114, %cst_37 {dimension_numbers = #tpu.dot_dimension_numbers<[2], [1], [1], [2], [0, 0, 0, 1, 1, 2], [0], [0]>} : vector<1x16x16xbf16>, vector<1x16x8xbf16>, vector<1x16x8xf32> -> vector<1x16x8xf32>
    "tpu.trace_stop"() : () -> ()
    %116 = vector.shape_cast %115 : vector<1x16x8xf32> to vector<16x8xf32>
    %c0_38 = arith.constant 0 : index
    %c16 = arith.constant 16 : index
    %117 = vector.load %arg21[%c0_38, %c16] : memref<16x32xf32, #tpu.memory_space<vmem>>, vector<16x8xf32>
    tpu.vector_store %arg21[%c0_38, %c16], %116 {strides = array<i32>} : memref<16x32xf32, #tpu.memory_space<vmem>>, vector<16x8xf32>,
    %118 = vector.extract_strided_slice %37 {offsets = [0, 24], sizes = [16, 8], strides = [1, 1]} : vector<16x32xf32> to vector<16x8xf32>
    %119 = vector.shape_cast %118 : vector<16x8xf32> to vector<1x16x8xf32>
    %120 = vector.extract_strided_slice %38 {offsets = [0, 24], sizes = [16, 8], strides = [1, 1]} : vector<16x32xf32> to vector<16x8xf32>
    %121 = vector.shape_cast %120 : vector<16x8xf32> to vector<1x16x8xf32>
    %122 = vector.extract_strided_slice %39 {offsets = [0, 24], sizes = [16, 8], strides = [1, 1]} : vector<16x32xf32> to vector<16x8xf32>
    %123 = vector.shape_cast %122 : vector<16x8xf32> to vector<1x16x8xf32>
    %124 = arith.truncf %119 : vector<1x16x8xf32> to vector<1x16x8xbf16>
    %125 = arith.truncf %121 : vector<1x16x8xf32> to vector<1x16x8xbf16>
    "tpu.trace_start"() <{level = 10 : i32, message = "bnd,bmd->bnm"}> : () -> ()
    %cst_39 = arith.constant dense<0.000000e+00> : vector<1x16x16xf32>
    %126 = tpu.matmul %124, %125, %cst_39 {dimension_numbers = #tpu.dot_dimension_numbers<[2], [2], [1], [1], [0, 0, 0, 1, 1, 1], [0], [0]>} : vector<1x16x8xbf16>, vector<1x16x8xbf16>, vector<1x16x16xf32> -> vector<1x16x16xf32>
    "tpu.trace_stop"() : () -> ()
    %cst_40 = arith.constant 0.353553385 : f32
    %127 = vector.broadcast %cst_40 : f32 to vector<1x16x16xf32>
    %128 = arith.mulf %126, %127 : vector<1x16x16xf32>
    %cst_41 = arith.constant dense<0xFF800000> : vector<1x16xf32>
    %129 = vector.multi_reduction <maximumf>, %128, %cst_41 [2] : vector<1x16x16xf32> to vector<1x16xf32>
    %130 = vector.shape_cast %129 : vector<1x16xf32> to vector<1x16x1xf32>
    %131 = vector.broadcast %130 : vector<1x16x1xf32> to vector<1x16x16xf32>
    %132 = arith.subf %128, %131 : vector<1x16x16xf32>
    %133 = math.exp %132 : vector<1x16x16xf32>
    %cst_42 = arith.constant dense<0.000000e+00> : vector<1x16xf32>
    %134 = vector.multi_reduction <add>, %133, %cst_42 [2] : vector<1x16x16xf32> to vector<1x16xf32>
    %135 = vector.shape_cast %134 : vector<1x16xf32> to vector<1x16x1xf32>
    %136 = tpu.reciprocal %135 {approx = true} : vector<1x16x1xf32> -> vector<1x16x1xf32>
    %137 = vector.broadcast %136 : vector<1x16x1xf32> to vector<1x16x16xf32>
    %138 = arith.mulf %133, %137 : vector<1x16x16xf32>
    %139 = arith.truncf %138 : vector<1x16x16xf32> to vector<1x16x16xbf16>
    %140 = arith.truncf %123 : vector<1x16x8xf32> to vector<1x16x8xbf16>
    "tpu.trace_start"() <{level = 10 : i32, message = "bnm,bmd->bnd"}> : () -> ()
    %cst_43 = arith.constant dense<0.000000e+00> : vector<1x16x8xf32>
    %141 = tpu.matmul %139, %140, %cst_43 {dimension_numbers = #tpu.dot_dimension_numbers<[2], [1], [1], [2], [0, 0, 0, 1, 1, 2], [0], [0]>} : vector<1x16x16xbf16>, vector<1x16x8xbf16>, vector<1x16x8xf32> -> vector<1x16x8xf32>
    "tpu.trace_stop"() : () -> ()
    %142 = vector.shape_cast %141 : vector<1x16x8xf32> to vector<16x8xf32>
    %c0_44 = arith.constant 0 : index
    %c24 = arith.constant 24 : index
    %143 = vector.load %arg21[%c0_44, %c24] : memref<16x32xf32, #tpu.memory_space<vmem>>, vector<16x8xf32>
    tpu.vector_store %arg21[%c0_44, %c24], %142 {strides = array<i32>} : memref<16x32xf32, #tpu.memory_space<vmem>>, vector<16x8xf32>,
    %c0_45 = arith.constant 0 : index
    %c0_46 = arith.constant 0 : index
    %144 = vector.load %arg21[%c0_45, %c0_46] : memref<16x32xf32, #tpu.memory_space<vmem>>, vector<16x32xf32>
    %145 = arith.truncf %144 : vector<16x32xf32> to vector<16x32xbf16>
    %c0_47 = arith.constant 0 : index
    %c0_48 = arith.constant 0 : index
    %c0_49 = arith.constant 0 : index
    %146 = vector.load %arg7[%c0_47, %c0_48, %c0_49] : memref<1x32x32xbf16, #tpu.memory_space<vmem>>, vector<1x32x32xbf16>
    %147 = vector.shape_cast %146 : vector<1x32x32xbf16> to vector<32x32xbf16>
    %cst_50 = arith.constant dense<0.000000e+00> : vector<16x32xf32>
    %148 = tpu.matmul %145, %147, %cst_50 {dimension_numbers = #tpu.dot_dimension_numbers<[1], [0], [0], [1], [0, 0, 1, 1], [], []>} : vector<16x32xbf16>, vector<32x32xbf16>, vector<16x32xf32> -> vector<16x32xf32>
    %c0_51 = arith.constant 0 : index
    %c0_52 = arith.constant 0 : index
    %c0_53 = arith.constant 0 : index
    %149 = vector.load %arg8[%c0_51, %c0_52, %c0_53] : memref<1x1x32xf32, #tpu.memory_space<vmem>>, vector<1x1x32xf32>
    %150 = vector.shape_cast %149 : vector<1x1x32xf32> to vector<1x32xf32>
    %151 = vector.broadcast %150 : vector<1x32xf32> to vector<16x32xf32>
    %152 = arith.addf %148, %151 : vector<16x32xf32>
    %153 = arith.addf %4, %152 : vector<16x32xf32>
    %c0_54 = arith.constant 0 : index
    %c0_55 = arith.constant 0 : index
    %c0_56 = arith.constant 0 : index
    %154 = vector.load %arg9[%c0_54, %c0_55, %c0_56] : memref<1x1x32xf32, #tpu.memory_space<vmem>>, vector<1x1x32xf32>
    %155 = vector.shape_cast %154 : vector<1x1x32xf32> to vector<1x32xf32>
    %c0_57 = arith.constant 0 : index
    %c0_58 = arith.constant 0 : index
    %c0_59 = arith.constant 0 : index
    %156 = vector.load %arg10[%c0_57, %c0_58, %c0_59] : memref<1x1x32xf32, #tpu.memory_space<vmem>>, vector<1x1x32xf32>
    %157 = vector.shape_cast %156 : vector<1x1x32xf32> to vector<1x32xf32>
    %cst_60 = arith.constant dense<0.000000e+00> : vector<16xf32>
    %158 = vector.multi_reduction <add>, %153, %cst_60 [1] : vector<16x32xf32> to vector<16xf32>
    %159 = vector.shape_cast %158 : vector<16xf32> to vector<16x1xf32>
    %cst_61 = arith.constant 3.200000e+01 : f32
    %160 = vector.broadcast %cst_61 : f32 to vector<16x1xf32>
    %161 = arith.divf %159, %160 : vector<16x1xf32>
    %162 = vector.broadcast %161 : vector<16x1xf32> to vector<16x32xf32>
    %163 = arith.subf %153, %162 : vector<16x32xf32>
    %164 = arith.mulf %163, %163 : vector<16x32xf32>
    %cst_62 = arith.constant dense<0.000000e+00> : vector<16xf32>
    %165 = vector.multi_reduction <add>, %164, %cst_62 [1] : vector<16x32xf32> to vector<16xf32>
    %166 = vector.shape_cast %165 : vector<16xf32> to vector<16x1xf32>
    %cst_63 = arith.constant 3.200000e+01 : f32
    %167 = vector.broadcast %cst_63 : f32 to vector<16x1xf32>
    %168 = arith.divf %166, %167 : vector<16x1xf32>
    %cst_64 = arith.constant 9.99999997E-7 : f32
    %169 = vector.broadcast %cst_64 : f32 to vector<16x1xf32>
    %170 = arith.addf %168, %169 : vector<16x1xf32>
    %171 = math.rsqrt %170 : vector<16x1xf32>
    %172 = vector.broadcast %171 : vector<16x1xf32> to vector<16x32xf32>
    %173 = arith.mulf %163, %172 : vector<16x32xf32>
    %174 = vector.broadcast %155 : vector<1x32xf32> to vector<16x32xf32>
    %175 = arith.mulf %173, %174 : vector<16x32xf32>
    %176 = vector.broadcast %157 : vector<1x32xf32> to vector<16x32xf32>
    %177 = arith.addf %175, %176 : vector<16x32xf32>
    %178 = arith.truncf %177 : vector<16x32xf32> to vector<16x32xbf16>
    %c0_65 = arith.constant 0 : index
    %c0_66 = arith.constant 0 : index
    %c0_67 = arith.constant 0 : index
    %179 = vector.load %arg11[%c0_65, %c0_66, %c0_67] : memref<1x32x128xbf16, #tpu.memory_space<vmem>>, vector<1x32x128xbf16>
    %180 = vector.shape_cast %179 : vector<1x32x128xbf16> to vector<32x128xbf16>
    %cst_68 = arith.constant dense<0.000000e+00> : vector<16x128xf32>
    %181 = tpu.matmul %178, %180, %cst_68 {dimension_numbers = #tpu.dot_dimension_numbers<[1], [0], [0], [1], [0, 0, 1, 1], [], []>} : vector<16x32xbf16>, vector<32x128xbf16>, vector<16x128xf32> -> vector<16x128xf32>
    %c0_69 = arith.constant 0 : index
    %c0_70 = arith.constant 0 : index
    %c0_71 = arith.constant 0 : index
    %182 = vector.load %arg12[%c0_69, %c0_70, %c0_71] : memref<1x1x128xf32, #tpu.memory_space<vmem>>, vector<1x1x128xf32>
    %183 = vector.shape_cast %182 : vector<1x1x128xf32> to vector<1x128xf32>
    %184 = vector.broadcast %183 : vector<1x128xf32> to vector<16x128xf32>
    %185 = arith.addf %181, %184 : vector<16x128xf32>
    %186 = arith.mulf %185, %185 : vector<16x128xf32>
    %187 = arith.mulf %185, %186 : vector<16x128xf32>
    %cst_72 = arith.constant 4.471500e-02 : f32
    %188 = vector.broadcast %cst_72 : f32 to vector<16x128xf32>
    %189 = arith.mulf %188, %187 : vector<16x128xf32>
    %190 = arith.addf %185, %189 : vector<16x128xf32>
    %cst_73 = arith.constant 0.797884583 : f32
    %191 = vector.broadcast %cst_73 : f32 to vector<16x128xf32>
    %192 = arith.mulf %191, %190 : vector<16x128xf32>
    %193 = math.tanh %192 : vector<16x128xf32>
    %cst_74 = arith.constant 1.000000e+00 : f32
    %194 = vector.broadcast %cst_74 : f32 to vector<16x128xf32>
    %195 = arith.addf %194, %193 : vector<16x128xf32>
    %cst_75 = arith.constant 5.000000e-01 : f32
    %196 = vector.broadcast %cst_75 : f32 to vector<16x128xf32>
    %197 = arith.mulf %196, %195 : vector<16x128xf32>
    %198 = arith.mulf %185, %197 : vector<16x128xf32>
    %199 = arith.truncf %198 : vector<16x128xf32> to vector<16x128xbf16>
    %c0_76 = arith.constant 0 : index
    %c0_77 = arith.constant 0 : index
    %c0_78 = arith.constant 0 : index
    %200 = vector.load %arg13[%c0_76, %c0_77, %c0_78] : memref<1x128x32xbf16, #tpu.memory_space<vmem>>, vector<1x128x32xbf16>
    %201 = vector.shape_cast %200 : vector<1x128x32xbf16> to vector<128x32xbf16>
    %cst_79 = arith.constant dense<0.000000e+00> : vector<16x32xf32>
    %202 = tpu.matmul %199, %201, %cst_79 {dimension_numbers = #tpu.dot_dimension_numbers<[1], [0], [0], [1], [0, 0, 1, 1], [], []>} : vector<16x128xbf16>, vector<128x32xbf16>, vector<16x32xf32> -> vector<16x32xf32>
    %c0_80 = arith.constant 0 : index
    %c0_81 = arith.constant 0 : index
    %c0_82 = arith.constant 0 : index
    %203 = vector.load %arg14[%c0_80, %c0_81, %c0_82] : memref<1x1x32xf32, #tpu.memory_space<vmem>>, vector<1x1x32xf32>
    %204 = vector.shape_cast %203 : vector<1x1x32xf32> to vector<1x32xf32>
    %205 = vector.broadcast %204 : vector<1x32xf32> to vector<16x32xf32>
    %206 = arith.addf %202, %205 : vector<16x32xf32>
    %207 = arith.addf %153, %206 : vector<16x32xf32>
    %208 = vector.shape_cast %207 : vector<16x32xf32> to vector<1x16x32xf32>
    %c0_83 = arith.constant 0 : index
    %c0_84 = arith.constant 0 : index
    %c0_85 = arith.constant 0 : index
    %209 = vector.load %arg20[%c0_83, %c0_84, %c0_85] : memref<1x16x32xf32, #tpu.memory_space<vmem>>, vector<1x16x32xf32>
    tpu.vector_store %arg20[%c0_83, %c0_84, %c0_85], %208 {strides = array<i32>} : memref<1x16x32xf32, #tpu.memory_space<vmem>>, vector<1x16x32xf32>,
    %c1_i32 = arith.constant 1 : i32
    %210 = arith.cmpi eq, %arg1, %c1_i32 : i32
    %211 = arith.extui %210 : i1 to i32
    %c0_i32_86 = arith.constant 0 : i32
    %212 = arith.cmpi ne, %211, %c0_i32_86 : i32
    scf.if %212 {
      %213 = vector.shape_cast %207 : vector<16x32xf32> to vector<1x16x32xf32>
      %214 = vector.extract_strided_slice %213 {offsets = [0, 0, 0], sizes = [1, 1, 32], strides = [1, 1, 1]} : vector<1x16x32xf32> to vector<1x1x32xf32>
      %215 = vector.shape_cast %214 : vector<1x1x32xf32> to vector<1x32xf32>
      %c0_87 = arith.constant 0 : index
      %c0_88 = arith.constant 0 : index
      %216 = vector.load %arg15[%c0_87, %c0_88] : memref<1x32xf32, #tpu.memory_space<vmem>>, vector<1x32xf32>
      %c0_89 = arith.constant 0 : index
      %c0_90 = arith.constant 0 : index
      %217 = vector.load %arg16[%c0_89, %c0_90] : memref<1x32xf32, #tpu.memory_space<vmem>>, vector<1x32xf32>
      %cst_91 = arith.constant dense<0.000000e+00> : vector<1xf32>
      %218 = vector.multi_reduction <add>, %215, %cst_91 [1] : vector<1x32xf32> to vector<1xf32>
      %219 = vector.shape_cast %218 : vector<1xf32> to vector<1x1xf32>
      %cst_92 = arith.constant 3.200000e+01 : f32
      %220 = vector.broadcast %cst_92 : f32 to vector<1x1xf32>
      %221 = arith.divf %219, %220 : vector<1x1xf32>
      %222 = vector.broadcast %221 : vector<1x1xf32> to vector<1x32xf32>
      %223 = arith.subf %215, %222 : vector<1x32xf32>
      %224 = arith.mulf %223, %223 : vector<1x32xf32>
      %cst_93 = arith.constant dense<0.000000e+00> : vector<1xf32>
      %225 = vector.multi_reduction <add>, %224, %cst_93 [1] : vector<1x32xf32> to vector<1xf32>
      %226 = vector.shape_cast %225 : vector<1xf32> to vector<1x1xf32>
      %cst_94 = arith.constant 3.200000e+01 : f32
      %227 = vector.broadcast %cst_94 : f32 to vector<1x1xf32>
      %228 = arith.divf %226, %227 : vector<1x1xf32>
      %cst_95 = arith.constant 9.99999997E-7 : f32
      %229 = vector.broadcast %cst_95 : f32 to vector<1x1xf32>
      %230 = arith.addf %228, %229 : vector<1x1xf32>
      %231 = math.rsqrt %230 : vector<1x1xf32>
      %232 = vector.broadcast %231 : vector<1x1xf32> to vector<1x32xf32>
      %233 = arith.mulf %223, %232 : vector<1x32xf32>
      %234 = arith.mulf %233, %216 : vector<1x32xf32>
      %235 = arith.addf %234, %217 : vector<1x32xf32>
      %236 = arith.truncf %235 : vector<1x32xf32> to vector<1x32xbf16>
      %c0_96 = arith.constant 0 : index
      %c0_97 = arith.constant 0 : index
      %237 = vector.load %arg17[%c0_96, %c0_97] : memref<32x10xbf16, #tpu.memory_space<vmem>>, vector<32x10xbf16>
      %cst_98 = arith.constant dense<0.000000e+00> : vector<1x10xf32>
      %238 = tpu.matmul %236, %237, %cst_98 {dimension_numbers = #tpu.dot_dimension_numbers<[1], [0], [0], [1], [0, 0, 1, 1], [], []>} : vector<1x32xbf16>, vector<32x10xbf16>, vector<1x10xf32> -> vector<1x10xf32>
      %c0_99 = arith.constant 0 : index
      %c0_100 = arith.constant 0 : index
      %239 = vector.load %arg18[%c0_99, %c0_100] : memref<1x10xf32, #tpu.memory_space<vmem>>, vector<1x10xf32>
      %240 = arith.addf %238, %239 : vector<1x10xf32>
      %c0_101 = arith.constant 0 : index
      %c0_102 = arith.constant 0 : index
      %c0_103 = arith.constant 0 : index
      %241 = vector.load %arg19[%c0_101, %c0_102, %c0_103] : memref<1x1x10xf32, #tpu.memory_space<vmem>>, vector<1x1x10xf32>
      %242 = vector.shape_cast %241 : vector<1x1x10xf32> to vector<1x10xf32>
      %243 = vector.shape_cast %240 : vector<1x10xf32> to vector<1x1x10xf32>
      tpu.vector_store %arg19[%c0_101, %c0_102, %c0_103], %243 {strides = array<i32>} : memref<1x1x10xf32, #tpu.memory_space<vmem>>, vector<1x1x10xf32>,
    } else {
    }
    return
  }
  func.func @transform_0(%arg0: i32, %arg1: i32) -> (i32, i32, i32) {
    %c0_i32 = arith.constant 0 : i32
    %c0_i32_0 = arith.constant 0 : i32
    %c0_i32_1 = arith.constant 0 : i32
    return %arg0, %c0_i32, %c0_i32_0 : i32, i32, i32
  }
  func.func @transform_1(%arg0: i32, %arg1: i32) -> (i32, i32, i32) {
    %c0_i32 = arith.constant 0 : i32
    %c0_i32_0 = arith.constant 0 : i32
    %c0_i32_1 = arith.constant 0 : i32
    return %arg1, %c0_i32, %c0_i32_0 : i32, i32, i32
  }
  func.func @transform_2(%arg0: i32, %arg1: i32) -> (i32, i32, i32) {
    %c0_i32 = arith.constant 0 : i32
    %c0_i32_0 = arith.constant 0 : i32
    %c0_i32_1 = arith.constant 0 : i32
    return %arg1, %c0_i32, %c0_i32_0 : i32, i32, i32
  }
  func.func @transform_3(%arg0: i32, %arg1: i32) -> (i32, i32, i32) {
    %c0_i32 = arith.constant 0 : i32
    %c0_i32_0 = arith.constant 0 : i32
    %c0_i32_1 = arith.constant 0 : i32
    return %arg1, %c0_i32, %c0_i32_0 : i32, i32, i32
  }
  func.func @transform_4(%arg0: i32, %arg1: i32) -> (i32, i32, i32) {
    %c0_i32 = arith.constant 0 : i32
    %c0_i32_0 = arith.constant 0 : i32
    %c0_i32_1 = arith.constant 0 : i32
    return %arg1, %c0_i32, %c0_i32_0 : i32, i32, i32
  }
  func.func @transform_5(%arg0: i32, %arg1: i32) -> (i32, i32, i32) {
    %c0_i32 = arith.constant 0 : i32
    %c0_i32_0 = arith.constant 0 : i32
    %c0_i32_1 = arith.constant 0 : i32
    return %arg1, %c0_i32, %c0_i32_0 : i32, i32, i32
  }
  func.func @transform_6(%arg0: i32, %arg1: i32) -> (i32, i32, i32) {
    %c0_i32 = arith.constant 0 : i32
    %c0_i32_0 = arith.constant 0 : i32
    %c0_i32_1 = arith.constant 0 : i32
    return %arg1, %c0_i32, %c0_i32_0 : i32, i32, i32
  }
  func.func @transform_7(%arg0: i32, %arg1: i32) -> (i32, i32, i32) {
    %c0_i32 = arith.constant 0 : i32
    %c0_i32_0 = arith.constant 0 : i32
    %c0_i32_1 = arith.constant 0 : i32
    return %arg1, %c0_i32, %c0_i32_0 : i32, i32, i32
  }
  func.func @transform_8(%arg0: i32, %arg1: i32) -> (i32, i32, i32) {
    %c0_i32 = arith.constant 0 : i32
    %c0_i32_0 = arith.constant 0 : i32
    %c0_i32_1 = arith.constant 0 : i32
    return %arg1, %c0_i32, %c0_i32_0 : i32, i32, i32
  }
  func.func @transform_9(%arg0: i32, %arg1: i32) -> (i32, i32, i32) {
    %c0_i32 = arith.constant 0 : i32
    %c0_i32_0 = arith.constant 0 : i32
    %c0_i32_1 = arith.constant 0 : i32
    return %arg1, %c0_i32, %c0_i32_0 : i32, i32, i32
  }
  func.func @transform_10(%arg0: i32, %arg1: i32) -> (i32, i32, i32) {
    %c0_i32 = arith.constant 0 : i32
    %c0_i32_0 = arith.constant 0 : i32
    %c0_i32_1 = arith.constant 0 : i32
    return %arg1, %c0_i32, %c0_i32_0 : i32, i32, i32
  }
  func.func @transform_11(%arg0: i32, %arg1: i32) -> (i32, i32, i32) {
    %c0_i32 = arith.constant 0 : i32
    %c0_i32_0 = arith.constant 0 : i32
    %c0_i32_1 = arith.constant 0 : i32
    return %arg1, %c0_i32, %c0_i32_0 : i32, i32, i32
  }
  func.func @transform_12(%arg0: i32, %arg1: i32) -> (i32, i32, i32) {
    %c0_i32 = arith.constant 0 : i32
    %c0_i32_0 = arith.constant 0 : i32
    %c0_i32_1 = arith.constant 0 : i32
    return %arg1, %c0_i32, %c0_i32_0 : i32, i32, i32
  }
  func.func @transform_13(%arg0: i32, %arg1: i32) -> (i32, i32) {
    %c0_i32 = arith.constant 0 : i32
    %c0_i32_0 = arith.constant 0 : i32
    %c0_i32_1 = arith.constant 0 : i32
    return %c0_i32, %c0_i32_0 : i32, i32
  }
  func.func @transform_14(%arg0: i32, %arg1: i32) -> (i32, i32) {
    %c0_i32 = arith.constant 0 : i32
    %c0_i32_0 = arith.constant 0 : i32
    %c0_i32_1 = arith.constant 0 : i32
    return %c0_i32, %c0_i32_0 : i32, i32
  }
  func.func @transform_15(%arg0: i32, %arg1: i32) -> (i32, i32) {
    %c0_i32 = arith.constant 0 : i32
    %c0_i32_0 = arith.constant 0 : i32
    %c0_i32_1 = arith.constant 0 : i32
    return %c0_i32, %c0_i32_0 : i32, i32
  }
  func.func @transform_16(%arg0: i32, %arg1: i32) -> (i32, i32) {
    %c0_i32 = arith.constant 0 : i32
    %c0_i32_0 = arith.constant 0 : i32
    %c0_i32_1 = arith.constant 0 : i32
    return %c0_i32, %c0_i32_0 : i32, i32
  }
  func.func @transform_17(%arg0: i32, %arg1: i32) -> (i32, i32, i32) {
    %c0_i32 = arith.constant 0 : i32
    %c0_i32_0 = arith.constant 0 : i32
    %c0_i32_1 = arith.constant 0 : i32
    return %arg0, %c0_i32, %c0_i32_0 : i32, i32, i32
  }
}

</mosaic_0001>

<bundles_post_ra>
// kernel: model_forward.6
= control target key start
LH: loop header
LB: loop body
LE: loop exit
PB: predicated region body
PF: predicated region fallthrough
CT: control target
= control target key end

     0   :  { %vm406_vm0 = vcmask 519168   ;;  %s1146_s0 = inlined_call_operand.vmem [shape: bf16[512,128], index: 0, kind: input, shape index: {}]   ;;  %s1147_s1 = inlined_call_operand.vmem [shape: f32[1,64], index: 1, kind: input, shape index: {}]   ;;  %s1148_s2 = inlined_call_operand.vmem [shape: f32[1,64], index: 2, kind: input, shape index: {}]   ;;  %s1149_s3 = inlined_call_operand.vmem [shape: bf16[512,64], index: 3, kind: output, shape index: {}]  }
   0x1   :  { %v476_v0 = vld [vmem:[%s1146_s0] sm:$0xff]   ;;  %v603_v5 = vld [vmem:[%s1146_s0 + $0x8] sm:$0xff]   ;;  %v604_v8 = vld [vmem:[%s1146_s0 + $0x10] sm:$0xff]  }
   0x2   :  { %v662_v1 = vld [vmem:[%s1147_s1] ss:$0 sm:$0xff]  ;;  %v477_v2 = vunpack.c.l.bf16 %v476_v0  ;;  %v478_v4 = vunpack.c.h.bf16 %v476_v0  ;;  %v481_v6 = vunpack.c.l.bf16 %v603_v5  ;;  %v482_v7 = vunpack.c.h.bf16 %v603_v5  ;;  %v605_v9 = vld [vmem:[%s1146_s0 + $0x18] sm:$0xff]   ;;  %v607_v39 = vld [vmem:[%s1146_s0 + $0x28] sm:$0xff]  }
   0x3   :  { %v667_v3 = vld [vmem:[%s1148_s2] ss:$0 sm:$0xff]  ;;  %v485_v12 = vunpack.c.l.bf16 %v604_v8  ;;  %v486_v13 = vunpack.c.h.bf16 %v604_v8  ;;  %v489_v16 = vunpack.c.l.bf16 %v605_v9  ;;  %v490_v17 = vunpack.c.h.bf16 %v605_v9  ;;  %v608_v44 = vld [vmem:[%s1146_s0 + $0x30] sm:$0xff]   ;;  %v609_v49 = vld [vmem:[%s1146_s0 + $0x38] sm:$0xff]  }
   0x4   :  { %v146_v10 = vmul.f32 %v662_v1, %v477_v2  ;;  %v147_v11 = vmul.f32 %v662_v1, %v478_v4  ;;  %v148_v14 = vmul.f32 %v662_v1, %v481_v6  ;;  %v149_v15 = vmul.f32 %v662_v1, %v482_v7  ;;  %v606_v34 = vld [vmem:[%s1146_s0 + $0x20] sm:$0xff]  }
   0x5   :  { %v150_v20 = vmul.f32 %v662_v1, %v485_v12  ;;  %v151_v21 = vmul.f32 %v662_v1, %v486_v13  ;;  %v152_v24 = vmul.f32 %v662_v1, %v489_v16  ;;  %v153_v25 = vmul.f32 %v662_v1, %v490_v17  ;;  %v610_v16 = vld [vmem:[%s1146_s0 + $0x40] sm:$0xff]  }
   0x6   :  { %v214_v18 = vadd.f32 %v667_v3, %v146_v10  ;;  %v215_v19 = vadd.f32 %v667_v3, %v147_v11  ;;  %v216_v22 = vadd.f32 %v667_v3, %v148_v14  ;;  %v217_v23 = vadd.f32 %v667_v3, %v149_v15 }
   0x7   :  { %v218_v28 = vadd.f32 %v667_v3, %v150_v20  ;;  %v219_v29 = vadd.f32 %v667_v3, %v151_v21  ;;  %v220_v32 = vadd.f32 %v667_v3, %v152_v24  ;;  %v221_v33 = vadd.f32 %v667_v3, %v153_v25  ;;  %v611_v21 = vld [vmem:[%s1146_s0 + $0x48] sm:$0xff]  }
   0x8   :  { %v278_v26 = vmax.f32 %v214_v18, 0.0  ;;  %v279_v27 = vmax.f32 %v215_v19, 0.0  ;;  %v280_v30 = vmax.f32 %v216_v22, 0.0  ;;  %v281_v31 = vmax.f32 %v217_v23, 0.0 }
   0x9   :  { %v282_v37 = vmax.f32 %v218_v28, 0.0  ;;  %v283_v38 = vmax.f32 %v219_v29, 0.0  ;;  %v284_v42 = vmax.f32 %v220_v32, 0.0  ;;  %v285_v43 = vmax.f32 %v221_v33, 0.0 }
   0xa   :  { %v342_v35 = vpack.c.bf16 %v278_v26, %v278_v26  ;;  %v343_v36 = vpack.c.bf16 %v279_v27, %v279_v27  ;;  %v344_v40 = vpack.c.bf16 %v280_v30, %v280_v30  ;;  %v345_v41 = vpack.c.bf16 %v281_v31, %v281_v31  ;;  %v612_v26 = vld [vmem:[%s1146_s0 + $0x50] sm:$0xff]   ;;  %v613_v31 = vld [vmem:[%s1146_s0 + $0x58] sm:$0xff]  }
   0xb   :  { %v346_v45 = vpack.c.bf16 %v282_v37, %v282_v37  ;;  %v347_v46 = vpack.c.bf16 %v283_v38, %v283_v38  ;;  %v493_v47 = vunpack.c.l.bf16 %v606_v34  ;;  %v494_v48 = vunpack.c.h.bf16 %v606_v34 }
   0xc   :  { %407 = vst.msk [vmem:[%s1149_s3] sm:$0xf] %vm406_vm0, %v342_v35  ;;  %v348_v50 = vpack.c.bf16 %v284_v42, %v284_v42  ;;  %v349_v51 = vpack.c.bf16 %v285_v43, %v285_v43  ;;  %v497_v52 = vunpack.c.l.bf16 %v607_v39  ;;  %v498_v53 = vunpack.c.h.bf16 %v607_v39 }
   0xd   :  { %408 = vst.msk [vmem:[%s1149_s3 + $0x4] sm:$0xf] %vm406_vm0, %v343_v36  ;;  %v154_v54 = vmul.f32 %v662_v1, %v493_v47  ;;  %v155_v55 = vmul.f32 %v662_v1, %v494_v48  ;;  %v501_v56 = vunpack.c.l.bf16 %v608_v44  ;;  %v502_v57 = vunpack.c.h.bf16 %v608_v44 }
   0xe   :  { %409 = vst.msk [vmem:[%s1149_s3 + $0x8] sm:$0xf] %vm406_vm0, %v344_v40  ;;  %v156_v58 = vmul.f32 %v662_v1, %v497_v52  ;;  %v157_v59 = vmul.f32 %v662_v1, %v498_v53  ;;  %v505_v60 = vunpack.c.l.bf16 %v609_v49  ;;  %v506_v61 = vunpack.c.h.bf16 %v609_v49 }
   0xf   :  { %410 = vst.msk [vmem:[%s1149_s3 + $0xc] sm:$0xf] %vm406_vm0, %v345_v41  ;;  %v222_v62 = vadd.f32 %v667_v3, %v154_v54  ;;  %v223_v63 = vadd.f32 %v667_v3, %v155_v55  ;;  %v158_v0 = vmul.f32 %v662_v1, %v501_v56  ;;  %v159_v2 = vmul.f32 %v662_v1, %v502_v57 }
  0x10   :  { %411 = vst.msk [vmem:[%s1149_s3 + $0x10] sm:$0xf] %vm406_vm0, %v346_v45  ;;  %v224_v4 = vadd.f32 %v667_v3, %v156_v58  ;;  %v225_v5 = vadd.f32 %v667_v3, %v157_v59  ;;  %v160_v6 = vmul.f32 %v662_v1, %v505_v60  ;;  %v161_v7 = vmul.f32 %v662_v1, %v506_v61  ;;  %v614_v60 = vld [vmem:[%s1146_s0 + $0x60] sm:$0xff]  }
  0x11   :  { %412 = vst.msk [vmem:[%s1149_s3 + $0x14] sm:$0xf] %vm406_vm0, %v347_v46  ;;  %v286_v8 = vmax.f32 %v222_v62, 0.0  ;;  %v287_v9 = vmax.f32 %v223_v63, 0.0  ;;  %v226_v10 = vadd.f32 %v667_v3, %v158_v0  ;;  %v227_v11 = vadd.f32 %v667_v3, %v159_v2  ;;  %v615_v2 = vld [vmem:[%s1146_s0 + $0x68] sm:$0xff]  }
  0x12   :  { %413 = vst.msk [vmem:[%s1149_s3 + $0x18] sm:$0xf] %vm406_vm0, %v348_v50  ;;  %v288_v12 = vmax.f32 %v224_v4, 0.0  ;;  %v289_v13 = vmax.f32 %v225_v5, 0.0  ;;  %v228_v14 = vadd.f32 %v667_v3, %v160_v6  ;;  %v229_v15 = vadd.f32 %v667_v3, %v161_v7 }
  0x13   :  { %414 = vst.msk [vmem:[%s1149_s3 + $0x1c] sm:$0xf] %vm406_vm0, %v349_v51  ;;  %v350_v17 = vpack.c.bf16 %v286_v8, %v286_v8  ;;  %v351_v18 = vpack.c.bf16 %v287_v9, %v287_v9  ;;  %v290_v19 = vmax.f32 %v226_v10, 0.0  ;;  %v291_v20 = vmax.f32 %v227_v11, 0.0  ;;  %v616_v8 = vld [vmem:[%s1146_s0 + $0x70] sm:$0xff]  }
  0x14   :  { %v352_v22 = vpack.c.bf16 %v288_v12, %v288_v12  ;;  %v353_v23 = vpack.c.bf16 %v289_v13, %v289_v13  ;;  %v292_v24 = vmax.f32 %v228_v14, 0.0  ;;  %v293_v25 = vmax.f32 %v229_v15, 0.0  ;;  %v617_v13 = vld [vmem:[%s1146_s0 + $0x78] sm:$0xff]  }
  0x15   :  { %415 = vst.msk [vmem:[%s1149_s3 + $0x20] sm:$0xf] %vm406_vm0, %v350_v17  ;;  %v354_v27 = vpack.c.bf16 %v290_v19, %v290_v19  ;;  %v355_v28 = vpack.c.bf16 %v291_v20, %v291_v20  ;;  %v509_v29 = vunpack.c.l.bf16 %v610_v16  ;;  %v510_v30 = vunpack.c.h.bf16 %v610_v16 }
  0x16   :  { %416 = vst.msk [vmem:[%s1149_s3 + $0x24] sm:$0xf] %vm406_vm0, %v351_v18  ;;  %v356_v32 = vpack.c.bf16 %v292_v24, %v292_v24  ;;  %v357_v33 = vpack.c.bf16 %v293_v25, %v293_v25  ;;  %v513_v34 = vunpack.c.l.bf16 %v611_v21  ;;  %v514_v35 = vunpack.c.h.bf16 %v611_v21 }
  0x17   :  { %417 = vst.msk [vmem:[%s1149_s3 + $0x28] sm:$0xf] %vm406_vm0, %v352_v22  ;;  %v162_v36 = vmul.f32 %v662_v1, %v509_v29  ;;  %v163_v37 = vmul.f32 %v662_v1, %v510_v30  ;;  %v517_v38 = vunpack.c.l.bf16 %v612_v26  ;;  %v518_v39 = vunpack.c.h.bf16 %v612_v26 }
  0x18   :  { %418 = vst.msk [vmem:[%s1149_s3 + $0x2c] sm:$0xf] %vm406_vm0, %v353_v23  ;;  %v164_v40 = vmul.f32 %v662_v1, %v513_v34  ;;  %v165_v41 = vmul.f32 %v662_v1, %v514_v35  ;;  %v521_v42 = vunpack.c.l.bf16 %v613_v31  ;;  %v522_v43 = vunpack.c.h.bf16 %v613_v31 }
  0x19   :  { %419 = vst.msk [vmem:[%s1149_s3 + $0x30] sm:$0xf] %vm406_vm0, %v354_v27  ;;  %v230_v44 = vadd.f32 %v667_v3, %v162_v36  ;;  %v231_v45 = vadd.f32 %v667_v3, %v163_v37  ;;  %v166_v46 = vmul.f32 %v662_v1, %v517_v38  ;;  %v167_v47 = vmul.f32 %v662_v1, %v518_v39 }
  0x1a   :  { %420 = vst.msk [vmem:[%s1149_s3 + $0x34] sm:$0xf] %vm406_vm0, %v355_v28  ;;  %v232_v48 = vadd.f32 %v667_v3, %v164_v40  ;;  %v233_v49 = vadd.f32 %v667_v3, %v165_v41  ;;  %v168_v50 = vmul.f32 %v662_v1, %v521_v42  ;;  %v169_v51 = vmul.f32 %v662_v1, %v522_v43  ;;  %v618_v42 = vld [vmem:[%s1146_s0 + $0x80] sm:$0xff]  }
  0x1b   :  { %421 = vst.msk [vmem:[%s1149_s3 + $0x38] sm:$0xf] %vm406_vm0, %v356_v32  ;;  %v294_v52 = vmax.f32 %v230_v44, 0.0  ;;  %v295_v53 = vmax.f32 %v231_v45, 0.0  ;;  %v234_v54 = vadd.f32 %v667_v3, %v166_v46  ;;  %v235_v55 = vadd.f32 %v667_v3, %v167_v47  ;;  %v619_v47 = vld [vmem:[%s1146_s0 + $0x88] sm:$0xff]  }
  0x1c   :  { %422 = vst.msk [vmem:[%s1149_s3 + $0x3c] sm:$0xf] %vm406_vm0, %v357_v33  ;;  %v296_v56 = vmax.f32 %v232_v48, 0.0  ;;  %v297_v57 = vmax.f32 %v233_v49, 0.0  ;;  %v236_v58 = vadd.f32 %v667_v3, %v168_v50  ;;  %v237_v59 = vadd.f32 %v667_v3, %v169_v51 }
  0x1d   :  { %v358_v61 = vpack.c.bf16 %v294_v52, %v294_v52  ;;  %v359_v62 = vpack.c.bf16 %v295_v53, %v295_v53  ;;  %v298_v63 = vmax.f32 %v234_v54, 0.0  ;;  %v299_v0 = vmax.f32 %v235_v55, 0.0  ;;  %v620_v52 = vld [vmem:[%s1146_s0 + $0x90] sm:$0xff]  }
  0x1e   :  { %v360_v4 = vpack.c.bf16 %v296_v56, %v296_v56  ;;  %v361_v5 = vpack.c.bf16 %v297_v57, %v297_v57  ;;  %v300_v6 = vmax.f32 %v236_v58, 0.0  ;;  %v301_v7 = vmax.f32 %v237_v59, 0.0  ;;  %v621_v57 = vld [vmem:[%s1146_s0 + $0x98] sm:$0xff]  }
  0x1f   :  { %423 = vst.msk [vmem:[%s1149_s3 + $0x40] sm:$0xf] %vm406_vm0, %v358_v61  ;;  %v362_v9 = vpack.c.bf16 %v298_v63, %v298_v63  ;;  %v363_v10 = vpack.c.bf16 %v299_v0, %v299_v0  ;;  %v525_v11 = vunpack.c.l.bf16 %v614_v60  ;;  %v526_v12 = vunpack.c.h.bf16 %v614_v60 }
  0x20   :  { %424 = vst.msk [vmem:[%s1149_s3 + $0x44] sm:$0xf] %vm406_vm0, %v359_v62  ;;  %v364_v14 = vpack.c.bf16 %v300_v6, %v300_v6  ;;  %v365_v15 = vpack.c.bf16 %v301_v7, %v301_v7  ;;  %v529_v16 = vunpack.c.l.bf16 %v615_v2  ;;  %v530_v17 = vunpack.c.h.bf16 %v615_v2 }
  0x21   :  { %425 = vst.msk [vmem:[%s1149_s3 + $0x48] sm:$0xf] %vm406_vm0, %v360_v4  ;;  %v170_v18 = vmul.f32 %v662_v1, %v525_v11  ;;  %v171_v19 = vmul.f32 %v662_v1, %v526_v12  ;;  %v533_v20 = vunpack.c.l.bf16 %v616_v8  ;;  %v534_v21 = vunpack.c.h.bf16 %v616_v8 }
  0x22   :  { %426 = vst.msk [vmem:[%s1149_s3 + $0x4c] sm:$0xf] %vm406_vm0, %v361_v5  ;;  %v172_v22 = vmul.f32 %v662_v1, %v529_v16  ;;  %v173_v23 = vmul.f32 %v662_v1, %v530_v17  ;;  %v537_v24 = vunpack.c.l.bf16 %v617_v13  ;;  %v538_v25 = vunpack.c.h.bf16 %v617_v13 }
  0x23   :  { %427 = vst.msk [vmem:[%s1149_s3 + $0x50] sm:$0xf] %vm406_vm0, %v362_v9  ;;  %v238_v26 = vadd.f32 %v667_v3, %v170_v18  ;;  %v239_v27 = vadd.f32 %v667_v3, %v171_v19  ;;  %v174_v28 = vmul.f32 %v662_v1, %v533_v20  ;;  %v175_v29 = vmul.f32 %v662_v1, %v534_v21 }
  0x24   :  { %428 = vst.msk [vmem:[%s1149_s3 + $0x54] sm:$0xf] %vm406_vm0, %v363_v10  ;;  %v240_v30 = vadd.f32 %v667_v3, %v172_v22  ;;  %v241_v31 = vadd.f32 %v667_v3, %v173_v23  ;;  %v176_v32 = vmul.f32 %v662_v1, %v537_v24  ;;  %v177_v33 = vmul.f32 %v662_v1, %v538_v25  ;;  %v622_v24 = vld [vmem:[%s1146_s0 + $0xa0] sm:$0xff]  }
  0x25   :  { %429 = vst.msk [vmem:[%s1149_s3 + $0x58] sm:$0xf] %vm406_vm0, %v364_v14  ;;  %v302_v34 = vmax.f32 %v238_v26, 0.0  ;;  %v303_v35 = vmax.f32 %v239_v27, 0.0  ;;  %v242_v36 = vadd.f32 %v667_v3, %v174_v28  ;;  %v243_v37 = vadd.f32 %v667_v3, %v175_v29  ;;  %v623_v29 = vld [vmem:[%s1146_s0 + $0xa8] sm:$0xff]  }
  0x26   :  { %430 = vst.msk [vmem:[%s1149_s3 + $0x5c] sm:$0xf] %vm406_vm0, %v365_v15  ;;  %v304_v38 = vmax.f32 %v240_v30, 0.0  ;;  %v305_v39 = vmax.f32 %v241_v31, 0.0  ;;  %v244_v40 = vadd.f32 %v667_v3, %v176_v32  ;;  %v245_v41 = vadd.f32 %v667_v3, %v177_v33 }
  0x27   :  { %v366_v43 = vpack.c.bf16 %v302_v34, %v302_v34  ;;  %v367_v44 = vpack.c.bf16 %v303_v35, %v303_v35  ;;  %v306_v45 = vmax.f32 %v242_v36, 0.0  ;;  %v307_v46 = vmax.f32 %v243_v37, 0.0  ;;  %v624_v34 = vld [vmem:[%s1146_s0 + $0xb0] sm:$0xff]  }
  0x28   :  { %v368_v48 = vpack.c.bf16 %v304_v38, %v304_v38  ;;  %v369_v49 = vpack.c.bf16 %v305_v39, %v305_v39  ;;  %v308_v50 = vmax.f32 %v244_v40, 0.0  ;;  %v309_v51 = vmax.f32 %v245_v41, 0.0  ;;  %v625_v39 = vld [vmem:[%s1146_s0 + $0xb8] sm:$0xff]  }
  0x29   :  { %431 = vst.msk [vmem:[%s1149_s3 + $0x60] sm:$0xf] %vm406_vm0, %v366_v43  ;;  %v370_v53 = vpack.c.bf16 %v306_v45, %v306_v45  ;;  %v371_v54 = vpack.c.bf16 %v307_v46, %v307_v46  ;;  %v541_v55 = vunpack.c.l.bf16 %v618_v42  ;;  %v542_v56 = vunpack.c.h.bf16 %v618_v42 }
  0x2a   :  { %432 = vst.msk [vmem:[%s1149_s3 + $0x64] sm:$0xf] %vm406_vm0, %v367_v44  ;;  %v372_v58 = vpack.c.bf16 %v308_v50, %v308_v50  ;;  %v373_v59 = vpack.c.bf16 %v309_v51, %v309_v51  ;;  %v545_v60 = vunpack.c.l.bf16 %v619_v47  ;;  %v546_v61 = vunpack.c.h.bf16 %v619_v47 }
  0x2b   :  { %433 = vst.msk [vmem:[%s1149_s3 + $0x68] sm:$0xf] %vm406_vm0, %v368_v48  ;;  %v178_v62 = vmul.f32 %v662_v1, %v541_v55  ;;  %v179_v63 = vmul.f32 %v662_v1, %v542_v56  ;;  %v549_v0 = vunpack.c.l.bf16 %v620_v52  ;;  %v550_v2 = vunpack.c.h.bf16 %v620_v52 }
  0x2c   :  { %434 = vst.msk [vmem:[%s1149_s3 + $0x6c] sm:$0xf] %vm406_vm0, %v369_v49  ;;  %v180_v4 = vmul.f32 %v662_v1, %v545_v60  ;;  %v181_v5 = vmul.f32 %v662_v1, %v546_v61  ;;  %v553_v6 = vunpack.c.l.bf16 %v621_v57  ;;  %v554_v7 = vunpack.c.h.bf16 %v621_v57 }
  0x2d   :  { %435 = vst.msk [vmem:[%s1149_s3 + $0x70] sm:$0xf] %vm406_vm0, %v370_v53  ;;  %v246_v8 = vadd.f32 %v667_v3, %v178_v62  ;;  %v247_v9 = vadd.f32 %v667_v3, %v179_v63  ;;  %v182_v10 = vmul.f32 %v662_v1, %v549_v0  ;;  %v183_v11 = vmul.f32 %v662_v1, %v550_v2 }
  0x2e   :  { %436 = vst.msk [vmem:[%s1149_s3 + $0x74] sm:$0xf] %vm406_vm0, %v371_v54  ;;  %v248_v12 = vadd.f32 %v667_v3, %v180_v4  ;;  %v249_v13 = vadd.f32 %v667_v3, %v181_v5  ;;  %v184_v14 = vmul.f32 %v662_v1, %v553_v6  ;;  %v185_v15 = vmul.f32 %v662_v1, %v554_v7  ;;  %v626_v6 = vld [vmem:[%s1146_s0 + $0xc0] sm:$0xff]  }
  0x2f   :  { %437 = vst.msk [vmem:[%s1149_s3 + $0x78] sm:$0xf] %vm406_vm0, %v372_v58  ;;  %v310_v16 = vmax.f32 %v246_v8, 0.0  ;;  %v311_v17 = vmax.f32 %v247_v9, 0.0  ;;  %v250_v18 = vadd.f32 %v667_v3, %v182_v10  ;;  %v251_v19 = vadd.f32 %v667_v3, %v183_v11  ;;  %v627_v11 = vld [vmem:[%s1146_s0 + $0xc8] sm:$0xff]  }
  0x30   :  { %438 = vst.msk [vmem:[%s1149_s3 + $0x7c] sm:$0xf] %vm406_vm0, %v373_v59  ;;  %v312_v20 = vmax.f32 %v248_v12, 0.0  ;;  %v313_v21 = vmax.f32 %v249_v13, 0.0  ;;  %v252_v22 = vadd.f32 %v667_v3, %v184_v14  ;;  %v253_v23 = vadd.f32 %v667_v3, %v185_v15 }
  0x31   :  { %v374_v25 = vpack.c.bf16 %v310_v16, %v310_v16  ;;  %v375_v26 = vpack.c.bf16 %v311_v17, %v311_v17  ;;  %v314_v27 = vmax.f32 %v250_v18, 0.0  ;;  %v315_v28 = vmax.f32 %v251_v19, 0.0  ;;  %v628_v16 = vld [vmem:[%s1146_s0 + $0xd0] sm:$0xff]  }
  0x32   :  { %v376_v30 = vpack.c.bf16 %v312_v20, %v312_v20  ;;  %v377_v31 = vpack.c.bf16 %v313_v21, %v313_v21  ;;  %v316_v32 = vmax.f32 %v252_v22, 0.0  ;;  %v317_v33 = vmax.f32 %v253_v23, 0.0  ;;  %v629_v21 = vld [vmem:[%s1146_s0 + $0xd8] sm:$0xff]  }
  0x33   :  { %439 = vst.msk [vmem:[%s1149_s3 + $0x80] sm:$0xf] %vm406_vm0, %v374_v25  ;;  %v378_v35 = vpack.c.bf16 %v314_v27, %v314_v27  ;;  %v379_v36 = vpack.c.bf16 %v315_v28, %v315_v28  ;;  %v557_v37 = vunpack.c.l.bf16 %v622_v24  ;;  %v558_v38 = vunpack.c.h.bf16 %v622_v24 }
  0x34   :  { %440 = vst.msk [vmem:[%s1149_s3 + $0x84] sm:$0xf] %vm406_vm0, %v375_v26  ;;  %v380_v40 = vpack.c.bf16 %v316_v32, %v316_v32  ;;  %v381_v41 = vpack.c.bf16 %v317_v33, %v317_v33  ;;  %v561_v42 = vunpack.c.l.bf16 %v623_v29  ;;  %v562_v43 = vunpack.c.h.bf16 %v623_v29 }
  0x35   :  { %441 = vst.msk [vmem:[%s1149_s3 + $0x88] sm:$0xf] %vm406_vm0, %v376_v30  ;;  %v186_v44 = vmul.f32 %v662_v1, %v557_v37  ;;  %v187_v45 = vmul.f32 %v662_v1, %v558_v38  ;;  %v565_v46 = vunpack.c.l.bf16 %v624_v34  ;;  %v566_v47 = vunpack.c.h.bf16 %v624_v34 }
  0x36   :  { %442 = vst.msk [vmem:[%s1149_s3 + $0x8c] sm:$0xf] %vm406_vm0, %v377_v31  ;;  %v188_v48 = vmul.f32 %v662_v1, %v561_v42  ;;  %v189_v49 = vmul.f32 %v662_v1, %v562_v43  ;;  %v569_v50 = vunpack.c.l.bf16 %v625_v39  ;;  %v570_v51 = vunpack.c.h.bf16 %v625_v39 }
  0x37   :  { %443 = vst.msk [vmem:[%s1149_s3 + $0x90] sm:$0xf] %vm406_vm0, %v378_v35  ;;  %v254_v52 = vadd.f32 %v667_v3, %v186_v44  ;;  %v255_v53 = vadd.f32 %v667_v3, %v187_v45  ;;  %v190_v54 = vmul.f32 %v662_v1, %v565_v46  ;;  %v191_v55 = vmul.f32 %v662_v1, %v566_v47 }
  0x38   :  { %444 = vst.msk [vmem:[%s1149_s3 + $0x94] sm:$0xf] %vm406_vm0, %v379_v36  ;;  %v256_v56 = vadd.f32 %v667_v3, %v188_v48  ;;  %v257_v57 = vadd.f32 %v667_v3, %v189_v49  ;;  %v192_v58 = vmul.f32 %v662_v1, %v569_v50  ;;  %v193_v59 = vmul.f32 %v662_v1, %v570_v51  ;;  %v630_v50 = vld [vmem:[%s1146_s0 + $0xe0] sm:$0xff]  }
  0x39   :  { %445 = vst.msk [vmem:[%s1149_s3 + $0x98] sm:$0xf] %vm406_vm0, %v380_v40  ;;  %v318_v60 = vmax.f32 %v254_v52, 0.0  ;;  %v319_v61 = vmax.f32 %v255_v53, 0.0  ;;  %v258_v62 = vadd.f32 %v667_v3, %v190_v54  ;;  %v259_v63 = vadd.f32 %v667_v3, %v191_v55  ;;  %v631_v55 = vld [vmem:[%s1146_s0 + $0xe8] sm:$0xff]  }
  0x3a   :  { %446 = vst.msk [vmem:[%s1149_s3 + $0x9c] sm:$0xf] %vm406_vm0, %v381_v41  ;;  %v320_v0 = vmax.f32 %v256_v56, 0.0  ;;  %v321_v2 = vmax.f32 %v257_v57, 0.0  ;;  %v260_v4 = vadd.f32 %v667_v3, %v192_v58  ;;  %v261_v5 = vadd.f32 %v667_v3, %v193_v59 }
  0x3b   :  { %v382_v7 = vpack.c.bf16 %v318_v60, %v318_v60  ;;  %v383_v8 = vpack.c.bf16 %v319_v61, %v319_v61  ;;  %v322_v9 = vmax.f32 %v258_v62, 0.0  ;;  %v323_v10 = vmax.f32 %v259_v63, 0.0  ;;  %v632_v60 = vld [vmem:[%s1146_s0 + $0xf0] sm:$0xff]  }
  0x3c   :  { %v384_v12 = vpack.c.bf16 %v320_v0, %v320_v0  ;;  %v385_v13 = vpack.c.bf16 %v321_v2, %v321_v2  ;;  %v324_v14 = vmax.f32 %v260_v4, 0.0  ;;  %v325_v15 = vmax.f32 %v261_v5, 0.0  ;;  %v633_v2 = vld [vmem:[%s1146_s0 + $0xf8] sm:$0xff]  }
  0x3d   :  { %447 = vst.msk [vmem:[%s1149_s3 + $0xa0] sm:$0xf] %vm406_vm0, %v382_v7  ;;  %v386_v17 = vpack.c.bf16 %v322_v9, %v322_v9  ;;  %v387_v18 = vpack.c.bf16 %v323_v10, %v323_v10  ;;  %v573_v19 = vunpack.c.l.bf16 %v626_v6  ;;  %v574_v20 = vunpack.c.h.bf16 %v626_v6 }
  0x3e   :  { %448 = vst.msk [vmem:[%s1149_s3 + $0xa4] sm:$0xf] %vm406_vm0, %v383_v8  ;;  %v388_v22 = vpack.c.bf16 %v324_v14, %v324_v14  ;;  %v389_v23 = vpack.c.bf16 %v325_v15, %v325_v15  ;;  %v577_v24 = vunpack.c.l.bf16 %v627_v11  ;;  %v578_v25 = vunpack.c.h.bf16 %v627_v11 }
  0x3f   :  { %449 = vst.msk [vmem:[%s1149_s3 + $0xa8] sm:$0xf] %vm406_vm0, %v384_v12  ;;  %v194_v26 = vmul.f32 %v662_v1, %v573_v19  ;;  %v195_v27 = vmul.f32 %v662_v1, %v574_v20  ;;  %v581_v28 = vunpack.c.l.bf16 %v628_v16  ;;  %v582_v29 = vunpack.c.h.bf16 %v628_v16 }
  0x40   :  { %450 = vst.msk [vmem:[%s1149_s3 + $0xac] sm:$0xf] %vm406_vm0, %v385_v13  ;;  %v196_v30 = vmul.f32 %v662_v1, %v577_v24  ;;  %v197_v31 = vmul.f32 %v662_v1, %v578_v25  ;;  %v585_v32 = vunpack.c.l.bf16 %v629_v21  ;;  %v586_v33 = vunpack.c.h.bf16 %v629_v21 }
  0x41   :  { %451 = vst.msk [vmem:[%s1149_s3 + $0xb0] sm:$0xf] %vm406_vm0, %v386_v17  ;;  %v262_v34 = vadd.f32 %v667_v3, %v194_v26  ;;  %v263_v35 = vadd.f32 %v667_v3, %v195_v27  ;;  %v198_v36 = vmul.f32 %v662_v1, %v581_v28  ;;  %v199_v37 = vmul.f32 %v662_v1, %v582_v29 }
  0x42   :  { %452 = vst.msk [vmem:[%s1149_s3 + $0xb4] sm:$0xf] %vm406_vm0, %v387_v18  ;;  %v264_v38 = vadd.f32 %v667_v3, %v196_v30  ;;  %v265_v39 = vadd.f32 %v667_v3, %v197_v31  ;;  %v200_v40 = vmul.f32 %v662_v1, %v585_v32  ;;  %v201_v41 = vmul.f32 %v662_v1, %v586_v33 }
  0x43   :  { %453 = vst.msk [vmem:[%s1149_s3 + $0xb8] sm:$0xf] %vm406_vm0, %v388_v22  ;;  %v326_v42 = vmax.f32 %v262_v34, 0.0  ;;  %v327_v43 = vmax.f32 %v263_v35, 0.0  ;;  %v266_v44 = vadd.f32 %v667_v3, %v198_v36  ;;  %v267_v45 = vadd.f32 %v667_v3, %v199_v37 }
  0x44   :  { %454 = vst.msk [vmem:[%s1149_s3 + $0xbc] sm:$0xf] %vm406_vm0, %v389_v23  ;;  %v328_v46 = vmax.f32 %v264_v38, 0.0  ;;  %v329_v47 = vmax.f32 %v265_v39, 0.0  ;;  %v268_v48 = vadd.f32 %v667_v3, %v200_v40  ;;  %v269_v49 = vadd.f32 %v667_v3, %v201_v41 }
  0x45   :  { %v390_v51 = vpack.c.bf16 %v326_v42, %v326_v42  ;;  %v391_v52 = vpack.c.bf16 %v327_v43, %v327_v43  ;;  %v330_v53 = vmax.f32 %v266_v44, 0.0  ;;  %v331_v54 = vmax.f32 %v267_v45, 0.0 }
  0x46   :  { %v392_v56 = vpack.c.bf16 %v328_v46, %v328_v46  ;;  %v393_v57 = vpack.c.bf16 %v329_v47, %v329_v47  ;;  %v332_v58 = vmax.f32 %v268_v48, 0.0  ;;  %v333_v59 = vmax.f32 %v269_v49, 0.0 }
  0x47   :  { %455 = vst.msk [vmem:[%s1149_s3 + $0xc0] sm:$0xf] %vm406_vm0, %v390_v51  ;;  %v394_v61 = vpack.c.bf16 %v330_v53, %v330_v53  ;;  %v395_v62 = vpack.c.bf16 %v331_v54, %v331_v54  ;;  %v589_v63 = vunpack.c.l.bf16 %v630_v50  ;;  %v590_v0 = vunpack.c.h.bf16 %v630_v50 }
  0x48   :  { %456 = vst.msk [vmem:[%s1149_s3 + $0xc4] sm:$0xf] %vm406_vm0, %v391_v52  ;;  %v396_v4 = vpack.c.bf16 %v332_v58, %v332_v58  ;;  %v397_v5 = vpack.c.bf16 %v333_v59, %v333_v59  ;;  %v593_v6 = vunpack.c.l.bf16 %v631_v55  ;;  %v594_v7 = vunpack.c.h.bf16 %v631_v55 }
  0x49   :  { %457 = vst.msk [vmem:[%s1149_s3 + $0xc8] sm:$0xf] %vm406_vm0, %v392_v56  ;;  %v202_v8 = vmul.f32 %v662_v1, %v589_v63  ;;  %v203_v9 = vmul.f32 %v662_v1, %v590_v0  ;;  %v597_v10 = vunpack.c.l.bf16 %v632_v60  ;;  %v598_v11 = vunpack.c.h.bf16 %v632_v60 }
  0x4a   :  { %458 = vst.msk [vmem:[%s1149_s3 + $0xcc] sm:$0xf] %vm406_vm0, %v393_v57  ;;  %v204_v12 = vmul.f32 %v662_v1, %v593_v6  ;;  %v205_v13 = vmul.f32 %v662_v1, %v594_v7  ;;  %v601_v14 = vunpack.c.l.bf16 %v633_v2  ;;  %v602_v15 = vunpack.c.h.bf16 %v633_v2 }
  0x4b   :  { %459 = vst.msk [vmem:[%s1149_s3 + $0xd0] sm:$0xf] %vm406_vm0, %v394_v61  ;;  %v270_v16 = vadd.f32 %v667_v3, %v202_v8  ;;  %v271_v17 = vadd.f32 %v667_v3, %v203_v9  ;;  %v206_v18 = vmul.f32 %v662_v1, %v597_v10  ;;  %v207_v19 = vmul.f32 %v662_v1, %v598_v11 }
  0x4c   :  { %460 = vst.msk [vmem:[%s1149_s3 + $0xd4] sm:$0xf] %vm406_vm0, %v395_v62  ;;  %v272_v20 = vadd.f32 %v667_v3, %v204_v12  ;;  %v273_v21 = vadd.f32 %v667_v3, %v205_v13  ;;  %v208_v22 = vmul.f32 %v662_v1, %v601_v14  ;;  %v209_v23 = vmul.f32 %v662_v1, %v602_v15 }
  0x4d   :  { %461 = vst.msk [vmem:[%s1149_s3 + $0xd8] sm:$0xf] %vm406_vm0, %v396_v4  ;;  %v334_v24 = vmax.f32 %v270_v16, 0.0  ;;  %v335_v25 = vmax.f32 %v271_v17, 0.0  ;;  %v274_v26 = vadd.f32 %v667_v3, %v206_v18  ;;  %v275_v27 = vadd.f32 %v667_v3, %v207_v19 }
  0x4e   :  { %462 = vst.msk [vmem:[%s1149_s3 + $0xdc] sm:$0xf] %vm406_vm0, %v397_v5  ;;  %v336_v28 = vmax.f32 %v272_v20, 0.0  ;;  %v337_v29 = vmax.f32 %v273_v21, 0.0  ;;  %v276_v1 = vadd.f32 %v667_v3, %v208_v22  ;;  %v277_v30 = vadd.f32 %v667_v3, %v209_v23 }
  0x4f   :  { %v398_v31 = vpack.c.bf16 %v334_v24, %v334_v24  ;;  %v399_v32 = vpack.c.bf16 %v335_v25, %v335_v25  ;;  %v338_v33 = vmax.f32 %v274_v26, 0.0  ;;  %v339_v34 = vmax.f32 %v275_v27, 0.0 }
  0x50   :  { %v400_v35 = vpack.c.bf16 %v336_v28, %v336_v28  ;;  %v401_v36 = vpack.c.bf16 %v337_v29, %v337_v29  ;;  %v340_v37 = vmax.f32 %v276_v1, 0.0  ;;  %v341_v38 = vmax.f32 %v277_v30, 0.0 }
  0x51   :  { %463 = vst.msk [vmem:[%s1149_s3 + $0xe0] sm:$0xf] %vm406_vm0, %v398_v31  ;;  %v402_v39 = vpack.c.bf16 %v338_v33, %v338_v33  ;;  %v403_v3 = vpack.c.bf16 %v339_v34, %v339_v34 }
  0x52   :  { %464 = vst.msk [vmem:[%s1149_s3 + $0xe4] sm:$0xf] %vm406_vm0, %v399_v32  ;;  %v404_v40 = vpack.c.bf16 %v340_v37, %v340_v37  ;;  %v405_v41 = vpack.c.bf16 %v341_v38, %v341_v38 }
  0x53   :  { %465 = vst.msk [vmem:[%s1149_s3 + $0xe8] sm:$0xf] %vm406_vm0, %v400_v35 }
  0x54   :  { %466 = vst.msk [vmem:[%s1149_s3 + $0xec] sm:$0xf] %vm406_vm0, %v401_v36 }
  0x55   :  { %467 = vst.msk [vmem:[%s1149_s3 + $0xf0] sm:$0xf] %vm406_vm0, %v402_v39 }
  0x56   :  { %468 = vst.msk [vmem:[%s1149_s3 + $0xf4] sm:$0xf] %vm406_vm0, %v403_v3 }
  0x57   :  { %469 = vst.msk [vmem:[%s1149_s3 + $0xf8] sm:$0xf] %vm406_vm0, %v404_v40 }
  0x58   :  { %470 = vst.msk [vmem:[%s1149_s3 + $0xfc] sm:$0xf] %vm406_vm0, %v405_v41 }

// kernel: model_forward.5
= control target key start
LH: loop header
LB: loop body
LE: loop exit
PB: predicated region body
PF: predicated region fallthrough
CT: control target
= control target key end

     0   :  { %s3063_s1 = inlined_call_operand.vmem [shape: bf16[256,128], index: 1, kind: input, shape index: {}]   ;;  %s3064_s0 = inlined_call_operand.vmem [shape: bf16[512,256], index: 0, kind: input, shape index: {}]   ;;  %s3065_s2 = inlined_call_operand.vmem [shape: f32[1,128], index: 2, kind: input, shape index: {}]   ;;  %s3066_s3 = inlined_call_operand.vmem [shape: bf16[512,128], index: 3, kind: output, shape index: {0}]   ;;  %s3067_s4 = inlined_call_operand.vmem [shape: f32[1,1,128], index: 4, kind: output, shape index: {1}]   ;;  %s3068_s5 = inlined_call_operand.vmem [shape: f32[1,1,128], index: 5, kind: output, shape index: {2}]  }
   0x1   :  { %v1997_v0 = vld [vmem:[%s3063_s1 + $0x38] sm:$0xff]  ;;  %v1996_v2 = vld [vmem:[%s3063_s1 + $0x30] sm:$0xff]  ;;  %v1995_v4 = vld [vmem:[%s3063_s1 + $0x28] sm:$0xff] }
   0x2   :  { %v2005_v1 = vld [vmem:[%s3063_s1 + $0x78] sm:$0xff]  ;;  %661 = vmatpush.bf16.msra.mxu0 %v1997_v0  ;;  %v2004_v3 = vld [vmem:[%s3063_s1 + $0x70] sm:$0xff]  ;;  %2197 = vmatpush.bf16.msra.mxu2 %v1997_v0  ;;  %v2003_v5 = vld [vmem:[%s3063_s1 + $0x68] sm:$0xff] }
   0x3   :  { %830 = vmatpush.bf16.msra.mxu1 %v2005_v1  ;;  %2205 = vmatpush.bf16.msra.mxu3 %v2005_v1  ;;  %v1994_v6 = vld [vmem:[%s3063_s1 + $0x20] sm:$0xff]  ;;  %v1993_v8 = vld [vmem:[%s3063_s1 + $0x18] sm:$0xff]  ;;  %v1992_v10 = vld [vmem:[%s3063_s1 + $0x10] sm:$0xff] }
   0x4   :  { %v2002_v7 = vld [vmem:[%s3063_s1 + $0x60] sm:$0xff]  ;;  %v2001_v9 = vld [vmem:[%s3063_s1 + $0x58] sm:$0xff]  ;;  %v2000_v11 = vld [vmem:[%s3063_s1 + $0x50] sm:$0xff] }
   0x5   :  { %v1991_v12 = vld [vmem:[%s3063_s1 + $0x8] sm:$0xff]  ;;  %v1990_v14 = vld [vmem:[%s3063_s1] sm:$0xff]  ;;  %v1616_v22 = vld [vmem:[%s3064_s0 + $0x10] sm:$0xf] }
   0x6   :  { %662 = vmatpush.bf16.msra.mxu0 %v1996_v2  ;;  %2198 = vmatpush.bf16.msra.mxu2 %v1996_v2  ;;  %v1999_v13 = vld [vmem:[%s3063_s1 + $0x48] sm:$0xff]  ;;  %v1998_v15 = vld [vmem:[%s3063_s1 + $0x40] sm:$0xff]  ;;  %v1929_v23 = vld [vmem:[%s3064_s0 + $0x14] sm:$0xf0] }
   0x7   :  { %831 = vmatpush.bf16.msra.mxu1 %v2004_v3  ;;  %2206 = vmatpush.bf16.msra.mxu3 %v2004_v3  ;;  %v1608_v16 = vld [vmem:[%s3064_s0] sm:$0xf]  ;;  %v1927_v17 = vld [vmem:[%s3064_s0 + $0x4] sm:$0xf0]  ;;  %v1926_v18 = vld [vmem:[%s3064_s0 + $0x4] sm:$0xf]  ;;  %v1617_v26 = vor.u32 %v1929_v23, %v1616_v22 }
   0x8   :  { %v1610_v19 = vld [vmem:[%s3064_s0 + $0x8] sm:$0xf0]  ;;  %v1609_v20 = vor.u32 %v1927_v17, %v1608_v16  ;;  %v1928_v24 = vld [vmem:[%s3064_s0 + $0x14] sm:$0xf]  ;;  %v1618_v25 = vld [vmem:[%s3064_s0 + $0x18] sm:$0xf0] }
   0x9   :  { %v1613_v21 = vor.u32 %v1926_v18, %v1610_v19  ;;  %v1621_v27 = vor.u32 %v1928_v24, %v1618_v25  ;;  %v1736_v28 = vld [vmem:[%s3064_s0 + $0x100] sm:$0xf]  ;;  %v1959_v29 = vld [vmem:[%s3064_s0 + $0x104] sm:$0xf0]  ;;  %v1958_v30 = vld [vmem:[%s3064_s0 + $0x104] sm:$0xf] }
   0xa   :  { %663 = vmatpush.bf16.msra.mxu0 %v1995_v4  ;;  %2199 = vmatpush.bf16.msra.mxu2 %v1995_v4  ;;  %v1737_v31 = vor.u32 %v1959_v29, %v1736_v28  ;;  %v1738_v32 = vld [vmem:[%s3064_s0 + $0x108] sm:$0xf0]  ;;  %v1624_v34 = vld [vmem:[%s3064_s0 + $0x20] sm:$0xf]  ;;  %v1931_v35 = vld [vmem:[%s3064_s0 + $0x24] sm:$0xf0] }
   0xb   :  { %832 = vmatpush.bf16.msra.mxu1 %v2003_v5  ;;  %2207 = vmatpush.bf16.msra.mxu3 %v2003_v5  ;;  %v1741_v33 = vor.u32 %v1958_v30, %v1738_v32  ;;  %v1930_v36 = vld [vmem:[%s3064_s0 + $0x24] sm:$0xf]  ;;  %v1626_v37 = vld [vmem:[%s3064_s0 + $0x28] sm:$0xf0]  ;;  %v1625_v38 = vor.u32 %v1931_v35, %v1624_v34  ;;  %v1744_v40 = vld [vmem:[%s3064_s0 + $0x110] sm:$0xf] }
   0xc   :  { %v1629_v39 = vor.u32 %v1930_v36, %v1626_v37  ;;  %v1961_v41 = vld [vmem:[%s3064_s0 + $0x114] sm:$0xf0]  ;;  %v1960_v42 = vld [vmem:[%s3064_s0 + $0x114] sm:$0xf]  ;;  %v1746_v44 = vld [vmem:[%s3064_s0 + $0x118] sm:$0xf0] }
   0xd   :  { %v1745_v43 = vor.u32 %v1961_v41, %v1744_v40  ;;  %v1749_v45 = vor.u32 %v1960_v42, %v1746_v44  ;;  %v1632_v46 = vld [vmem:[%s3064_s0 + $0x30] sm:$0xf]  ;;  %v1933_v47 = vld [vmem:[%s3064_s0 + $0x34] sm:$0xf0]  ;;  %v1932_v48 = vld [vmem:[%s3064_s0 + $0x34] sm:$0xf] }
   0xe   :  { %664 = vmatpush.bf16.msra.mxu0 %v1994_v6  ;;  %2200 = vmatpush.bf16.msra.mxu2 %v1994_v6  ;;  %v1634_v49 = vld [vmem:[%s3064_s0 + $0x38] sm:$0xf0]  ;;  %v1633_v50 = vor.u32 %v1933_v47, %v1632_v46  ;;  %v1752_v52 = vld [vmem:[%s3064_s0 + $0x120] sm:$0xf]  ;;  %v1963_v53 = vld [vmem:[%s3064_s0 + $0x124] sm:$0xf0] }
   0xf   :  { %833 = vmatpush.bf16.msra.mxu1 %v2002_v7  ;;  %2208 = vmatpush.bf16.msra.mxu3 %v2002_v7  ;;  %v1637_v51 = vor.u32 %v1932_v48, %v1634_v49  ;;  %v1962_v54 = vld [vmem:[%s3064_s0 + $0x124] sm:$0xf]  ;;  %v1753_v55 = vor.u32 %v1963_v53, %v1752_v52  ;;  %v1754_v56 = vld [vmem:[%s3064_s0 + $0x128] sm:$0xf0]  ;;  %v1640_v58 = vld [vmem:[%s3064_s0 + $0x40] sm:$0xf] }
  0x10   :  { %v1757_v57 = vor.u32 %v1962_v54, %v1754_v56  ;;  %v1935_v59 = vld [vmem:[%s3064_s0 + $0x44] sm:$0xf0]  ;;  %v1934_v60 = vld [vmem:[%s3064_s0 + $0x44] sm:$0xf]  ;;  %v1642_v61 = vld [vmem:[%s3064_s0 + $0x48] sm:$0xf0] }
  0x11   :  { %v1641_v62 = vor.u32 %v1935_v59, %v1640_v58  ;;  %v1645_v63 = vor.u32 %v1934_v60, %v1642_v61  ;;  %v1760_v0 = vld [vmem:[%s3064_s0 + $0x130] sm:$0xf]  ;;  %v1965_v1 = vld [vmem:[%s3064_s0 + $0x134] sm:$0xf0]  ;;  %v1964_v2 = vld [vmem:[%s3064_s0 + $0x134] sm:$0xf] }
  0x12   :  { %665 = vmatpush.bf16.msra.mxu0 %v1993_v8  ;;  %2201 = vmatpush.bf16.msra.mxu2 %v1993_v8  ;;  %v1761_v3 = vor.u32 %v1965_v1, %v1760_v0  ;;  %v1762_v4 = vld [vmem:[%s3064_s0 + $0x138] sm:$0xf0]  ;;  %v1648_v6 = vld [vmem:[%s3064_s0 + $0x50] sm:$0xf]  ;;  %v1937_v7 = vld [vmem:[%s3064_s0 + $0x54] sm:$0xf0] }
  0x13   :  { %834 = vmatpush.bf16.msra.mxu1 %v2001_v9  ;;  %2209 = vmatpush.bf16.msra.mxu3 %v2001_v9  ;;  %v1765_v5 = vor.u32 %v1964_v2, %v1762_v4  ;;  %v1936_v8 = vld [vmem:[%s3064_s0 + $0x54] sm:$0xf]  ;;  %v1650_v9 = vld [vmem:[%s3064_s0 + $0x58] sm:$0xf0]  ;;  %v1770_v16 = vld [vmem:[%s3064_s0 + $0x148] sm:$0xf0] }
  0x14   :  { %v1656_v18 = vld [vmem:[%s3064_s0 + $0x60] sm:$0xf]  ;;  %v1939_v19 = vld [vmem:[%s3064_s0 + $0x64] sm:$0xf0]  ;;  %v1776_v24 = vld [vmem:[%s3064_s0 + $0x150] sm:$0xf] }
  0x15   :  { %v1657_v22 = vor.u32 %v1939_v19, %v1656_v18  ;;  %v1969_v25 = vld [vmem:[%s3064_s0 + $0x154] sm:$0xf0]  ;;  %v1778_v28 = vld [vmem:[%s3064_s0 + $0x158] sm:$0xf0]  ;;  %v1664_v30 = vld [vmem:[%s3064_s0 + $0x70] sm:$0xf] }
  0x16   :  { %666 = vmatpush.bf16.msra.mxu0 %v1992_v10  ;;  %2202 = vmatpush.bf16.msra.mxu2 %v1992_v10  ;;  %v1649_v10 = vor.u32 %v1937_v7, %v1648_v6  ;;  %v1940_v32 = vld [vmem:[%s3064_s0 + $0x74] sm:$0xf]  ;;  %v1784_v36 = vld [vmem:[%s3064_s0 + $0x160] sm:$0xf]  ;;  %v1971_v37 = vld [vmem:[%s3064_s0 + $0x164] sm:$0xf0] }
  0x17   :  { %835 = vmatpush.bf16.msra.mxu1 %v2000_v11  ;;  %2210 = vmatpush.bf16.msra.mxu3 %v2000_v11  ;;  %v1653_v11 = vor.u32 %v1936_v8, %v1650_v9  ;;  %v1786_v40 = vld [vmem:[%s3064_s0 + $0x168] sm:$0xf0]  ;;  %v1672_v42 = vld [vmem:[%s3064_s0 + $0x80] sm:$0xf]  ;;  %v1942_v44 = vld [vmem:[%s3064_s0 + $0x84] sm:$0xf] }
  0x18   :  { %v1972_v52 = vld [vmem:[%s3064_s0 + $0x174] sm:$0xf]  ;;  %v1794_v54 = vld [vmem:[%s3064_s0 + $0x178] sm:$0xf0]  ;;  %v1945_v0 = vld [vmem:[%s3064_s0 + $0x94] sm:$0xf0] }
  0x19   :  { %v1944_v1 = vld [vmem:[%s3064_s0 + $0x94] sm:$0xf]  ;;  %v1682_v2 = vld [vmem:[%s3064_s0 + $0x98] sm:$0xf0]  ;;  %v1802_v18 = vld [vmem:[%s3064_s0 + $0x188] sm:$0xf0] }
  0x1a   :  { %667 = vmatpush.bf16.msra.mxu0 %v1991_v12  ;;  %2203 = vmatpush.bf16.msra.mxu2 %v1991_v12  ;;  %v1768_v12 = vld [vmem:[%s3064_s0 + $0x140] sm:$0xf]  ;;  %v1685_v9 = vor.u32 %v1944_v1, %v1682_v2  ;;  %v1696_v2 = vld [vmem:[%s3064_s0 + $0xb0] sm:$0xf] }
  0x1b   :  { %836 = vmatpush.bf16.msra.mxu1 %v1999_v13  ;;  %2211 = vmatpush.bf16.msra.mxu3 %v1999_v13  ;;  %v1967_v13 = vld [vmem:[%s3064_s0 + $0x144] sm:$0xf0] }
  0x1e   :  { %668 = vmatpush.bf16.msra.mxu0 %v1990_v14  ;;  %2204 = vmatpush.bf16.msra.mxu2 %v1990_v14  ;;  %v1966_v14 = vld [vmem:[%s3064_s0 + $0x144] sm:$0xf] }
  0x1f   :  { %837 = vmatpush.bf16.msra.mxu1 %v1998_v15  ;;  %2212 = vmatpush.bf16.msra.mxu3 %v1998_v15  ;;  %v1769_v15 = vor.u32 %v1967_v13, %v1768_v12  ;;  %v1773_v17 = vor.u32 %v1966_v14, %v1770_v16  ;;  %v1800_v13 = vld [vmem:[%s3064_s0 + $0x180] sm:$0xf]  ;;  %v1975_v14 = vld [vmem:[%s3064_s0 + $0x184] sm:$0xf0] }
  0x21   :  { %669 = vmatmul.bf16.vlgmr.msra.gmra.mxu0 %v1609_v20  ;;  %749 = vmatmul.bf16.vlgmr.msra.gmra.mxu2 %v1737_v31  ;;  %v1938_v20 = vld [vmem:[%s3064_s0 + $0x64] sm:$0xf]  ;;  %v1941_v31 = vld [vmem:[%s3064_s0 + $0x74] sm:$0xf0] }
  0x22   :  { %838 = vmatmul.bf16.vlgmr.msra.gmra.mxu1 %v1613_v21  ;;  %918 = vmatmul.bf16.vlgmr.msra.gmra.mxu3 %v1741_v33  ;;  %v1658_v21 = vld [vmem:[%s3064_s0 + $0x68] sm:$0xf0]  ;;  %v1666_v33 = vld [vmem:[%s3064_s0 + $0x78] sm:$0xf0]  ;;  %v1665_v34 = vor.u32 %v1941_v31, %v1664_v30  ;;  %v1947_v30 = vld [vmem:[%s3064_s0 + $0xa4] sm:$0xf0] }
  0x23   :  { %v1661_v23 = vor.u32 %v1938_v20, %v1658_v21  ;;  %v1669_v35 = vor.u32 %v1940_v32, %v1666_v33  ;;  %v1946_v31 = vld [vmem:[%s3064_s0 + $0xa4] sm:$0xf]  ;;  %v1690_v32 = vld [vmem:[%s3064_s0 + $0xa8] sm:$0xf0] }
  0x31   :  { %674 = vmatmul.bf16.gmra.mxu0 %v1617_v26  ;;  %754 = vmatmul.bf16.gmra.mxu2 %v1745_v43  ;;  %v1968_v26 = vld [vmem:[%s3064_s0 + $0x154] sm:$0xf]  ;;  %v1943_v43 = vld [vmem:[%s3064_s0 + $0x84] sm:$0xf0] }
  0x32   :  { %843 = vmatmul.bf16.gmra.mxu1 %v1621_v27  ;;  %923 = vmatmul.bf16.gmra.mxu3 %v1749_v45  ;;  %v1777_v27 = vor.u32 %v1969_v25, %v1776_v24  ;;  %v1781_v29 = vor.u32 %v1968_v26, %v1778_v28  ;;  %v1674_v45 = vld [vmem:[%s3064_s0 + $0x88] sm:$0xf0]  ;;  %v1673_v46 = vor.u32 %v1943_v43, %v1672_v42 }
  0x33   :  { %v1677_v47 = vor.u32 %v1942_v44, %v1674_v45 }
  0x41   :  { %679 = vmatmul.bf16.gmra.mxu0 %v1625_v38  ;;  %759 = vmatmul.bf16.gmra.mxu2 %v1753_v55  ;;  %v1970_v38 = vld [vmem:[%s3064_s0 + $0x164] sm:$0xf]  ;;  %v1797_v55 = vor.u32 %v1972_v52, %v1794_v54  ;;  %v1810_v52 = vld [vmem:[%s3064_s0 + $0x198] sm:$0xf0] }
  0x42   :  { %848 = vmatmul.bf16.gmra.mxu1 %v1629_v39  ;;  %928 = vmatmul.bf16.gmra.mxu3 %v1757_v57  ;;  %v1785_v39 = vor.u32 %v1971_v37, %v1784_v36  ;;  %v1789_v41 = vor.u32 %v1970_v38, %v1786_v40  ;;  %v2500_v57 = vld [vmem:[%s3065_s2] ss:$0 sm:$0xff]  ;;  %v1693_v38 = vor.u32 %v1946_v31, %v1690_v32 }
  0x51   :  { %684 = vmatmul.bf16.gmra.mxu0 %v1633_v50  ;;  %764 = vmatmul.bf16.gmra.mxu2 %v1761_v3  ;;  %v1792_v50 = vld [vmem:[%s3064_s0 + $0x170] sm:$0xf] }
  0x52   :  { %853 = vmatmul.bf16.gmra.mxu1 %v1637_v51  ;;  %933 = vmatmul.bf16.gmra.mxu3 %v1765_v5  ;;  %v1973_v51 = vld [vmem:[%s3064_s0 + $0x174] sm:$0xf0] }
  0x53   :  { %v1793_v53 = vor.u32 %v1973_v51, %v1792_v50 }
  0x61   :  { %689 = vmatmul.bf16.gmra.mxu0 %v1641_v62  ;;  %769 = vmatmul.bf16.gmra.mxu2 %v1769_v15  ;;  %v1974_v15 = vld [vmem:[%s3064_s0 + $0x184] sm:$0xf] }
  0x62   :  { %858 = vmatmul.bf16.gmra.mxu1 %v1645_v63  ;;  %938 = vmatmul.bf16.gmra.mxu3 %v1773_v17  ;;  %v1680_v63 = vld [vmem:[%s3064_s0 + $0x90] sm:$0xf]  ;;  %v1801_v17 = vor.u32 %v1975_v14, %v1800_v13  ;;  %v1805_v19 = vor.u32 %v1974_v15, %v1802_v18 }
  0x63   :  { %v1681_v8 = vor.u32 %v1945_v0, %v1680_v63 }
  0x71   :  { %694 = vmatmul.bf16.gmra.mxu0 %v1649_v10  ;;  %774 = vmatmul.bf16.gmra.mxu2 %v1777_v27 }
  0x72   :  { %863 = vmatmul.bf16.gmra.mxu1 %v1653_v11  ;;  %943 = vmatmul.bf16.gmra.mxu3 %v1781_v29  ;;  %v1688_v29 = vld [vmem:[%s3064_s0 + $0xa0] sm:$0xf] }
  0x73   :  { %v1689_v37 = vor.u32 %v1947_v30, %v1688_v29 }
  0x81   :  { %699 = vmatmul.bf16.gmra.mxu0 %v1657_v22  ;;  %779 = vmatmul.bf16.gmra.mxu2 %v1785_v39 }
  0x82   :  { %868 = vmatmul.bf16.gmra.mxu1 %v1661_v23  ;;  %948 = vmatmul.bf16.gmra.mxu3 %v1789_v41 }
  0x91   :  { %704 = vmatmul.bf16.gmra.mxu0 %v1665_v34  ;;  %784 = vmatmul.bf16.gmra.mxu2 %v1793_v53 }
  0x92   :  { %873 = vmatmul.bf16.gmra.mxu1 %v1669_v35  ;;  %953 = vmatmul.bf16.gmra.mxu3 %v1797_v55 }
  0x9e   :  { %v670_v48 = vpop.f32.mrf.mxu0 }
  0x9f   :  { %v839_v49 = vpop.f32.mrf.mxu1 }
  0xa0   :  { %v840_v56 = vadd.f32 %v839_v49, %v670_v48  ;;  %v1977_v48 = vld [vmem:[%s3064_s0 + $0x194] sm:$0xf0]  ;;  %v1976_v49 = vld [vmem:[%s3064_s0 + $0x194] sm:$0xf] }
  0xa1   :  { %709 = vmatmul.bf16.gmra.mxu0 %v1673_v46  ;;  %789 = vmatmul.bf16.gmra.mxu2 %v1801_v17  ;;  %v1813_v54 = vor.u32 %v1976_v49, %v1810_v52 }
  0xa2   :  { %878 = vmatmul.bf16.gmra.mxu1 %v1677_v47  ;;  %v1198_v60 = vadd.f32 %v2500_v57, %v840_v56  ;;  %958 = vmatmul.bf16.gmra.mxu3 %v1805_v19  ;;  %v1808_v47 = vld [vmem:[%s3064_s0 + $0x190] sm:$0xf] }
  0xa3   :  { %v1809_v51 = vor.u32 %v1977_v48, %v1808_v47 }
  0xa4   :  { %v1460_v3 = vmul.f32 %v1198_v60, %v1198_v60  ;;  %v750_v26 = vpop.f32.mrf.mxu2 }
  0xa5   :  { %v919_v27 = vpop.f32.mrf.mxu3 }
  0xa6   :  { %v672_v58 = vpop.f32.mrf.mxu0  ;;  %v920_v39 = vadd.f32 %v919_v27, %v750_v26 }
  0xa7   :  { %v841_v59 = vpop.f32.mrf.mxu1 }
  0xa8   :  { %v842_v61 = vadd.f32 %v841_v59, %v672_v58  ;;  %v2549_v45 = vadd.f32 %v2500_v57, %v920_v39  ;;  %v1951_v39 = vld [vmem:[%s3064_s0 + $0xc4] sm:$0xf0] }
  0xaa   :  { %v1199_v62 = vadd.f32 %v2500_v57, %v842_v61 }
  0xac   :  { %v2009_v4 = vpack.c.bf16 %v1199_v62, %v1198_v60  ;;  %v1390_v5 = vadd.f32 %v1199_v62, %v1198_v60  ;;  %v1461_v6 = vmul.f32 %v1199_v62, %v1199_v62  ;;  %v752_v43 = vpop.f32.mrf.mxu2 }
  0xad   :  { %v921_v44 = vpop.f32.mrf.mxu3 }
  0xae   :  { %2010 = vst [vmem:[%s3066_s3] sm:$0xff] %v2009_v4   ;;  %v1524_v7 = vadd.f32 %v1461_v6, %v1460_v3  ;;  %v675_v10 = vpop.f32.mrf.mxu0  ;;  %v922_v46 = vadd.f32 %v921_v44, %v752_v43  ;;  %v1949_v3 = vld [vmem:[%s3064_s0 + $0xb4] sm:$0xf0]  ;;  %v1948_v4 = vld [vmem:[%s3064_s0 + $0xb4] sm:$0xf] }
  0xaf   :  { %v844_v11 = vpop.f32.mrf.mxu1 }
  0xb0   :  { %v845_v12 = vadd.f32 %v844_v11, %v675_v10  ;;  %v2565_v53 = vadd.f32 %v2500_v57, %v922_v46  ;;  %v1697_v10 = vor.u32 %v1949_v3, %v1696_v2 }
  0xb1   :  { %714 = vmatmul.bf16.gmra.mxu0 %v1681_v8  ;;  %794 = vmatmul.bf16.gmra.mxu2 %v1809_v51 }
  0xb2   :  { %v1200_v16 = vadd.f32 %v2500_v57, %v845_v12  ;;  %883 = vmatmul.bf16.gmra.mxu1 %v1685_v9  ;;  %v2089_v58 = vpack.c.bf16 %v2565_v53, %v2549_v45  ;;  %963 = vmatmul.bf16.gmra.mxu3 %v1813_v54 }
  0xb4   :  { %v1391_v20 = vadd.f32 %v1390_v5, %v1200_v16  ;;  %v1462_v21 = vmul.f32 %v1200_v16, %v1200_v16  ;;  %2181 = vst [vmem:[%s3066_s3 + $0x80] sm:$0xff] %v2089_v58   ;;  %v755_v63 = vpop.f32.mrf.mxu2  ;;  %v1698_v5 = vld [vmem:[%s3064_s0 + $0xb8] sm:$0xf0] }
  0xb5   :  { %v924_v0 = vpop.f32.mrf.mxu3  ;;  %v1701_v11 = vor.u32 %v1948_v4, %v1698_v5 }
  0xb6   :  { %v1525_v22 = vadd.f32 %v1524_v7, %v1462_v21  ;;  %v677_v23 = vpop.f32.mrf.mxu0  ;;  %v925_v12 = vadd.f32 %v924_v0, %v755_v63  ;;  %v1979_v21 = vld [vmem:[%s3064_s0 + $0x1a4] sm:$0xf0]  ;;  %v1826_v0 = vld [vmem:[%s3064_s0 + $0x1b8] sm:$0xf0] }
  0xb7   :  { %v846_v24 = vpop.f32.mrf.mxu1 }
  0xb8   :  { %v847_v25 = vadd.f32 %v846_v24, %v677_v23  ;;  %v2589_v18 = vadd.f32 %v2500_v57, %v925_v12 }
  0xba   :  { %v1201_v28 = vadd.f32 %v2500_v57, %v847_v25  ;;  %v1818_v25 = vld [vmem:[%s3064_s0 + $0x1a8] sm:$0xf0] }
  0xbc   :  { %v2014_v33 = vpack.c.bf16 %v1201_v28, %v1200_v16  ;;  %v1392_v34 = vadd.f32 %v1391_v20, %v1201_v28  ;;  %v1463_v35 = vmul.f32 %v1201_v28, %v1201_v28  ;;  %v757_v16 = vpop.f32.mrf.mxu2  ;;  %v1816_v20 = vld [vmem:[%s3064_s0 + $0x1a0] sm:$0xf] }
  0xbd   :  { %v926_v17 = vpop.f32.mrf.mxu3  ;;  %v1817_v24 = vor.u32 %v1979_v21, %v1816_v20 }
  0xbe   :  { %2166 = vst [vmem:[%s3066_s3 + $0x8] sm:$0xff] %v2014_v33   ;;  %v1526_v36 = vadd.f32 %v1525_v22, %v1463_v35  ;;  %v680_v40 = vpop.f32.mrf.mxu0  ;;  %v927_v19 = vadd.f32 %v926_v17, %v757_v16  ;;  %v1978_v22 = vld [vmem:[%s3064_s0 + $0x1a4] sm:$0xf]  ;;  %v1714_v16 = vld [vmem:[%s3064_s0 + $0xd8] sm:$0xf0] }
  0xbf   :  { %v849_v41 = vpop.f32.mrf.mxu1  ;;  %v1821_v27 = vor.u32 %v1978_v22, %v1818_v25 }
  0xc0   :  { %v850_v42 = vadd.f32 %v849_v41, %v680_v40  ;;  %v2605_v26 = vadd.f32 %v2500_v57, %v927_v19  ;;  %v1950_v40 = vld [vmem:[%s3064_s0 + $0xc4] sm:$0xf]  ;;  %v1706_v41 = vld [vmem:[%s3064_s0 + $0xc8] sm:$0xf0] }
  0xc1   :  { %719 = vmatmul.bf16.gmra.mxu0 %v1689_v37  ;;  %799 = vmatmul.bf16.gmra.mxu2 %v1817_v24  ;;  %v1709_v48 = vor.u32 %v1950_v40, %v1706_v41 }
  0xc2   :  { %v1202_v50 = vadd.f32 %v2500_v57, %v850_v42  ;;  %888 = vmatmul.bf16.gmra.mxu1 %v1693_v38  ;;  %v2094_v30 = vpack.c.bf16 %v2605_v26, %v2589_v18  ;;  %968 = vmatmul.bf16.gmra.mxu3 %v1821_v27  ;;  %v1704_v38 = vld [vmem:[%s3064_s0 + $0xc0] sm:$0xf] }
  0xc3   :  { %v1705_v47 = vor.u32 %v1951_v39, %v1704_v38  ;;  %v1834_v38 = vld [vmem:[%s3064_s0 + $0x1c8] sm:$0xf0] }
  0xc4   :  { %v1393_v55 = vadd.f32 %v1392_v34, %v1202_v50  ;;  %v1464_v56 = vmul.f32 %v1202_v50, %v1202_v50  ;;  %2182 = vst [vmem:[%s3066_s3 + $0x88] sm:$0xff] %v2094_v30   ;;  %v760_v35 = vpop.f32.mrf.mxu2 }
  0xc6   :  { %v1527_v59 = vadd.f32 %v1526_v36, %v1464_v56  ;;  %v682_v60 = vpop.f32.mrf.mxu0  ;;  %v929_v36 = vpop.f32.mrf.mxu3 }
  0xc7   :  { %v851_v61 = vpop.f32.mrf.mxu1  ;;  %v930_v49 = vadd.f32 %v929_v36, %v760_v35  ;;  %v1982_v35 = vld [vmem:[%s3064_s0 + $0x1c4] sm:$0xf] }
  0xc8   :  { %v852_v62 = vadd.f32 %v851_v61, %v682_v60  ;;  %v1981_v60 = vld [vmem:[%s3064_s0 + $0x1b4] sm:$0xf0]  ;;  %v1980_v61 = vld [vmem:[%s3064_s0 + $0x1b4] sm:$0xf]  ;;  %v1837_v40 = vor.u32 %v1982_v35, %v1834_v38 }
  0xc9   :  { %v2629_v56 = vadd.f32 %v2500_v57, %v930_v49  ;;  %v1829_v2 = vor.u32 %v1980_v61, %v1826_v0 }
  0xca   :  { %v1203_v1 = vadd.f32 %v2500_v57, %v852_v62 }
  0xcc   :  { %v2019_v6 = vpack.c.bf16 %v1203_v1, %v1202_v50  ;;  %v1394_v7 = vadd.f32 %v1393_v55, %v1203_v1  ;;  %v1465_v8 = vmul.f32 %v1203_v1, %v1203_v1  ;;  %v762_v54 = vpop.f32.mrf.mxu2 }
  0xce   :  { %2167 = vst [vmem:[%s3066_s3 + $0x10] sm:$0xff] %v2019_v6   ;;  %v1528_v9 = vadd.f32 %v1527_v59, %v1465_v8  ;;  %v685_v13 = vpop.f32.mrf.mxu0  ;;  %v931_v55 = vpop.f32.mrf.mxu3  ;;  %v1824_v59 = vld [vmem:[%s3064_s0 + $0x1b0] sm:$0xf] }
  0xcf   :  { %v854_v14 = vpop.f32.mrf.mxu1  ;;  %v932_v58 = vadd.f32 %v931_v55, %v762_v54  ;;  %v1825_v63 = vor.u32 %v1981_v60, %v1824_v59  ;;  %v1955_v54 = vld [vmem:[%s3064_s0 + $0xe4] sm:$0xf0]  ;;  %v1954_v55 = vld [vmem:[%s3064_s0 + $0xe4] sm:$0xf] }
  0xd0   :  { %v855_v15 = vadd.f32 %v854_v14, %v685_v13  ;;  %v1712_v13 = vld [vmem:[%s3064_s0 + $0xd0] sm:$0xf]  ;;  %v1953_v14 = vld [vmem:[%s3064_s0 + $0xd4] sm:$0xf0] }
  0xd1   :  { %724 = vmatmul.bf16.gmra.mxu0 %v1697_v10  ;;  %v2645_v1 = vadd.f32 %v2500_v57, %v932_v58  ;;  %804 = vmatmul.bf16.gmra.mxu2 %v1825_v63  ;;  %v1713_v22 = vor.u32 %v1953_v14, %v1712_v13  ;;  %v1722_v58 = vld [vmem:[%s3064_s0 + $0xe8] sm:$0xf0] }
  0xd2   :  { %v1204_v23 = vadd.f32 %v2500_v57, %v855_v15  ;;  %893 = vmatmul.bf16.gmra.mxu1 %v1701_v11  ;;  %973 = vmatmul.bf16.gmra.mxu3 %v1829_v2  ;;  %v1952_v15 = vld [vmem:[%s3064_s0 + $0xd4] sm:$0xf]  ;;  %v1725_v0 = vor.u32 %v1954_v55, %v1722_v58 }
  0xd3   :  { %v2099_v5 = vpack.c.bf16 %v2645_v1, %v2629_v56 }
  0xd4   :  { %v1395_v28 = vadd.f32 %v1394_v7, %v1204_v23  ;;  %v1466_v29 = vmul.f32 %v1204_v23, %v1204_v23  ;;  %v765_v10 = vpop.f32.mrf.mxu2 }
  0xd5   :  { %2183 = vst [vmem:[%s3066_s3 + $0x90] sm:$0xff] %v2099_v5  }
  0xd6   :  { %v1529_v31 = vadd.f32 %v1528_v9, %v1466_v29  ;;  %v687_v32 = vpop.f32.mrf.mxu0  ;;  %v934_v11 = vpop.f32.mrf.mxu3 }
  0xd7   :  { %v856_v33 = vpop.f32.mrf.mxu1  ;;  %v935_v24 = vadd.f32 %v934_v11, %v765_v10  ;;  %v1840_v10 = vld [vmem:[%s3064_s0 + $0x1d0] sm:$0xf]  ;;  %v1985_v11 = vld [vmem:[%s3064_s0 + $0x1d4] sm:$0xf0] }
  0xd8   :  { %v857_v34 = vadd.f32 %v856_v33, %v687_v32  ;;  %v1832_v33 = vld [vmem:[%s3064_s0 + $0x1c0] sm:$0xf]  ;;  %v1841_v14 = vor.u32 %v1985_v11, %v1840_v10 }
  0xda   :  { %v1205_v37 = vadd.f32 %v2500_v57, %v857_v34  ;;  %v1983_v34 = vld [vmem:[%s3064_s0 + $0x1c4] sm:$0xf0] }
  0xdc   :  { %v2024_v42 = vpack.c.bf16 %v1205_v37, %v1204_v23  ;;  %v1396_v43 = vadd.f32 %v1395_v28, %v1205_v37  ;;  %v1467_v44 = vmul.f32 %v1205_v37, %v1205_v37  ;;  %v1717_v23 = vor.u32 %v1952_v15, %v1714_v16  ;;  %v767_v29 = vpop.f32.mrf.mxu2  ;;  %v1842_v15 = vld [vmem:[%s3064_s0 + $0x1d8] sm:$0xf0] }
  0xdd   :  { %v1833_v37 = vor.u32 %v1983_v34, %v1832_v33  ;;  %v1956_v33 = vld [vmem:[%s3064_s0 + $0xf4] sm:$0xf]  ;;  %v1730_v34 = vld [vmem:[%s3064_s0 + $0xf8] sm:$0xf0] }
  0xde   :  { %2168 = vst [vmem:[%s3066_s3 + $0x18] sm:$0xff] %v2024_v42   ;;  %v1530_v46 = vadd.f32 %v1529_v31, %v1467_v44  ;;  %v690_v50 = vpop.f32.mrf.mxu0  ;;  %v936_v30 = vpop.f32.mrf.mxu3  ;;  %v2669_v31 = vadd.f32 %v2500_v57, %v935_v24 }
  0xdf   :  { %v859_v51 = vpop.f32.mrf.mxu1  ;;  %v937_v32 = vadd.f32 %v936_v30, %v767_v29  ;;  %v1728_v30 = vld [vmem:[%s3064_s0 + $0xf0] sm:$0xf] }
  0xe0   :  { %v860_v52 = vadd.f32 %v859_v51, %v690_v50 }
  0xe1   :  { %729 = vmatmul.bf16.gmra.mxu0 %v1705_v47  ;;  %v2685_v39 = vadd.f32 %v2500_v57, %v937_v32  ;;  %809 = vmatmul.bf16.gmra.mxu2 %v1833_v37  ;;  %v1957_v32 = vld [vmem:[%s3064_s0 + $0xf4] sm:$0xf0] }
  0xe2   :  { %v1206_v62 = vadd.f32 %v2500_v57, %v860_v52  ;;  %898 = vmatmul.bf16.gmra.mxu1 %v1709_v48  ;;  %978 = vmatmul.bf16.gmra.mxu3 %v1837_v40  ;;  %v1720_v52 = vld [vmem:[%s3064_s0 + $0xe0] sm:$0xf]  ;;  %v1729_v40 = vor.u32 %v1957_v32, %v1728_v30  ;;  %v1858_v30 = vld [vmem:[%s3064_s0 + $0x1f8] sm:$0xf0] }
  0xe3   :  { %v1721_v63 = vor.u32 %v1955_v54, %v1720_v52  ;;  %v1987_v52 = vld [vmem:[%s3064_s0 + $0x1e4] sm:$0xf0]  ;;  %v1986_v54 = vld [vmem:[%s3064_s0 + $0x1e4] sm:$0xf] }
  0xe4   :  { %v1397_v3 = vadd.f32 %v1396_v43, %v1206_v62  ;;  %v1468_v4 = vmul.f32 %v1206_v62, %v1206_v62  ;;  %v2104_v43 = vpack.c.bf16 %v2685_v39, %v2669_v31  ;;  %v770_v49 = vpop.f32.mrf.mxu2 }
  0xe6   :  { %v1531_v6 = vadd.f32 %v1530_v46, %v1468_v4  ;;  %v692_v7 = vpop.f32.mrf.mxu0  ;;  %2184 = vst [vmem:[%s3066_s3 + $0x98] sm:$0xff] %v2104_v43   ;;  %v939_v50 = vpop.f32.mrf.mxu3 }
  0xe7   :  { %v861_v8 = vpop.f32.mrf.mxu1  ;;  %v940_v2 = vadd.f32 %v939_v50, %v770_v49 }
  0xe8   :  { %v862_v9 = vadd.f32 %v861_v8, %v692_v7 }
  0xe9   :  { %v2709_v8 = vadd.f32 %v2500_v57, %v940_v2 }
  0xea   :  { %v1207_v12 = vadd.f32 %v2500_v57, %v862_v9 }
  0xec   :  { %v2029_v17 = vpack.c.bf16 %v1207_v12, %v1206_v62  ;;  %v1398_v19 = vadd.f32 %v1397_v3, %v1207_v12  ;;  %v1469_v20 = vmul.f32 %v1207_v12, %v1207_v12  ;;  %v1984_v12 = vld [vmem:[%s3064_s0 + $0x1d4] sm:$0xf] }
  0xee   :  { %2169 = vst [vmem:[%s3066_s3 + $0x20] sm:$0xff] %v2029_v17   ;;  %v1532_v21 = vadd.f32 %v1531_v6, %v1469_v20  ;;  %v695_v25 = vpop.f32.mrf.mxu0  ;;  %v772_v6 = vpop.f32.mrf.mxu2  ;;  %v1845_v17 = vor.u32 %v1984_v12, %v1842_v15 }
  0xef   :  { %v864_v27 = vpop.f32.mrf.mxu1  ;;  %v941_v7 = vpop.f32.mrf.mxu3 }
  0xf0   :  { %v865_v28 = vadd.f32 %v864_v27, %v695_v25  ;;  %v942_v9 = vadd.f32 %v941_v7, %v772_v6 }
  0xf1   :  { %734 = vmatmul.bf16.gmra.mxu0 %v1713_v22  ;;  %814 = vmatmul.bf16.gmra.mxu2 %v1841_v14 }
  0xf2   :  { %v1208_v36 = vadd.f32 %v2500_v57, %v865_v28  ;;  %903 = vmatmul.bf16.gmra.mxu1 %v1717_v23  ;;  %v2725_v16 = vadd.f32 %v2500_v57, %v942_v9  ;;  %983 = vmatmul.bf16.gmra.mxu3 %v1845_v17 }
  0xf4   :  { %v1399_v41 = vadd.f32 %v1398_v19, %v1208_v36  ;;  %v1470_v42 = vmul.f32 %v1208_v36, %v1208_v36 }
  0xf6   :  { %v1533_v44 = vadd.f32 %v1532_v21, %v1470_v42  ;;  %v697_v46 = vpop.f32.mrf.mxu0  ;;  %v2109_v21 = vpack.c.bf16 %v2725_v16, %v2709_v8  ;;  %v775_v27 = vpop.f32.mrf.mxu2 }
  0xf7   :  { %v866_v47 = vpop.f32.mrf.mxu1  ;;  %v944_v28 = vpop.f32.mrf.mxu3 }
  0xf8   :  { %v867_v48 = vadd.f32 %v866_v47, %v697_v46  ;;  %2185 = vst [vmem:[%s3066_s3 + $0xa0] sm:$0xff] %v2109_v21   ;;  %v945_v42 = vadd.f32 %v944_v28, %v775_v27  ;;  %v1988_v27 = vld [vmem:[%s3064_s0 + $0x1f4] sm:$0xf] }
  0xfa   :  { %v1209_v51 = vadd.f32 %v2500_v57, %v867_v48  ;;  %v2749_v49 = vadd.f32 %v2500_v57, %v945_v42 }
  0xfc   :  { %v2034_v59 = vpack.c.bf16 %v1209_v51, %v1208_v36  ;;  %v1400_v60 = vadd.f32 %v1399_v41, %v1209_v51  ;;  %v1471_v61 = vmul.f32 %v1209_v51, %v1209_v51  ;;  %v1733_v41 = vor.u32 %v1956_v33, %v1730_v34  ;;  %v1848_v51 = vld [vmem:[%s3064_s0 + $0x1e0] sm:$0xf] }
  0xfd   :  { %v1849_v58 = vor.u32 %v1987_v52, %v1848_v51  ;;  %v1861_v33 = vor.u32 %v1988_v27, %v1858_v30 }
  0xfe   :  { %2170 = vst [vmem:[%s3066_s3 + $0x28] sm:$0xff] %v2034_v59   ;;  %v1534_v62 = vadd.f32 %v1533_v44, %v1471_v61  ;;  %v700_v3 = vpop.f32.mrf.mxu0  ;;  %v777_v47 = vpop.f32.mrf.mxu2  ;;  %v1850_v59 = vld [vmem:[%s3064_s0 + $0x1e8] sm:$0xf0] }
  0xff   :  { %v869_v4 = vpop.f32.mrf.mxu1  ;;  %v946_v48 = vpop.f32.mrf.mxu3  ;;  %v1853_v61 = vor.u32 %v1986_v54, %v1850_v59 }
 0x100   :  { %v870_v5 = vadd.f32 %v869_v4, %v700_v3  ;;  %v947_v50 = vadd.f32 %v946_v48, %v777_v47 }
 0x101   :  { %739 = vmatmul.bf16.gmra.mxu0 %v1721_v63  ;;  %819 = vmatmul.bf16.gmra.mxu2 %v1849_v58 }
 0x102   :  { %v1210_v13 = vadd.f32 %v2500_v57, %v870_v5  ;;  %908 = vmatmul.bf16.gmra.mxu1 %v1725_v0  ;;  %988 = vmatmul.bf16.gmra.mxu3 %v1853_v61 }
 0x104   :  { %v1401_v19 = vadd.f32 %v1400_v60, %v1210_v13  ;;  %v1472_v20 = vmul.f32 %v1210_v13, %v1210_v13  ;;  %v2765_v60 = vadd.f32 %v2500_v57, %v947_v50 }
 0x106   :  { %v1535_v22 = vadd.f32 %v1534_v62, %v1472_v20  ;;  %v702_v23 = vpop.f32.mrf.mxu0  ;;  %v2114_v0 = vpack.c.bf16 %v2765_v60, %v2749_v49  ;;  %v780_v6 = vpop.f32.mrf.mxu2 }
 0x107   :  { %v871_v24 = vpop.f32.mrf.mxu1  ;;  %v949_v7 = vpop.f32.mrf.mxu3 }
 0x108   :  { %v872_v25 = vadd.f32 %v871_v24, %v702_v23  ;;  %2186 = vst [vmem:[%s3066_s3 + $0xa8] sm:$0xff] %v2114_v0   ;;  %v950_v14 = vadd.f32 %v949_v7, %v780_v6  ;;  %v1856_v24 = vld [vmem:[%s3064_s0 + $0x1f0] sm:$0xf] }
 0x10a   :  { %v1211_v29 = vadd.f32 %v2500_v57, %v872_v25  ;;  %v1989_v25 = vld [vmem:[%s3064_s0 + $0x1f4] sm:$0xf0] }
 0x10c   :  { %v2039_v35 = vpack.c.bf16 %v1211_v29, %v1210_v13  ;;  %v1402_v36 = vadd.f32 %v1401_v19, %v1211_v29  ;;  %v1473_v37 = vmul.f32 %v1211_v29, %v1211_v29  ;;  %v1857_v29 = vor.u32 %v1989_v25, %v1856_v24 }
 0x10e   :  { %2171 = vst [vmem:[%s3066_s3 + $0x30] sm:$0xff] %v2039_v35   ;;  %v1536_v38 = vadd.f32 %v1535_v22, %v1473_v37  ;;  %v705_v43 = vpop.f32.mrf.mxu0  ;;  %v782_v20 = vpop.f32.mrf.mxu2  ;;  %v2777_v22 = vadd.f32 %v2500_v57, %v950_v14 }
 0x10f   :  { %v874_v44 = vpop.f32.mrf.mxu1  ;;  %v951_v21 = vpop.f32.mrf.mxu3 }
 0x110   :  { %v875_v46 = vadd.f32 %v874_v44, %v705_v43  ;;  %v952_v23 = vadd.f32 %v951_v21, %v782_v20 }
 0x111   :  { %744 = vmatmul.bf16.gmra.mxu0 %v1729_v40  ;;  %824 = vmatmul.bf16.gmra.mxu2 %v1857_v29 }
 0x112   :  { %v1212_v55 = vadd.f32 %v2500_v57, %v875_v46  ;;  %913 = vmatmul.bf16.gmra.mxu1 %v1733_v41  ;;  %v2793_v32 = vadd.f32 %v2500_v57, %v952_v23  ;;  %993 = vmatmul.bf16.gmra.mxu3 %v1861_v33 }
 0x114   :  { %v1403_v62 = vadd.f32 %v1402_v36, %v1212_v55  ;;  %v1474_v63 = vmul.f32 %v1212_v55, %v1212_v55  ;;  %v2119_v36 = vpack.c.bf16 %v2793_v32, %v2777_v22 }
 0x116   :  { %v1537_v2 = vadd.f32 %v1536_v38, %v1474_v63  ;;  %v707_v3 = vpop.f32.mrf.mxu0  ;;  %2187 = vst [vmem:[%s3066_s3 + $0xb0] sm:$0xff] %v2119_v36   ;;  %v785_v42 = vpop.f32.mrf.mxu2 }
 0x117   :  { %v876_v4 = vpop.f32.mrf.mxu1  ;;  %v954_v43 = vpop.f32.mrf.mxu3 }
 0x118   :  { %v877_v5 = vadd.f32 %v876_v4, %v707_v3  ;;  %v955_v51 = vadd.f32 %v954_v43, %v785_v42 }
 0x11a   :  { %v1213_v9 = vadd.f32 %v2500_v57, %v877_v5  ;;  %v2805_v61 = vadd.f32 %v2500_v57, %v955_v51 }
 0x11c   :  { %v2044_v10 = vpack.c.bf16 %v1213_v9, %v1212_v55  ;;  %v1404_v11 = vadd.f32 %v1403_v62, %v1213_v9  ;;  %v1475_v12 = vmul.f32 %v1213_v9, %v1213_v9 }
 0x11e   :  { %2172 = vst [vmem:[%s3066_s3 + $0x38] sm:$0xff] %v2044_v10   ;;  %v1538_v13 = vadd.f32 %v1537_v2, %v1475_v12  ;;  %v710_v15 = vpop.f32.mrf.mxu0  ;;  %v787_v58 = vpop.f32.mrf.mxu2 }
 0x11f   :  { %v879_v17 = vpop.f32.mrf.mxu1  ;;  %v956_v59 = vpop.f32.mrf.mxu3 }
 0x120   :  { %v880_v19 = vadd.f32 %v879_v17, %v710_v15  ;;  %v957_v62 = vadd.f32 %v956_v59, %v787_v58 }
 0x122   :  { %v1214_v28 = vadd.f32 %v2500_v57, %v880_v19  ;;  %v2809_v0 = vadd.f32 %v2500_v57, %v957_v62 }
 0x124   :  { %v1405_v34 = vadd.f32 %v1404_v11, %v1214_v28  ;;  %v1476_v35 = vmul.f32 %v1214_v28, %v1214_v28  ;;  %v2124_v4 = vpack.c.bf16 %v2809_v0, %v2805_v61 }
 0x126   :  { %v1539_v37 = vadd.f32 %v1538_v13, %v1476_v35  ;;  %v712_v38 = vpop.f32.mrf.mxu0  ;;  %2188 = vst [vmem:[%s3066_s3 + $0xb8] sm:$0xff] %v2124_v4   ;;  %v790_v10 = vpop.f32.mrf.mxu2 }
 0x127   :  { %v881_v40 = vpop.f32.mrf.mxu1  ;;  %v959_v11 = vpop.f32.mrf.mxu3 }
 0x128   :  { %v882_v41 = vadd.f32 %v881_v40, %v712_v38  ;;  %v960_v19 = vadd.f32 %v959_v11, %v790_v10 }
 0x12a   :  { %v1215_v44 = vadd.f32 %v2500_v57, %v882_v41  ;;  %v2825_v25 = vadd.f32 %v2500_v57, %v960_v19 }
 0x12c   :  { %v2049_v46 = vpack.c.bf16 %v1215_v44, %v1214_v28  ;;  %v1406_v47 = vadd.f32 %v1405_v34, %v1215_v44  ;;  %v1477_v48 = vmul.f32 %v1215_v44, %v1215_v44 }
 0x12e   :  { %2173 = vst [vmem:[%s3066_s3 + $0x40] sm:$0xff] %v2049_v46   ;;  %v1540_v50 = vadd.f32 %v1539_v37, %v1477_v48  ;;  %v715_v52 = vpop.f32.mrf.mxu0  ;;  %v792_v23 = vpop.f32.mrf.mxu2 }
 0x12f   :  { %v884_v54 = vpop.f32.mrf.mxu1  ;;  %v961_v24 = vpop.f32.mrf.mxu3 }
 0x130   :  { %v885_v55 = vadd.f32 %v884_v54, %v715_v52  ;;  %v962_v27 = vadd.f32 %v961_v24, %v792_v23 }
 0x132   :  { %v1216_v63 = vadd.f32 %v2500_v57, %v885_v55  ;;  %v2828_v28 = vadd.f32 %v2500_v57, %v962_v27 }
 0x134   :  { %v1407_v2 = vadd.f32 %v1406_v47, %v1216_v63  ;;  %v1478_v3 = vmul.f32 %v1216_v63, %v1216_v63  ;;  %v2129_v29 = vpack.c.bf16 %v2828_v28, %v2825_v25 }
 0x136   :  { %v1541_v5 = vadd.f32 %v1540_v50, %v1478_v3  ;;  %v717_v6 = vpop.f32.mrf.mxu0  ;;  %2189 = vst [vmem:[%s3066_s3 + $0xc0] sm:$0xff] %v2129_v29   ;;  %v795_v36 = vpop.f32.mrf.mxu2 }
 0x137   :  { %v886_v7 = vpop.f32.mrf.mxu1  ;;  %v964_v37 = vpop.f32.mrf.mxu3 }
 0x138   :  { %v887_v9 = vadd.f32 %v886_v7, %v717_v6  ;;  %v965_v42 = vadd.f32 %v964_v37, %v795_v36 }
 0x13a   :  { %v1217_v12 = vadd.f32 %v2500_v57, %v887_v9  ;;  %v2847_v48 = vadd.f32 %v2500_v57, %v965_v42 }
 0x13c   :  { %v2054_v13 = vpack.c.bf16 %v1217_v12, %v1216_v63  ;;  %v2817_v14 = vadd.f32 %v1407_v2, %v1217_v12  ;;  %v1479_v15 = vmul.f32 %v1217_v12, %v1217_v12 }
 0x13e   :  { %2174 = vst [vmem:[%s3066_s3 + $0x48] sm:$0xff] %v2054_v13   ;;  %v2822_v17 = vadd.f32 %v1541_v5, %v1479_v15  ;;  %v720_v20 = vpop.f32.mrf.mxu0  ;;  %v797_v46 = vpop.f32.mrf.mxu2 }
 0x13f   :  { %v889_v21 = vpop.f32.mrf.mxu1  ;;  %v966_v47 = vpop.f32.mrf.mxu3 }
 0x140   :  { %v890_v30 = vadd.f32 %v889_v21, %v720_v20  ;;  %v967_v50 = vadd.f32 %v966_v47, %v797_v46 }
 0x142   :  { %v2836_v38 = vadd.f32 %v2500_v57, %v890_v30  ;;  %v2850_v51 = vadd.f32 %v2500_v57, %v967_v50 }
 0x144   :  { %v2134_v52 = vpack.c.bf16 %v2850_v51, %v2847_v48 }
 0x146   :  { %v722_v33 = vpop.f32.mrf.mxu0  ;;  %2190 = vst [vmem:[%s3066_s3 + $0xc8] sm:$0xff] %v2134_v52   ;;  %v800_v62 = vpop.f32.mrf.mxu2 }
 0x147   :  { %v891_v34 = vpop.f32.mrf.mxu1  ;;  %v969_v63 = vpop.f32.mrf.mxu3 }
 0x148   :  { %v892_v35 = vadd.f32 %v891_v34, %v722_v33  ;;  %v970_v5 = vadd.f32 %v969_v63, %v800_v62 }
 0x14a   :  { %v2839_v40 = vadd.f32 %v2500_v57, %v892_v35  ;;  %v2869_v11 = vadd.f32 %v2500_v57, %v970_v5 }
 0x14c   :  { %v2059_v41 = vpack.c.bf16 %v2839_v40, %v2836_v38 }
 0x14e   :  { %2175 = vst [vmem:[%s3066_s3 + $0x50] sm:$0xff] %v2059_v41   ;;  %v725_v43 = vpop.f32.mrf.mxu0  ;;  %v802_v9 = vpop.f32.mrf.mxu2 }
 0x14f   :  { %v894_v44 = vpop.f32.mrf.mxu1  ;;  %v971_v10 = vpop.f32.mrf.mxu3 }
 0x150   :  { %v895_v54 = vadd.f32 %v894_v44, %v725_v43  ;;  %v972_v12 = vadd.f32 %v971_v10, %v802_v9 }
 0x152   :  { %v2858_v2 = vadd.f32 %v2500_v57, %v895_v54  ;;  %v2872_v13 = vadd.f32 %v2500_v57, %v972_v12 }
 0x154   :  { %v2139_v15 = vpack.c.bf16 %v2872_v13, %v2869_v11 }
 0x156   :  { %v727_v55 = vpop.f32.mrf.mxu0  ;;  %2191 = vst [vmem:[%s3066_s3 + $0xd0] sm:$0xff] %v2139_v15   ;;  %v805_v24 = vpop.f32.mrf.mxu2  ;;  %v1480_v15 = vmul.f32 %v2836_v38, %v2836_v38 }
 0x157   :  { %v896_v58 = vpop.f32.mrf.mxu1  ;;  %v974_v27 = vpop.f32.mrf.mxu3 }
 0x158   :  { %v897_v59 = vadd.f32 %v896_v58, %v727_v55  ;;  %v975_v34 = vadd.f32 %v974_v27, %v805_v24  ;;  %v1543_v27 = vadd.f32 %v2822_v17, %v1480_v15 }
 0x15a   :  { %v2861_v3 = vadd.f32 %v2500_v57, %v897_v59  ;;  %v2885_v42 = vadd.f32 %v2500_v57, %v975_v34 }
 0x15c   :  { %v2064_v4 = vpack.c.bf16 %v2861_v3, %v2858_v2 }
 0x15e   :  { %2176 = vst [vmem:[%s3066_s3 + $0x58] sm:$0xff] %v2064_v4   ;;  %v730_v6 = vpop.f32.mrf.mxu0  ;;  %v807_v37 = vpop.f32.mrf.mxu2 }
 0x15f   :  { %v899_v7 = vpop.f32.mrf.mxu1  ;;  %v976_v41 = vpop.f32.mrf.mxu3 }
 0x160   :  { %v900_v19 = vadd.f32 %v899_v7, %v730_v6  ;;  %v977_v43 = vadd.f32 %v976_v41, %v807_v37 }
 0x162   :  { %v1222_v29 = vadd.f32 %v2500_v57, %v900_v19  ;;  %v2888_v44 = vadd.f32 %v2500_v57, %v977_v43 }
 0x164   :  { %v2144_v46 = vpack.c.bf16 %v2888_v44, %v2885_v42 }
 0x166   :  { %v732_v20 = vpop.f32.mrf.mxu0  ;;  %2192 = vst [vmem:[%s3066_s3 + $0xd8] sm:$0xff] %v2144_v46   ;;  %v810_v55 = vpop.f32.mrf.mxu2 }
 0x167   :  { %v901_v21 = vpop.f32.mrf.mxu1  ;;  %v979_v58 = vpop.f32.mrf.mxu3 }
 0x168   :  { %v902_v23 = vadd.f32 %v901_v21, %v732_v20  ;;  %v980_v6 = vadd.f32 %v979_v58, %v810_v55  ;;  %v1481_v20 = vmul.f32 %v2839_v40, %v2839_v40 }
 0x16a   :  { %v1223_v30 = vadd.f32 %v2500_v57, %v902_v23  ;;  %v2901_v12 = vadd.f32 %v2500_v57, %v980_v6  ;;  %v1409_v23 = vadd.f32 %v2817_v14, %v2836_v38  ;;  %v1544_v46 = vadd.f32 %v1543_v27, %v1481_v20 }
 0x16b   :  { %v1483_v14 = vmul.f32 %v2861_v3, %v2861_v3 }
 0x16c   :  { %v2069_v33 = vpack.c.bf16 %v1223_v30, %v1222_v29 }
 0x16e   :  { %2177 = vst [vmem:[%s3066_s3 + $0x60] sm:$0xff] %v2069_v33   ;;  %v735_v35 = vpop.f32.mrf.mxu0  ;;  %v812_v7 = vpop.f32.mrf.mxu2  ;;  %v1482_v33 = vmul.f32 %v2858_v2, %v2858_v2 }
 0x16f   :  { %v904_v36 = vpop.f32.mrf.mxu1  ;;  %v981_v9 = vpop.f32.mrf.mxu3 }
 0x170   :  { %v905_v47 = vadd.f32 %v904_v36, %v735_v35  ;;  %v982_v10 = vadd.f32 %v981_v9, %v812_v7  ;;  %v1410_v36 = vadd.f32 %v1409_v23, %v2839_v40 }
 0x172   :  { %v1224_v59 = vadd.f32 %v2500_v57, %v905_v47  ;;  %v2906_v19 = vadd.f32 %v2500_v57, %v982_v10  ;;  %v1411_v17 = vadd.f32 %v1410_v36, %v2858_v2 }
 0x174   :  { %v2149_v21 = vpack.c.bf16 %v2906_v19, %v2901_v12  ;;  %v1486_v7 = vmul.f32 %v1224_v59, %v1224_v59 }
 0x176   :  { %v737_v50 = vpop.f32.mrf.mxu0  ;;  %2193 = vst [vmem:[%s3066_s3 + $0xe0] sm:$0xff] %v2149_v21   ;;  %v815_v41 = vpop.f32.mrf.mxu2 }
 0x177   :  { %v906_v52 = vpop.f32.mrf.mxu1  ;;  %v984_v43 = vpop.f32.mrf.mxu3 }
 0x178   :  { %v907_v54 = vadd.f32 %v906_v52, %v737_v50  ;;  %v1545_v50 = vadd.f32 %v1544_v46, %v1482_v33  ;;  %v1484_v52 = vmul.f32 %v1222_v29, %v1222_v29  ;;  %v985_v10 = vadd.f32 %v984_v43, %v815_v41 }
 0x17a   :  { %v1225_v62 = vadd.f32 %v2500_v57, %v907_v54  ;;  %v1412_v54 = vadd.f32 %v1411_v17, %v2861_v3  ;;  %v1546_v58 = vadd.f32 %v1545_v50, %v1483_v14 }
 0x17c   :  { %v2074_v63 = vpack.c.bf16 %v1225_v62, %v1224_v59  ;;  %v1413_v40 = vadd.f32 %v1412_v54, %v1222_v29  ;;  %v2931_v29 = vadd.f32 %v2500_v57, %v985_v10 }
 0x17e   :  { %2178 = vst [vmem:[%s3066_s3 + $0x68] sm:$0xff] %v2074_v63   ;;  %v740_v4 = vpop.f32.mrf.mxu0  ;;  %v1485_v63 = vmul.f32 %v1223_v30, %v1223_v30  ;;  %v1414_v2 = vadd.f32 %v1413_v40, %v1223_v30  ;;  %v817_v15 = vpop.f32.mrf.mxu2 }
 0x17f   :  { %v909_v5 = vpop.f32.mrf.mxu1  ;;  %v986_v20 = vpop.f32.mrf.mxu3 }
 0x180   :  { %v910_v24 = vadd.f32 %v909_v5, %v740_v4  ;;  %v1547_v4 = vadd.f32 %v1546_v58, %v1484_v52  ;;  %v987_v21 = vadd.f32 %v986_v20, %v817_v15  ;;  %v1415_v3 = vadd.f32 %v1414_v2, %v1224_v59 }
 0x182   :  { %v1226_v38 = vadd.f32 %v2500_v57, %v910_v24  ;;  %v1548_v23 = vadd.f32 %v1547_v4, %v1485_v63  ;;  %v1487_v24 = vmul.f32 %v1225_v62, %v1225_v62  ;;  %v2934_v27 = vadd.f32 %v2500_v57, %v987_v21 }
 0x184   :  { %v1549_v33 = vadd.f32 %v1548_v23, %v1486_v7  ;;  %v2154_v36 = vpack.c.bf16 %v2934_v27, %v2931_v29  ;;  %v1493_v7 = vmul.f32 %v2565_v53, %v2565_v53  ;;  %v1494_v23 = vmul.f32 %v2589_v18, %v2589_v18 }
 0x186   :  { %v742_v34 = vpop.f32.mrf.mxu0  ;;  %2194 = vst [vmem:[%s3066_s3 + $0xe8] sm:$0xff] %v2154_v36  }
 0x187   :  { %v911_v35 = vpop.f32.mrf.mxu1  ;;  %v989_v54 = vpop.f32.mrf.mxu3 }
 0x188   :  { %v912_v37 = vadd.f32 %v911_v35, %v742_v34  ;;  %v1416_v34 = vadd.f32 %v1415_v3, %v1225_v62  ;;  %v1488_v35 = vmul.f32 %v1226_v38, %v1226_v38  ;;  %v820_v62 = vpop.f32.mrf.mxu2 }
 0x189   :  { %v990_v10 = vadd.f32 %v989_v54, %v820_v62 }
 0x18a   :  { %v1227_v47 = vadd.f32 %v2500_v57, %v912_v37  ;;  %v1550_v37 = vadd.f32 %v1549_v33, %v1487_v24  ;;  %v1417_v41 = vadd.f32 %v1416_v34, %v1226_v38 }
 0x18c   :  { %v2079_v55 = vpack.c.bf16 %v1227_v47, %v1226_v38  ;;  %v1489_v43 = vmul.f32 %v1227_v47, %v1227_v47  ;;  %v1551_v14 = vadd.f32 %v1550_v37, %v1488_v35  ;;  %v1418_v17 = vadd.f32 %v1417_v41, %v1227_v47 }
 0x18e   :  { %2179 = vst [vmem:[%s3066_s3 + $0x70] sm:$0xff] %v2079_v55   ;;  %v745_v5 = vpop.f32.mrf.mxu0  ;;  %v1552_v55 = vadd.f32 %v1551_v14, %v1489_v43  ;;  %v1497_v43 = vmul.f32 %v2645_v1, %v2645_v1 }
 0x18f   :  { %v914_v6 = vpop.f32.mrf.mxu1  ;;  %v991_v20 = vpop.f32.mrf.mxu3 }
 0x190   :  { %v915_v9 = vadd.f32 %v914_v6, %v745_v5  ;;  %v1492_v6 = vmul.f32 %v2549_v45, %v2549_v45  ;;  %v822_v15 = vpop.f32.mrf.mxu2 }
 0x191   :  { %v992_v21 = vadd.f32 %v991_v20, %v822_v15  ;;  %v1504_v15 = vmul.f32 %v2777_v22, %v2777_v22 }
 0x192   :  { %v1228_v30 = vadd.f32 %v2500_v57, %v915_v9 }
 0x194   :  { %v1490_v50 = vmul.f32 %v1228_v30, %v1228_v30  ;;  %v1419_v58 = vadd.f32 %v1418_v17, %v1228_v30  ;;  %v1498_v17 = vmul.f32 %v2669_v31, %v2669_v31 }
 0x196   :  { %v747_v46 = vpop.f32.mrf.mxu0  ;;  %v1553_v63 = vadd.f32 %v1552_v55, %v1490_v50  ;;  %v1500_v55 = vmul.f32 %v2709_v8, %v2709_v8 }
 0x197   :  { %v916_v59 = vpop.f32.mrf.mxu1  ;;  %v994_v14 = vpop.f32.mrf.mxu3 }
 0x198   :  { %v917_v52 = vadd.f32 %v916_v59, %v747_v46  ;;  %v825_v59 = vpop.f32.mrf.mxu2 }
 0x19a   :  { %v1229_v40 = vadd.f32 %v2500_v57, %v917_v52 }
 0x19c   :  { %v2084_v4 = vpack.c.bf16 %v1229_v40, %v1228_v30  ;;  %v1420_v38 = vadd.f32 %v1419_v58, %v1229_v40  ;;  %v1491_v5 = vmul.f32 %v1229_v40, %v1229_v40  ;;  %v1501_v40 = vmul.f32 %v2725_v16, %v2725_v16 }
 0x19e   :  { %2180 = vst [vmem:[%s3066_s3 + $0x78] sm:$0xff] %v2084_v4   ;;  %v1421_v47 = vadd.f32 %v1420_v38, %v2549_v45  ;;  %v1554_v2 = vadd.f32 %v1553_v63, %v1491_v5  ;;  %v2214_v45 = vld [vmem:[%s3065_s2] ss:$0 sm:$0xff] }
 0x19f   :  { %v2958_v33 = vadd.f32 %v2214_v45, %v990_v10  ;;  %v2960_v34 = vadd.f32 %v2214_v45, %v992_v21  ;;  %v996_v5 = vpop.f32.mrf.mxu3 }
 0x1a0   :  { %v1422_v9 = vadd.f32 %v1421_v47, %v2565_v53  ;;  %v1555_v57 = vadd.f32 %v1554_v2, %v1492_v6  ;;  %v1495_v53 = vmul.f32 %v2605_v26, %v2605_v26  ;;  %v827_v38 = vpop.f32.mrf.mxu2 }
 0x1a1   :  { %v2159_v36 = vpack.c.bf16 %v2960_v34, %v2958_v33  ;;  %v997_v6 = vadd.f32 %v996_v5, %v827_v38  ;;  %v1519_v5 = vmul.f32 %v2934_v27, %v2934_v27 }
 0x1a2   :  { %v1423_v3 = vadd.f32 %v1422_v9, %v2589_v18  ;;  %v1556_v24 = vadd.f32 %v1555_v57, %v1493_v7  ;;  %v1496_v18 = vmul.f32 %v2629_v56, %v2629_v56 }
 0x1a3   :  { %2195 = vst [vmem:[%s3066_s3 + $0xf0] sm:$0xff] %v2159_v36   ;;  %v2991_v9 = vadd.f32 %v2214_v45, %v997_v6 }
 0x1a4   :  { %v1424_v35 = vadd.f32 %v1423_v3, %v2605_v26  ;;  %v1557_v30 = vadd.f32 %v1556_v24, %v1494_v23 }
 0x1a6   :  { %v1425_v37 = vadd.f32 %v1424_v35, %v2629_v56  ;;  %v1558_v41 = vadd.f32 %v1557_v30, %v1495_v53  ;;  %v1499_v56 = vmul.f32 %v2685_v39, %v2685_v39  ;;  %v1507_v53 = vmul.f32 %v2809_v0, %v2809_v0 }
 0x1a7   :  { %v1508_v30 = vmul.f32 %v2825_v25, %v2825_v25 }
 0x1a8   :  { %v1426_v46 = vadd.f32 %v1425_v37, %v2645_v1  ;;  %v1559_v26 = vadd.f32 %v1558_v41, %v1496_v18 }
 0x1aa   :  { %v1427_v50 = vadd.f32 %v1426_v46, %v2669_v31  ;;  %v1560_v52 = vadd.f32 %v1559_v26, %v1497_v43  ;;  %v995_v31 = vadd.f32 %v994_v14, %v825_v59 }
 0x1ac   :  { %v1428_v62 = vadd.f32 %v1427_v50, %v2685_v39  ;;  %v1561_v54 = vadd.f32 %v1560_v52, %v1498_v17  ;;  %v1502_v39 = vmul.f32 %v2749_v49, %v2749_v49  ;;  %v1260_v7 = vadd.f32 %v2214_v45, %v995_v31 }
 0x1ad   :  { %v1518_v31 = vmul.f32 %v2931_v29, %v2931_v29 }
 0x1ae   :  { %v1429_v1 = vadd.f32 %v1428_v62, %v2709_v8  ;;  %v1562_v58 = vadd.f32 %v1561_v54, %v1499_v56  ;;  %v1503_v8 = vmul.f32 %v2765_v60, %v2765_v60  ;;  %v2164_v10 = vpack.c.bf16 %v2991_v9, %v1260_v7 }
 0x1b0   :  { %v1430_v63 = vadd.f32 %v1429_v1, %v2725_v16  ;;  %v1563_v4 = vadd.f32 %v1562_v58, %v1500_v55  ;;  %2196 = vst [vmem:[%s3066_s3 + $0xf8] sm:$0xff] %v2164_v10   ;;  %v1516_v1 = vmul.f32 %v2901_v12, %v2901_v12 }
 0x1b2   :  { %v1431_v47 = vadd.f32 %v1430_v63, %v2749_v49  ;;  %v1564_v2 = vadd.f32 %v1563_v4, %v1501_v40  ;;  %v1505_v49 = vmul.f32 %v2793_v32, %v2793_v32  ;;  %v1517_v63 = vmul.f32 %v2906_v19, %v2906_v19 }
 0x1b4   :  { %v1432_v57 = vadd.f32 %v1431_v47, %v2765_v60  ;;  %v1565_v16 = vadd.f32 %v1564_v2, %v1502_v39  ;;  %v1506_v60 = vmul.f32 %v2805_v61, %v2805_v61  ;;  %v1520_v39 = vmul.f32 %v2958_v33, %v2958_v33 }
 0x1b5   :  { %v1521_v2 = vmul.f32 %v2960_v34, %v2960_v34 }
 0x1b6   :  { %v1566_v20 = vadd.f32 %v1565_v16, %v1503_v8  ;;  %v1433_v21 = vadd.f32 %v1432_v57, %v2777_v22  ;;  %v1522_v57 = vmul.f32 %v1260_v7, %v1260_v7 }
 0x1b8   :  { %v1434_v23 = vadd.f32 %v1433_v21, %v2793_v32  ;;  %v1567_v3 = vadd.f32 %v1566_v20, %v1504_v15  ;;  %v1509_v32 = vmul.f32 %v2828_v28, %v2828_v28 }
 0x1ba   :  { %v1435_v24 = vadd.f32 %v1434_v23, %v2805_v61  ;;  %v1568_v45 = vadd.f32 %v1567_v3, %v1505_v49  ;;  %v1510_v61 = vmul.f32 %v2847_v48, %v2847_v48 }
 0x1bc   :  { %v1436_v22 = vadd.f32 %v1435_v24, %v2809_v0  ;;  %v1569_v35 = vadd.f32 %v1568_v45, %v1506_v60  ;;  %v1511_v0 = vmul.f32 %v2850_v51, %v2850_v51 }
 0x1be   :  { %v1437_v36 = vadd.f32 %v1436_v22, %v2825_v25  ;;  %v1570_v18 = vadd.f32 %v1569_v35, %v1507_v53  ;;  %v1512_v25 = vmul.f32 %v2869_v11, %v2869_v11 }
 0x1c0   :  { %v1438_v37 = vadd.f32 %v1437_v36, %v2828_v28  ;;  %v1571_v41 = vadd.f32 %v1570_v18, %v1508_v30  ;;  %v1513_v28 = vmul.f32 %v2872_v13, %v2872_v13 }
 0x1c2   :  { %v1439_v43 = vadd.f32 %v1438_v37, %v2847_v48  ;;  %v1572_v46 = vadd.f32 %v1571_v41, %v1509_v32  ;;  %v1514_v48 = vmul.f32 %v2885_v42, %v2885_v42 }
 0x1c4   :  { %v1440_v26 = vadd.f32 %v1439_v43, %v2850_v51  ;;  %v1573_v59 = vadd.f32 %v1572_v46, %v1510_v61  ;;  %v1515_v51 = vmul.f32 %v2888_v44, %v2888_v44 }
 0x1c6   :  { %v1441_v14 = vadd.f32 %v1440_v26, %v2869_v11  ;;  %v1574_v17 = vadd.f32 %v1573_v59, %v1511_v0 }
 0x1c8   :  { %v1442_v50 = vadd.f32 %v1441_v14, %v2872_v13  ;;  %v1575_v52 = vadd.f32 %v1574_v17, %v1512_v25 }
 0x1ca   :  { %v1443_v56 = vadd.f32 %v1442_v50, %v2885_v42  ;;  %v1576_v62 = vadd.f32 %v1575_v52, %v1513_v28 }
 0x1cc   :  { %v1444_v54 = vadd.f32 %v1443_v56, %v2888_v44  ;;  %v1577_v55 = vadd.f32 %v1576_v62, %v1514_v48 }
 0x1ce   :  { %v1445_v11 = vadd.f32 %v1444_v54, %v2901_v12  ;;  %v1578_v58 = vadd.f32 %v1577_v55, %v1515_v51 }
 0x1d0   :  { %v1579_v13 = vadd.f32 %v1578_v58, %v1516_v1  ;;  %v1446_v40 = vadd.f32 %v1445_v11, %v2906_v19 }
 0x1d2   :  { %v1580_v42 = vadd.f32 %v1579_v13, %v1517_v63  ;;  %v1447_v4 = vadd.f32 %v1446_v40, %v2931_v29 }
 0x1d4   :  { %v1581_v44 = vadd.f32 %v1580_v42, %v1518_v31  ;;  %v1448_v38 = vadd.f32 %v1447_v4, %v2934_v27  ;;  %v1523_v27 = vmul.f32 %v2991_v9, %v2991_v9 }
 0x1d6   :  { %v1582_v12 = vadd.f32 %v1581_v44, %v1519_v5  ;;  %v1449_v6 = vadd.f32 %v1448_v38, %v2958_v33 }
 0x1d8   :  { %v1583_v47 = vadd.f32 %v1582_v12, %v1520_v39  ;;  %v1450_v19 = vadd.f32 %v1449_v6, %v2960_v34 }
 0x1da   :  { %v1584_v8 = vadd.f32 %v1583_v47, %v1521_v2  ;;  %v1451_v29 = vadd.f32 %v1450_v19, %v1260_v7 }
 0x1dc   :  { %v1585_v16 = vadd.f32 %v1584_v8, %v1522_v57  ;;  %v1452_v10 = vadd.f32 %v1451_v29, %v2991_v9 }
 0x1de   :  { %v1453_v15 = vrot.slane %v1452_v10, 4  ;;  %v1586_v20 = vadd.f32 %v1585_v16, %v1523_v27 }
 0x1e0   :  { %v1454_v21 = vadd.f32 %v1453_v15, %v1452_v10  ;;  %v1587_v49 = vrot.slane %v1586_v20, 4 }
 0x1e2   :  { %v1455_v33 = vrot.slane %v1454_v21, 2  ;;  %v1588_v23 = vadd.f32 %v1587_v49, %v1586_v20 }
 0x1e4   :  { %v1456_v3 = vadd.f32 %v1455_v33, %v1454_v21  ;;  %v1589_v60 = vrot.slane %v1588_v23, 2 }
 0x1e6   :  { %v1457_v24 = vrot.slane %v1456_v3, 1  ;;  %v1590_v45 = vadd.f32 %v1589_v60, %v1588_v23 }
 0x1e8   :  { %v1458_v34 = vadd.f32 %v1457_v24, %v1456_v3  ;;  %v1591_v53 = vrot.slane %v1590_v45, 1 }
 0x1ea   :  { %1459 = vst [vmem:[%s3067_s4] sm:$0x1] %v1458_v34  ;;  %v1592_v7 = vadd.f32 %v1591_v53, %v1590_v45 }
 0x1ec   :  { %1593 = vst [vmem:[%s3068_s5] sm:$0x1] %v1592_v7 }

// kernel: model_forward.7
= control target key start
LH: loop header
LB: loop body
LE: loop exit
PB: predicated region body
PF: predicated region fallthrough
CT: control target
= control target key end

     0   :  { %s1489_s18 = smov 0   ;;  %s1491_s19 = smov 0   ;;  %s1659_s0 = inlined_call_operand.vmem [shape: bf16[128,768], index: 0, kind: input, shape index: {}]   ;;  %s1660_s1 = inlined_call_operand.vmem [shape: bf16[768,128], index: 1, kind: input, shape index: {}]   ;;  %s1661_s2 = inlined_call_operand.vmem [shape: f32[1,128], index: 2, kind: input, shape index: {}]   ;;  %s1662_s3 = inlined_call_operand.vmem [shape: bf16[128,128], index: 3, kind: output, shape index: {0}]   ;;  %s1663_s4 = inlined_call_operand.vmem [shape: f32[1,1,128], index: 4, kind: output, shape index: {1}]   ;;  %s1664_s5 = inlined_call_operand.vmem [shape: f32[1,1,128], index: 5, kind: output, shape index: {2}]  }
   0x1   :  { %s1493_s20 = smov 0   ;;  %s1495_s21 = smov 0  }
   0x2   :  { %s1497_s22 = smov 0  }
   0x3 LB: > { %s28_s23 = sadd.s32 1, %s1452_s21  ;;  %p51_p1 = scmp.ne.s32.totalorder %s1444_s19, %s1440_s18  ;;  %s1456_s22 = sphi %s1497_s22, %s16_s22   ;;  %s1452_s21 = sphi %s1495_s21, %s1668_s21   ;;  %s1448_s20 = sphi %s1493_s20, %s1667_s20   ;;  %s1444_s19 = sphi %s1491_s19, %s1666_s19   ;;  %s1440_s18 = sphi %s1489_s18, %s1665_s18  }
   0x4   : > { %p29_p0 = scmp.ge.s32.totalorder %s28_s23, 3  ;;  %p52_p2 = scmp.eq.s32.totalorder %s1456_s22, 0 }
   0x5   : > { %s44_s25 = sadd.s32 1, %s1444_s19  ;;  %p1136_p5 = scmp.ge.s32.totalorder %s1456_s22, 3 }
   0x6   : > { %s1670_s23 = smov (%p29_p0, %s28_s23), 0  ;;  %p53_p3 = por %p52_p2, %p51_p1 }
   0x7   : > { %s40_s24 = ssub.s32 %s1452_s21, %s1670_s23  ;;  %221 = sbr.rel (%p1136_p5) target bundleno = 32 (0x20), region = 20 }
   0x8   : > { %p42_p4 = scmp.eq.s32.totalorder %s40_s24, 0 }
   0xa   : > { %s1524_s26 = scalar_select %p42_p4, %s1444_s19, %s44_s25  }
   0xc   : > { %224 = sbr.rel (!%p53_p3) target bundleno = 32 (0x20), region = 24  ;;  %s226_s27 = sand.u32 (%p53_p3), 1, %s1444_s19  }
   0xd   : > { %s1280_s28 = sshll.u32 (%p53_p3), %s1452_s21, 3  ;;  %s1137_s29 = sshll.u32 (%p53_p3), %s226_s27, 7 }
   0xe   : > { %s1532_s7 = scalar_lea.vmem (%p53_p3), %s1659_s0, %s1280_s28  ;;  %s228_s8 = scalar_lea.vmem (%p53_p3), [#allocation3], %s1137_s29 }
   0xf   : > { %v293_v0 = vld [vmem:[%s1532_s7] sm:$0xff] (%p53_p3)  ;;  %v295_v1 = vld [vmem:[%s1532_s7 + $0x18] sm:$0xff] (%p53_p3)  ;;  %v297_v2 = vld [vmem:[%s1532_s7 + $0x30] sm:$0xff] (%p53_p3) }
  0x10   : > { %294 = vst [vmem:[%s228_s8] sm:$0xff] (%p53_p3), %v293_v0  ;;  %v299_v3 = vld [vmem:[%s1532_s7 + $0x48] sm:$0xff] (%p53_p3)  ;;  %v301_v4 = vld [vmem:[%s1532_s7 + $0x60] sm:$0xff] (%p53_p3)  ;;  %v303_v5 = vld [vmem:[%s1532_s7 + $0x78] sm:$0xff] (%p53_p3) }
  0x11   : > { %296 = vst [vmem:[%s228_s8 + $0x8] sm:$0xff] %v295_v1  ;;  %v305_v6 = vld [vmem:[%s1532_s7 + $0x90] sm:$0xff]  ;;  %v307_v7 = vld [vmem:[%s1532_s7 + $0xa8] sm:$0xff]  ;;  %v309_v8 = vld [vmem:[%s1532_s7 + $0xc0] sm:$0xff] }
  0x12   : > { %298 = vst [vmem:[%s228_s8 + $0x10] sm:$0xff] %v297_v2  ;;  %v311_v9 = vld [vmem:[%s1532_s7 + $0xd8] sm:$0xff]  ;;  %v313_v10 = vld [vmem:[%s1532_s7 + $0xf0] sm:$0xff]  ;;  %v315_v11 = vld [vmem:[%s1532_s7 + $0x108] sm:$0xff] }
  0x13   : > { %300 = vst [vmem:[%s228_s8 + $0x18] sm:$0xff] %v299_v3  ;;  %v317_v12 = vld [vmem:[%s1532_s7 + $0x120] sm:$0xff]  ;;  %v319_v13 = vld [vmem:[%s1532_s7 + $0x138] sm:$0xff]  ;;  %v321_v14 = vld [vmem:[%s1532_s7 + $0x150] sm:$0xff] }
  0x14   : > { %302 = vst [vmem:[%s228_s8 + $0x20] sm:$0xff] %v301_v4  ;;  %v323_v15 = vld [vmem:[%s1532_s7 + $0x168] sm:$0xff] }
  0x15   : > { %304 = vst [vmem:[%s228_s8 + $0x28] sm:$0xff] %v303_v5 }
  0x16   : > { %306 = vst [vmem:[%s228_s8 + $0x30] sm:$0xff] %v305_v6 }
  0x17   : > { %308 = vst [vmem:[%s228_s8 + $0x38] sm:$0xff] %v307_v7 }
  0x18   : > { %310 = vst [vmem:[%s228_s8 + $0x40] sm:$0xff] %v309_v8 }
  0x19   : > { %312 = vst [vmem:[%s228_s8 + $0x48] sm:$0xff] %v311_v9 }
  0x1a   : > { %314 = vst [vmem:[%s228_s8 + $0x50] sm:$0xff] %v313_v10 }
  0x1b   : > { %316 = vst [vmem:[%s228_s8 + $0x58] sm:$0xff] %v315_v11 }
  0x1c   : > { %318 = vst [vmem:[%s228_s8 + $0x60] sm:$0xff] %v317_v12 }
  0x1d   : > { %320 = vst [vmem:[%s228_s8 + $0x68] sm:$0xff] %v319_v13 }
  0x1e   : > { %322 = vst [vmem:[%s228_s8 + $0x70] sm:$0xff] %v321_v14 }
  0x1f   : > { %324 = vst [vmem:[%s228_s8 + $0x78] sm:$0xff] %v323_v15 }
  0x20 PF: > { %p1140_p6 = scmp.ge.s32.totalorder %s1456_s22, 1  ;;  %p341_p7 = scmp.lt.s32.totalorder %s1456_s22, 4 }
  0x22   : > { %p342_p8 = pnand %p1140_p6, %p341_p7 }
  0x23   : > { %s348_s9 = sand.u32 (!%p342_p8), 1, %s1440_s18   ;;  %s1142_s10 = sshll.u32 (!%p342_p8), %s1448_s20, 5 }
  0x24   : > { %345 = sbr.rel (%p342_p8) target bundleno = 339 (0x153), region = 66  ;;  %s1141_s11 = sshll.u32 (!%p342_p8), %s348_s9, 7 }
  0x25   : > { %p404_p9 = scmp.lt.s32.totalorder (!%p342_p8), %s1142_s10, 95  ;;  %s1559_s16 = scalar_lea.vmem (!%p342_p8), [#allocation3], %s1141_s11 }
  0x26   : > { %p1144_p10 = scmp.ne.s32.totalorder (!%p342_p8), %s1448_s20, 0 }
  0x29   : > { %s1672_s10 = smov (!%p404_p9, %s1142_s10), 95  ;;  %439 = sbr.rel (%p1144_p10) target bundleno = 63 (0x3f), region = 74 }
  0x2a   : > { %s1143_s12 = sshll.u32 %s1672_s10, 2 }
  0x2b   : > { %s1557_s15 = scalar_lea.vmem %s1660_s1, %s1143_s12 }
  0x2e   : > { %v1458_v16 = vmov 0.0  }
  0x2f   : > { %440 = vst [vmem:[#allocation2 + $0x30] sm:$0xff] %v1458_v16 }
  0x30   : > { %441 = vst [vmem:[#allocation2] sm:$0xff] %v1458_v16 }
  0x31   : > { %442 = vst [vmem:[#allocation2 + $0x58] sm:$0xff] %v1458_v16 }
  0x32   : > { %443 = vst [vmem:[#allocation2 + $0x18] sm:$0xff] %v1458_v16 }
  0x33   : > { %444 = vst [vmem:[#allocation2 + $0x50] sm:$0xff] %v1458_v16 }
  0x34   : > { %445 = vst [vmem:[#allocation2 + $0x68] sm:$0xff] %v1458_v16 }
  0x35   : > { %446 = vst [vmem:[#allocation2 + $0x8] sm:$0xff] %v1458_v16 }
  0x36   : > { %447 = vst [vmem:[#allocation2 + $0x48] sm:$0xff] %v1458_v16 }
  0x37   : > { %448 = vst [vmem:[#allocation2 + $0x40] sm:$0xff] %v1458_v16 }
  0x38   : > { %449 = vst [vmem:[#allocation2 + $0x20] sm:$0xff] %v1458_v16 }
  0x39   : > { %450 = vst [vmem:[#allocation2 + $0x10] sm:$0xff] %v1458_v16 }
  0x3a   : > { %451 = vst [vmem:[#allocation2 + $0x38] sm:$0xff] %v1458_v16 }
  0x3b   : > { %452 = vst [vmem:[#allocation2 + $0x60] sm:$0xff] %v1458_v16 }
  0x3c   : > { %453 = vst [vmem:[#allocation2 + $0x70] sm:$0xff] %v1458_v16 }
  0x3d   : > { %454 = vst [vmem:[#allocation2 + $0x78] sm:$0xff] %v1458_v16 }
  0x3e   : > { %455 = vst [vmem:[#allocation2 + $0x28] sm:$0xff] %v1458_v16 }
  0x3f PF: > { %v1304_v17 = vld [vmem:[%s1557_s15 + $0x38] sm:$0xff]  ;;  %v1303_v19 = vld [vmem:[%s1557_s15 + $0x30] sm:$0xff]  ;;  %v1302_v21 = vld [vmem:[%s1557_s15 + $0x28] sm:$0xff]  ;;  %p1273_p11 = scmp.ne.s32.totalorder %s1448_s20, 2 }
  0x40   : > { %v1312_v18 = vld [vmem:[%s1557_s15 + $0x78] sm:$0xff]  ;;  %696 = vmatpush.bf16.msra.mxu0 %v1304_v17  ;;  %1360 = vmatpush.bf16.msra.mxu2 %v1304_v17  ;;  %v1311_v20 = vld [vmem:[%s1557_s15 + $0x70] sm:$0xff]  ;;  %v1310_v22 = vld [vmem:[%s1557_s15 + $0x68] sm:$0xff] }
  0x41   : > { %745 = vmatpush.bf16.msra.mxu1 %v1312_v18  ;;  %1368 = vmatpush.bf16.msra.mxu3 %v1312_v18  ;;  %v1301_v23 = vld [vmem:[%s1557_s15 + $0x20] sm:$0xff]  ;;  %v1300_v25 = vld [vmem:[%s1557_s15 + $0x18] sm:$0xff]  ;;  %v1299_v27 = vld [vmem:[%s1557_s15 + $0x10] sm:$0xff] }
  0x42   : > { %v1309_v24 = vld [vmem:[%s1557_s15 + $0x60] sm:$0xff]  ;;  %v1308_v26 = vld [vmem:[%s1557_s15 + $0x58] sm:$0xff]  ;;  %v1307_v28 = vld [vmem:[%s1557_s15 + $0x50] sm:$0xff] }
  0x43   : > { %v1298_v29 = vld [vmem:[%s1557_s15 + $0x8] sm:$0xff]  ;;  %v1297_v31 = vld [vmem:[%s1557_s15] sm:$0xff]  ;;  %v1155_v45 = vld [vmem:[%s1559_s16 + $0x10] sm:$0xf] }
  0x44   : > { %697 = vmatpush.bf16.msra.mxu0 %v1303_v19  ;;  %1361 = vmatpush.bf16.msra.mxu2 %v1303_v19  ;;  %v1306_v30 = vld [vmem:[%s1557_s15 + $0x48] sm:$0xff]  ;;  %v1305_v32 = vld [vmem:[%s1557_s15 + $0x40] sm:$0xff]  ;;  %v1284_v46 = vld [vmem:[%s1559_s16 + $0x14] sm:$0xf0] }
  0x45   : > { %746 = vmatpush.bf16.msra.mxu1 %v1311_v20  ;;  %1369 = vmatpush.bf16.msra.mxu3 %v1311_v20  ;;  %v1147_v33 = vld [vmem:[%s1559_s16] sm:$0xf]  ;;  %v1282_v34 = vld [vmem:[%s1559_s16 + $0x4] sm:$0xf0]  ;;  %v1281_v37 = vld [vmem:[%s1559_s16 + $0x4] sm:$0xf]  ;;  %v1156_v53 = vor.u32 %v1284_v46, %v1155_v45 }
  0x46   : > { %v1179_v35 = vld [vmem:[%s1559_s16 + $0x40] sm:$0xf]  ;;  %v1290_v36 = vld [vmem:[%s1559_s16 + $0x44] sm:$0xf0]  ;;  %v1149_v38 = vld [vmem:[%s1559_s16 + $0x8] sm:$0xf0]  ;;  %v1148_v41 = vor.u32 %v1282_v34, %v1147_v33 }
  0x47   : > { %v1289_v39 = vld [vmem:[%s1559_s16 + $0x44] sm:$0xf]  ;;  %v1181_v40 = vld [vmem:[%s1559_s16 + $0x48] sm:$0xf0]  ;;  %v1180_v42 = vor.u32 %v1290_v36, %v1179_v35  ;;  %v1152_v43 = vor.u32 %v1281_v37, %v1149_v38  ;;  %v1187_v47 = vld [vmem:[%s1559_s16 + $0x50] sm:$0xf] }
  0x48   : > { %698 = vmatpush.bf16.msra.mxu0 %v1302_v21  ;;  %1362 = vmatpush.bf16.msra.mxu2 %v1302_v21  ;;  %v1184_v44 = vor.u32 %v1289_v39, %v1181_v40  ;;  %v1292_v48 = vld [vmem:[%s1559_s16 + $0x54] sm:$0xf0]  ;;  %v1283_v49 = vld [vmem:[%s1559_s16 + $0x14] sm:$0xf]  ;;  %v1157_v50 = vld [vmem:[%s1559_s16 + $0x18] sm:$0xf0] }
  0x49   : > { %747 = vmatpush.bf16.msra.mxu1 %v1310_v22  ;;  %1370 = vmatpush.bf16.msra.mxu3 %v1310_v22  ;;  %v1291_v51 = vld [vmem:[%s1559_s16 + $0x54] sm:$0xf]  ;;  %v1189_v52 = vld [vmem:[%s1559_s16 + $0x58] sm:$0xf0]  ;;  %v1188_v54 = vor.u32 %v1292_v48, %v1187_v47  ;;  %v1160_v55 = vor.u32 %v1283_v49, %v1157_v50  ;;  %v1163_v57 = vld [vmem:[%s1559_s16 + $0x20] sm:$0xf] }
  0x4a   : > { %v1192_v56 = vor.u32 %v1291_v51, %v1189_v52  ;;  %v1286_v58 = vld [vmem:[%s1559_s16 + $0x24] sm:$0xf0]  ;;  %v1195_v59 = vld [vmem:[%s1559_s16 + $0x60] sm:$0xf]  ;;  %v1285_v61 = vld [vmem:[%s1559_s16 + $0x24] sm:$0xf] }
  0x4b   : > { %v1294_v60 = vld [vmem:[%s1559_s16 + $0x64] sm:$0xf0]  ;;  %v1165_v62 = vld [vmem:[%s1559_s16 + $0x28] sm:$0xf0]  ;;  %v1293_v63 = vld [vmem:[%s1559_s16 + $0x64] sm:$0xf]  ;;  %v1164_v1 = vor.u32 %v1286_v58, %v1163_v57 }
  0x4c   : > { %699 = vmatpush.bf16.msra.mxu0 %v1301_v23  ;;  %1363 = vmatpush.bf16.msra.mxu2 %v1301_v23  ;;  %v1197_v0 = vld [vmem:[%s1559_s16 + $0x68] sm:$0xf0]  ;;  %v1196_v2 = vor.u32 %v1294_v60, %v1195_v59  ;;  %v1168_v3 = vor.u32 %v1285_v61, %v1165_v62  ;;  %v1171_v5 = vld [vmem:[%s1559_s16 + $0x30] sm:$0xf]  ;;  %v1288_v6 = vld [vmem:[%s1559_s16 + $0x34] sm:$0xf0] }
  0x4d   : > { %748 = vmatpush.bf16.msra.mxu1 %v1309_v24  ;;  %1371 = vmatpush.bf16.msra.mxu3 %v1309_v24  ;;  %v1200_v4 = vor.u32 %v1293_v63, %v1197_v0  ;;  %v1203_v7 = vld [vmem:[%s1559_s16 + $0x70] sm:$0xf]  ;;  %v1296_v8 = vld [vmem:[%s1559_s16 + $0x74] sm:$0xf0]  ;;  %v1287_v9 = vld [vmem:[%s1559_s16 + $0x34] sm:$0xf]  ;;  %v1172_v13 = vor.u32 %v1288_v6, %v1171_v5 }
  0x4e   : > { %v1173_v10 = vld [vmem:[%s1559_s16 + $0x38] sm:$0xf0]  ;;  %v1295_v11 = vld [vmem:[%s1559_s16 + $0x74] sm:$0xf]  ;;  %v1204_v14 = vor.u32 %v1296_v8, %v1203_v7  ;;  %v464_v23 = vld [vmem:[#allocation2 + $0x40] sm:$0xff] }
  0x4f   : > { %v1205_v12 = vld [vmem:[%s1559_s16 + $0x78] sm:$0xf0]  ;;  %v1176_v15 = vor.u32 %v1287_v9, %v1173_v10  ;;  %v456_v18 = vld [vmem:[#allocation2 + $0x30] sm:$0xff]  ;;  %v465_v33 = vld [vmem:[#allocation2 + $0x20] sm:$0xff] }
  0x50   : > { %700 = vmatpush.bf16.msra.mxu0 %v1300_v25  ;;  %1364 = vmatpush.bf16.msra.mxu2 %v1300_v25  ;;  %v1208_v16 = vor.u32 %v1295_v11, %v1205_v12  ;;  %v458_v37 = vld [vmem:[#allocation2 + $0x58] sm:$0xff]  ;;  %v460_v57 = vld [vmem:[#allocation2 + $0x50] sm:$0xff]  ;;  %v468_v63 = vld [vmem:[#allocation2 + $0x60] sm:$0xff] }
  0x51   : > { %749 = vmatpush.bf16.msra.mxu1 %v1308_v26  ;;  %1372 = vmatpush.bf16.msra.mxu3 %v1308_v26  ;;  %v459_v47 = vld [vmem:[#allocation2 + $0x18] sm:$0xff]  ;;  %v469_v9 = vld [vmem:[#allocation2 + $0x70] sm:$0xff] }
  0x54   : > { %701 = vmatpush.bf16.msra.mxu0 %v1299_v27  ;;  %1365 = vmatpush.bf16.msra.mxu2 %v1299_v27  ;;  %v457_v27 = vld [vmem:[#allocation2] sm:$0xff] }
  0x55   : > { %750 = vmatpush.bf16.msra.mxu1 %v1307_v28  ;;  %1373 = vmatpush.bf16.msra.mxu3 %v1307_v28 }
  0x58   : > { %702 = vmatpush.bf16.msra.mxu0 %v1298_v29  ;;  %1366 = vmatpush.bf16.msra.mxu2 %v1298_v29 }
  0x59   : > { %751 = vmatpush.bf16.msra.mxu1 %v1306_v30  ;;  %1374 = vmatpush.bf16.msra.mxu3 %v1306_v30 }
  0x5c   : > { %703 = vmatpush.bf16.msra.mxu0 %v1297_v31  ;;  %1367 = vmatpush.bf16.msra.mxu2 %v1297_v31 }
  0x5d   : > { %752 = vmatpush.bf16.msra.mxu1 %v1305_v32  ;;  %1375 = vmatpush.bf16.msra.mxu3 %v1305_v32 }
  0x5f   : > { %704 = vmatmul.bf16.vlgmr.msra.gmra.mxu0 %v1148_v41  ;;  %724 = vmatmul.bf16.vlgmr.msra.gmra.mxu2 %v1180_v42 }
  0x60   : > { %753 = vmatmul.bf16.vlgmr.msra.gmra.mxu1 %v1152_v43  ;;  %773 = vmatmul.bf16.vlgmr.msra.gmra.mxu3 %v1184_v44  ;;  %v466_v43 = vld [vmem:[#allocation2 + $0x10] sm:$0xff] }
  0x6f   : > { %709 = vmatmul.bf16.gmra.mxu0 %v1156_v53  ;;  %729 = vmatmul.bf16.gmra.mxu2 %v1188_v54  ;;  %v467_v53 = vld [vmem:[#allocation2 + $0x38] sm:$0xff] }
  0x70   : > { %758 = vmatmul.bf16.gmra.mxu1 %v1160_v55  ;;  %778 = vmatmul.bf16.gmra.mxu3 %v1192_v56 }
  0x7f   : > { %714 = vmatmul.bf16.gmra.mxu0 %v1164_v1  ;;  %734 = vmatmul.bf16.gmra.mxu2 %v1196_v2 }
  0x80   : > { %763 = vmatmul.bf16.gmra.mxu1 %v1168_v3  ;;  %783 = vmatmul.bf16.gmra.mxu3 %v1200_v4  ;;  %v461_v3 = vld [vmem:[#allocation2 + $0x68] sm:$0xff] }
  0x8f   : > { %719 = vmatmul.bf16.gmra.mxu0 %v1172_v13  ;;  %739 = vmatmul.bf16.gmra.mxu2 %v1204_v14  ;;  %v462_v13 = vld [vmem:[#allocation2 + $0x8] sm:$0xff] }
  0x90   : > { %768 = vmatmul.bf16.gmra.mxu1 %v1176_v15  ;;  %788 = vmatmul.bf16.gmra.mxu3 %v1208_v16 }
  0xdc   : > { %v705_v17 = vpop.f32.mrf.mxu0 }
  0xdd   : > { %v754_v19 = vpop.f32.mrf.mxu1 }
  0xde   : > { %v755_v20 = vadd.f32 %v754_v19, %v705_v17  ;;  %v470_v19 = vld [vmem:[#allocation2 + $0x78] sm:$0xff] }
  0xe0   : > { %v794_v21 = vadd.f32 %v755_v20, %v456_v18 }
  0xe2   : > { %810 = vst [vmem:[#allocation2 + $0x30] sm:$0xff] %v794_v21  ;;  %v725_v22 = vpop.f32.mrf.mxu2 }
  0xe3   : > { %v774_v24 = vpop.f32.mrf.mxu3 }
  0xe4   : > { %v775_v25 = vadd.f32 %v774_v24, %v725_v22  ;;  %v707_v26 = vpop.f32.mrf.mxu0 }
  0xe5   : > { %v756_v28 = vpop.f32.mrf.mxu1 }
  0xe6   : > { %v802_v29 = vadd.f32 %v775_v25, %v464_v23  ;;  %v757_v30 = vadd.f32 %v756_v28, %v707_v26  ;;  %v463_v23 = vld [vmem:[#allocation2 + $0x48] sm:$0xff] }
  0xe8   : > { %818 = vst [vmem:[#allocation2 + $0x40] sm:$0xff] %v802_v29  ;;  %v795_v31 = vadd.f32 %v757_v30, %v457_v27  ;;  %v471_v29 = vld [vmem:[#allocation2 + $0x28] sm:$0xff] }
  0xea   : > { %811 = vst [vmem:[#allocation2] sm:$0xff] %v795_v31  ;;  %v727_v32 = vpop.f32.mrf.mxu2 }
  0xeb   : > { %v776_v34 = vpop.f32.mrf.mxu3 }
  0xec   : > { %v777_v35 = vadd.f32 %v776_v34, %v727_v32  ;;  %v710_v36 = vpop.f32.mrf.mxu0 }
  0xed   : > { %v759_v38 = vpop.f32.mrf.mxu1 }
  0xee   : > { %v803_v39 = vadd.f32 %v777_v35, %v465_v33  ;;  %v760_v40 = vadd.f32 %v759_v38, %v710_v36 }
  0xf0   : > { %819 = vst [vmem:[#allocation2 + $0x20] sm:$0xff] %v803_v39  ;;  %v796_v41 = vadd.f32 %v760_v40, %v458_v37 }
  0xf2   : > { %812 = vst [vmem:[#allocation2 + $0x58] sm:$0xff] %v796_v41  ;;  %v730_v42 = vpop.f32.mrf.mxu2 }
  0xf3   : > { %v779_v44 = vpop.f32.mrf.mxu3 }
  0xf4   : > { %v780_v45 = vadd.f32 %v779_v44, %v730_v42  ;;  %v712_v46 = vpop.f32.mrf.mxu0 }
  0xf5   : > { %v761_v48 = vpop.f32.mrf.mxu1 }
  0xf6   : > { %v804_v49 = vadd.f32 %v780_v45, %v466_v43  ;;  %v762_v50 = vadd.f32 %v761_v48, %v712_v46 }
  0xf8   : > { %820 = vst [vmem:[#allocation2 + $0x10] sm:$0xff] %v804_v49  ;;  %v797_v51 = vadd.f32 %v762_v50, %v459_v47 }
  0xfa   : > { %813 = vst [vmem:[#allocation2 + $0x18] sm:$0xff] %v797_v51  ;;  %v732_v52 = vpop.f32.mrf.mxu2 }
  0xfb   : > { %v781_v54 = vpop.f32.mrf.mxu3 }
  0xfc   : > { %v782_v55 = vadd.f32 %v781_v54, %v732_v52  ;;  %v715_v56 = vpop.f32.mrf.mxu0 }
  0xfd   : > { %v764_v58 = vpop.f32.mrf.mxu1 }
  0xfe   : > { %v805_v59 = vadd.f32 %v782_v55, %v467_v53  ;;  %v765_v60 = vadd.f32 %v764_v58, %v715_v56 }
 0x100   : > { %821 = vst [vmem:[#allocation2 + $0x38] sm:$0xff] %v805_v59  ;;  %v798_v61 = vadd.f32 %v765_v60, %v460_v57 }
 0x102   : > { %814 = vst [vmem:[#allocation2 + $0x50] sm:$0xff] %v798_v61  ;;  %v735_v62 = vpop.f32.mrf.mxu2 }
 0x103   : > { %v784_v0 = vpop.f32.mrf.mxu3 }
 0x104   : > { %v785_v1 = vadd.f32 %v784_v0, %v735_v62  ;;  %v717_v2 = vpop.f32.mrf.mxu0 }
 0x105   : > { %v766_v4 = vpop.f32.mrf.mxu1 }
 0x106   : > { %v806_v5 = vadd.f32 %v785_v1, %v468_v63  ;;  %v767_v6 = vadd.f32 %v766_v4, %v717_v2 }
 0x108   : > { %822 = vst [vmem:[#allocation2 + $0x60] sm:$0xff] %v806_v5  ;;  %v799_v7 = vadd.f32 %v767_v6, %v461_v3 }
 0x10a   : > { %815 = vst [vmem:[#allocation2 + $0x68] sm:$0xff] %v799_v7  ;;  %v737_v8 = vpop.f32.mrf.mxu2 }
 0x10b   : > { %v786_v10 = vpop.f32.mrf.mxu3 }
 0x10c   : > { %v787_v11 = vadd.f32 %v786_v10, %v737_v8  ;;  %v720_v12 = vpop.f32.mrf.mxu0 }
 0x10d   : > { %v769_v14 = vpop.f32.mrf.mxu1 }
 0x10e   : > { %v807_v15 = vadd.f32 %v787_v11, %v469_v9  ;;  %v770_v16 = vadd.f32 %v769_v14, %v720_v12 }
 0x110   : > { %823 = vst [vmem:[#allocation2 + $0x70] sm:$0xff] %v807_v15  ;;  %v800_v17 = vadd.f32 %v770_v16, %v462_v13 }
 0x112   : > { %816 = vst [vmem:[#allocation2 + $0x8] sm:$0xff] %v800_v17  ;;  %v740_v18 = vpop.f32.mrf.mxu2 }
 0x113   : > { %v789_v20 = vpop.f32.mrf.mxu3 }
 0x114   : > { %v790_v21 = vadd.f32 %v789_v20, %v740_v18  ;;  %v722_v22 = vpop.f32.mrf.mxu0 }
 0x115   : > { %v771_v24 = vpop.f32.mrf.mxu1 }
 0x116   : > { %v808_v25 = vadd.f32 %v790_v21, %v470_v19  ;;  %v772_v26 = vadd.f32 %v771_v24, %v722_v22 }
 0x118   : > { %824 = vst [vmem:[#allocation2 + $0x78] sm:$0xff] %v808_v25  ;;  %v801_v27 = vadd.f32 %v772_v26, %v463_v23 }
 0x11a   : > { %817 = vst [vmem:[#allocation2 + $0x48] sm:$0xff] %v801_v27  ;;  %v742_v28 = vpop.f32.mrf.mxu2 }
 0x11b   : > { %v791_v30 = vpop.f32.mrf.mxu3 }
 0x11c   : > { %v792_v31 = vadd.f32 %v791_v30, %v742_v28  ;;  %829 = sbr.rel (%p1273_p11) target bundleno = 339 (0x153), region = 78 }
 0x11e   : > { %v809_v32 = vadd.f32 %v792_v31, %v471_v29 }
 0x120   : > { %825 = vst [vmem:[#allocation2 + $0x28] sm:$0xff] %v809_v32 }
 0x121   : > { %v830_v33 = vld [vmem:[#allocation2 + $0x30] sm:$0xff]  ;;  %v831_v34 = vld [vmem:[#allocation2] sm:$0xff]  ;;  %v832_v36 = vld [vmem:[#allocation2 + $0x58] sm:$0xff] }
 0x122   : > { %v1417_v35 = vld [vmem:[%s1661_s2] ss:$0 sm:$0xff]  ;;  %v833_v37 = vld [vmem:[#allocation2 + $0x18] sm:$0xff]  ;;  %v834_v38 = vld [vmem:[#allocation2 + $0x50] sm:$0xff] }
 0x123   : > { %v835_v39 = vld [vmem:[#allocation2 + $0x68] sm:$0xff]  ;;  %v850_v41 = vadd.f32 %v1417_v35, %v830_v33  ;;  %v851_v42 = vadd.f32 %v1417_v35, %v831_v34  ;;  %v852_v43 = vadd.f32 %v1417_v35, %v832_v36  ;;  %v853_v44 = vadd.f32 %v1417_v35, %v833_v37  ;;  %v838_v57 = vld [vmem:[#allocation2 + $0x40] sm:$0xff]  ;;  %v840_v59 = vld [vmem:[#allocation2 + $0x10] sm:$0xff] }
 0x124   : > { %v836_v40 = vld [vmem:[#allocation2 + $0x8] sm:$0xff]  ;;  %v854_v46 = vadd.f32 %v1417_v35, %v834_v38  ;;  %v855_v47 = vadd.f32 %v1417_v35, %v835_v39  ;;  %v839_v58 = vld [vmem:[#allocation2 + $0x20] sm:$0xff]  ;;  %v841_v63 = vld [vmem:[#allocation2 + $0x38] sm:$0xff]  ;;  %v858_v6 = vadd.f32 %v1417_v35, %v838_v57  ;;  %v860_v8 = vadd.f32 %v1417_v35, %v840_v59 }
 0x125   : > { %v837_v45 = vld [vmem:[#allocation2 + $0x48] sm:$0xff]  ;;  %v856_v48 = vadd.f32 %v1417_v35, %v836_v40  ;;  %v1316_v49 = vpack.c.bf16 %v851_v42, %v850_v41  ;;  %v898_v50 = vadd.f32 %v851_v42, %v850_v41  ;;  %v920_v51 = vmul.f32 %v850_v41, %v850_v41  ;;  %v842_v0 = vld [vmem:[#allocation2 + $0x60] sm:$0xff]  ;;  %v843_v1 = vld [vmem:[#allocation2 + $0x70] sm:$0xff] }
 0x126   : > { %v921_v52 = vmul.f32 %v851_v42, %v851_v42  ;;  %v1321_v53 = vpack.c.bf16 %v853_v44, %v852_v43  ;;  %v922_v54 = vmul.f32 %v852_v43, %v852_v43  ;;  %v1326_v55 = vpack.c.bf16 %v855_v47, %v854_v46  ;;  %v844_v16 = vld [vmem:[#allocation2 + $0x78] sm:$0xff] }
 0x127   : > { %v857_v56 = vadd.f32 %v1417_v35, %v837_v45  ;;  %1317 = vst [vmem:[%s1662_s3] sm:$0xff] %v1316_v49   ;;  %v899_v61 = vadd.f32 %v898_v50, %v852_v43  ;;  %v923_v62 = vmul.f32 %v853_v44, %v853_v44  ;;  %v924_v2 = vmul.f32 %v854_v46, %v854_v46  ;;  %v845_v17 = vld [vmem:[#allocation2 + $0x28] sm:$0xff] }
 0x128   : > { %v936_v60 = vadd.f32 %v921_v52, %v920_v51  ;;  %1353 = vst [vmem:[%s1662_s3 + $0x8] sm:$0xff] %v1321_v53   ;;  %v859_v7 = vadd.f32 %v1417_v35, %v839_v58  ;;  %v861_v9 = vadd.f32 %v1417_v35, %v841_v63  ;;  %v862_v10 = vadd.f32 %v1417_v35, %v842_v0 }
 0x129   : > { %v1331_v3 = vpack.c.bf16 %v857_v56, %v856_v48  ;;  %v900_v4 = vadd.f32 %v899_v61, %v853_v44  ;;  %1354 = vst [vmem:[%s1662_s3 + $0x10] sm:$0xff] %v1326_v55   ;;  %v863_v11 = vadd.f32 %v1417_v35, %v843_v1  ;;  %v925_v14 = vmul.f32 %v855_v47, %v855_v47 }
 0x12a   : > { %v937_v5 = vadd.f32 %v936_v60, %v922_v54  ;;  %v1336_v15 = vpack.c.bf16 %v859_v7, %v858_v6  ;;  %v1341_v18 = vpack.c.bf16 %v861_v9, %v860_v8  ;;  %v926_v22 = vmul.f32 %v856_v48, %v856_v48 }
 0x12b   : > { %1355 = vst [vmem:[%s1662_s3 + $0x18] sm:$0xff] %v1331_v3   ;;  %v901_v13 = vadd.f32 %v900_v4, %v854_v46  ;;  %v1346_v19 = vpack.c.bf16 %v863_v11, %v862_v10  ;;  %v864_v23 = vadd.f32 %v1417_v35, %v844_v16  ;;  %v865_v24 = vadd.f32 %v1417_v35, %v845_v17 }
 0x12c   : > { %v938_v12 = vadd.f32 %v937_v5, %v923_v62  ;;  %1356 = vst [vmem:[%s1662_s3 + $0x20] sm:$0xff] %v1336_v15   ;;  %v927_v27 = vmul.f32 %v857_v56, %v857_v56  ;;  %v928_v31 = vmul.f32 %v858_v6, %v858_v6  ;;  %v929_v34 = vmul.f32 %v859_v7, %v859_v7 }
 0x12d   : > { %v902_v20 = vadd.f32 %v901_v13, %v855_v47  ;;  %1357 = vst [vmem:[%s1662_s3 + $0x28] sm:$0xff] %v1341_v18   ;;  %v1351_v28 = vpack.c.bf16 %v865_v24, %v864_v23  ;;  %v930_v37 = vmul.f32 %v860_v8, %v860_v8  ;;  %v931_v40 = vmul.f32 %v861_v9, %v861_v9 }
 0x12e   : > { %v939_v21 = vadd.f32 %v938_v12, %v924_v2  ;;  %1358 = vst [vmem:[%s1662_s3 + $0x30] sm:$0xff] %v1346_v19   ;;  %v932_v43 = vmul.f32 %v862_v10, %v862_v10  ;;  %v933_v46 = vmul.f32 %v863_v11, %v863_v11  ;;  %v934_v49 = vmul.f32 %v864_v23, %v864_v23 }
 0x12f   : > { %v903_v26 = vadd.f32 %v902_v20, %v856_v48  ;;  %1359 = vst [vmem:[%s1662_s3 + $0x38] sm:$0xff] %v1351_v28   ;;  %v935_v51 = vmul.f32 %v865_v24, %v865_v24 }
 0x130   : > { %v940_v25 = vadd.f32 %v939_v21, %v925_v14 }
 0x131   : > { %v904_v29 = vadd.f32 %v903_v26, %v857_v56 }
 0x132   : > { %v941_v30 = vadd.f32 %v940_v25, %v926_v22 }
 0x133   : > { %v905_v33 = vadd.f32 %v904_v29, %v858_v6 }
 0x134   : > { %v942_v32 = vadd.f32 %v941_v30, %v927_v27 }
 0x135   : > { %v906_v36 = vadd.f32 %v905_v33, %v859_v7 }
 0x136   : > { %v943_v35 = vadd.f32 %v942_v32, %v928_v31 }
 0x137   : > { %v907_v39 = vadd.f32 %v906_v36, %v860_v8 }
 0x138   : > { %v944_v38 = vadd.f32 %v943_v35, %v929_v34 }
 0x139   : > { %v908_v41 = vadd.f32 %v907_v39, %v861_v9 }
 0x13a   : > { %v945_v42 = vadd.f32 %v944_v38, %v930_v37 }
 0x13b   : > { %v909_v45 = vadd.f32 %v908_v41, %v862_v10 }
 0x13c   : > { %v946_v44 = vadd.f32 %v945_v42, %v931_v40 }
 0x13d   : > { %v910_v47 = vadd.f32 %v909_v45, %v863_v11 }
 0x13e   : > { %v947_v48 = vadd.f32 %v946_v44, %v932_v43 }
 0x13f   : > { %v911_v50 = vadd.f32 %v910_v47, %v864_v23 }
 0x140   : > { %v948_v52 = vadd.f32 %v947_v48, %v933_v46 }
 0x141   : > { %v912_v53 = vadd.f32 %v911_v50, %v865_v24 }
 0x142   : > { %v949_v54 = vadd.f32 %v948_v52, %v934_v49 }
 0x143   : > { %v913_v55 = vrot.slane %v912_v53, 4 }
 0x144   : > { %v950_v56 = vadd.f32 %v949_v54, %v935_v51 }
 0x145   : > { %v914_v57 = vadd.f32 %v913_v55, %v912_v53 }
 0x146   : > { %v951_v58 = vrot.slane %v950_v56, 4 }
 0x147   : > { %v915_v59 = vrot.slane %v914_v57, 2 }
 0x148   : > { %v952_v60 = vadd.f32 %v951_v58, %v950_v56 }
 0x149   : > { %v916_v61 = vadd.f32 %v915_v59, %v914_v57 }
 0x14a   : > { %v953_v62 = vrot.slane %v952_v60, 2 }
 0x14b   : > { %v917_v63 = vrot.slane %v916_v61, 1 }
 0x14c   : > { %v954_v0 = vadd.f32 %v953_v62, %v952_v60 }
 0x14d   : > { %v918_v1 = vadd.f32 %v917_v63, %v916_v61 }
 0x14e   : > { %v955_v2 = vrot.slane %v954_v0, 1 }
 0x14f   : > { %919 = vst [vmem:[%s1663_s4] sm:$0x1] %v918_v1 }
 0x150   : > { %v956_v3 = vadd.f32 %v955_v2, %v954_v0 }
 0x152   : > { %957 = vst [vmem:[%s1664_s5] sm:$0x1] %v956_v3 }
 0x153 PF: > { %s16_s22 = sadd.s32 1, %s1456_s22   ;;  %s1665_s18 = smov %s1444_s19 }
 0x154   : > { %p13_p12 = scmp.ge.s32.totalorder %s16_s22, 5   ;;  %s1666_s19 = smov %s1524_s26 }
 0x155   : > { %s1667_s20 = smov %s1452_s21  ;;  %s1668_s21 = smov %s1670_s23 }
 0x156   :  { %15 = sbr.rel (!%p13_p12) target bundleno = 3 (0x3), region = 143 }

// kernel: sub.21
= control target key start
LH: loop header
LB: loop body
LE: loop exit
PB: predicated region body
PF: predicated region fallthrough
CT: control target
= control target key end

     0   :  { %vm3_vm0 = vcmask 261120   ;;  %s29_s10 = smov 96   ;;  %s30_s13 = smov 32   ;;  %vm9_vm1 = vcmask 1048320   ;;  %vm15_vm2 = vcmask 785920   ;;  %vm21_vm3 = vcmask 523520   ;;  %s66_s0 = inlined_call_operand.vmem [shape: f32[32,32], index: 0, kind: input, shape index: {}]   ;;  %s67_s1 = inlined_call_operand.vmem [shape: f32[1024], index: 1, kind: output, shape index: {}]  }
   0x1   :  { %v23_v0 = vld [vmem:[%s66_s0 + $0x3] ss:$4 sm:$0xff]   ;;  %v25_v1 = vld [vmem:[%s66_s0 + $0x1] ss:$4 sm:$0xff]   ;;  %v2_v2 = vld [vmem:[%s66_s0] ss:$4 sm:$0xff]  }
   0x2   :  { %7 = vrot.lane.b32.xlu0 %v23_v0, %s29_s10  ;;  %19 = vrot.lane.b32.xlu1 %v25_v1, %s30_s13  ;;  %4 = vst.msk [vmem:[%s67_s1] sm:$0xff] %vm3_vm0, %v2_v2   ;;  %v24_v3 = vld [vmem:[%s66_s0 + $0x2] ss:$4 sm:$0xff]   ;;  %s31_s0 = smov 64  }
   0xa   :  { %13 = vrot.lane.b32.xlu0 %v24_v3, %s31_s0 }
  0x74   :  { %v8_v4 = vpop.permute.xlu0 %7   ;;  %v20_v5 = vpop.permute.xlu1 %19  }
  0x75   :  { %10 = vst.msk [vmem:[%s67_s1] sm:$0xff] %vm9_vm1, %v8_v4  }
  0x7c   :  { %v14_v6 = vpop.permute.xlu0 %13  }
  0x7d   :  { %16 = vst.msk [vmem:[%s67_s1] sm:$0xff] %vm15_vm2, %v14_v6  }
  0x7e   :  { %22 = vst.msk [vmem:[%s67_s1] sm:$0xff] %vm21_vm3, %v20_v5  }

// kernel: model_forward.8
= control target key start
LH: loop header
LB: loop body
LE: loop exit
PB: predicated region body
PF: predicated region fallthrough
CT: control target
= control target key end

     0   :  { %s537_s18 = smov 0   ;;  %s571_s0 = inlined_call_operand.vmem [shape: s32[2,1,64], index: 0, kind: input, shape index: {}]   ;;  %s572_s1 = inlined_call_operand.vmem [shape: bf16[2,64,128], index: 1, kind: input, shape index: {}]   ;;  %s573_s2 = inlined_call_operand.vmem [shape: f32[1,128], index: 2, kind: input, shape index: {}]   ;;  %s574_s3 = inlined_call_operand.vmem [shape: f32[1,128], index: 3, kind: input, shape index: {}]   ;;  %s575_s4 = inlined_call_operand.vmem [shape: f32[2,16,32], index: 4, kind: input, shape index: {}]   ;;  %s576_s5 = inlined_call_operand.vmem [shape: f32[2,16,32], index: 5, kind: output, shape index: {}]  }
   0x1 LB: > { %s442_s19 = sadd.s32 4294967295, %s503_s18   ;;  %p446_p0 = scmp.ge.s32.totalorder %s503_s18, 1  ;;  %s503_s18 = sphi %s537_s18, %s15_s18  }
   0x2   : > { %p205_p1 = scmp.lt.s32.totalorder %s503_s18, 3 }
   0x4   : > { %p206_p2 = pnand %p446_p0, %p205_p1 }
   0x5   : > { %p241_p3 = scmp.lt.s32.totalorder (!%p206_p2), %s442_s19, 1 }
   0x6   : > { %209 = sbr.rel (%p206_p2) target bundleno = 303 (0x12f), region = 40 }
   0xb   : > { %s578_s19 = smov (!%p241_p3, %s442_s19), 1  ;;  %v491_v0 = vld [vmem:[%s573_s2] ss:$0 sm:$0xff]  ;;  %v313_v20 = vlaneseq  ;;  %v505_v48 = vmov 0.0   ;;  %vm325_vm2 = vcmask 523264   ;;  %v506_v52 = vmov 32  }
   0xc   : > { %s458_s20 = sshll.u32 %s578_s19, 5  ;;  %v492_v6 = vld [vmem:[%s574_s3] ss:$0 sm:$0xff]  ;;  %s243_s30 = scalar_lea.vmem %s571_s0, %s578_s19  ;;  %490 = vset.pattern.permute.xlu0 %v506_v52  ;;  %vm363_vm3 = vcmask 261120  }
   0xd   : > { %s248_s23 = scalar_lea.vmem %s572_s1, %s458_s20  ;;  %v260_v25 = vld [vmem:[%s243_s30] sm:$0x1]  ;;  %v314_v34 = vshrl.u32 %v313_v20, 7  ;;  %s459_s6 = sshll.u32 %s578_s19, 4 }
   0xe   : > { %v479_v1 = vld [vmem:[%s248_s23 + $0x18] sm:$0xff]   ;;  %v478_v2 = vld [vmem:[%s248_s23 + $0x10] sm:$0xff]   ;;  %v477_v3 = vld [vmem:[%s248_s23 + $0x8] sm:$0xff]   ;;  %v316_v35 = vadd.s32 1, %v260_v25  ;;  %s253_s9 = scalar_lea.vmem %s575_s4, %s459_s6  ;;  %s258_s12 = scalar_lea.vmem %s576_s5, %s459_s6 }
   0xf   : > { %v475_v4 = vunpack.c.l.bf16 %v479_v1  ;;  %v476_v5 = vunpack.c.h.bf16 %v479_v1  ;;  %v471_v7 = vunpack.c.l.bf16 %v478_v2  ;;  %v472_v8 = vunpack.c.h.bf16 %v478_v2  ;;  %v462_v9 = vld [vmem:[%s248_s23] sm:$0xff]   ;;  %v360_v63 = vld [vmem:[%s253_s9 + $0x8] sm:$0xff] }
  0x10   : > { %v467_v10 = vunpack.c.l.bf16 %v477_v3  ;;  %v468_v11 = vunpack.c.h.bf16 %v477_v3  ;;  %v463_v12 = vunpack.c.l.bf16 %v462_v9  ;;  %v464_v13 = vunpack.c.h.bf16 %v462_v9  ;;  %v359_v59 = vld [vmem:[%s253_s9] sm:$0xff] }
  0x11   : > { %v287_v14 = vmul.f32 %v491_v0, %v475_v4  ;;  %v288_v15 = vmul.f32 %v491_v0, %v476_v5  ;;  %v285_v16 = vmul.f32 %v491_v0, %v471_v7  ;;  %v286_v17 = vmul.f32 %v491_v0, %v472_v8 }
  0x12   : > { %v283_v18 = vmul.f32 %v491_v0, %v467_v10  ;;  %v284_v19 = vmul.f32 %v491_v0, %v468_v11  ;;  %v281_v28 = vmul.f32 %v491_v0, %v463_v12  ;;  %v282_v29 = vmul.f32 %v491_v0, %v464_v13 }
  0x13   : > { %v299_v21 = vadd.f32 %v492_v6, %v287_v14  ;;  %v300_v22 = vadd.f32 %v492_v6, %v288_v15  ;;  %v297_v23 = vadd.f32 %v492_v6, %v285_v16  ;;  %v298_v24 = vadd.f32 %v492_v6, %v286_v17 }
  0x14   : > { %v295_v26 = vadd.f32 %v492_v6, %v283_v18  ;;  %v296_v27 = vadd.f32 %v492_v6, %v284_v19  ;;  %v293_v37 = vadd.f32 %v492_v6, %v281_v28  ;;  %v294_v41 = vadd.f32 %v492_v6, %v282_v29 }
  0x15   : > { %v307_v30 = vmax.f32 %v299_v21, 0.0  ;;  %v308_v31 = vmax.f32 %v300_v22, 0.0  ;;  %v305_v32 = vmax.f32 %v297_v23, 0.0  ;;  %v306_v33 = vmax.f32 %v298_v24, 0.0 }
  0x16   : > { %v303_v39 = vmax.f32 %v295_v26, 0.0  ;;  %v304_v40 = vmax.f32 %v296_v27, 0.0  ;;  %v315_v42 = vadd.s32 8, %v314_v34  ;;  %v317_v43 = vperm.slane %v316_v35, 0 }
  0x17   : > { %v312_v36 = vpack.c.bf16 %v308_v31, %v307_v30  ;;  %v311_v38 = vpack.c.bf16 %v306_v33, %v305_v32  ;;  %v301_v45 = vmax.f32 %v293_v37, 0.0  ;;  %v302_v46 = vmax.f32 %v294_v41, 0.0 }
  0x18   : > { %v310_v44 = vpack.c.bf16 %v304_v40, %v303_v39  ;;  %vm318_vm0 = vcmp.eq.s32.totalorder %v314_v34, %v317_v43  ;;  %vm319_vm1 = vcmp.eq.s32.totalorder %v315_v42, %v317_v43 }
  0x19   : > { %333 = vmatpush.bf16.msra.mxu0 %v312_v36  ;;  %v309_v47 = vpack.c.bf16 %v302_v46, %v301_v45  ;;  %v453_v49 = vsel %vm318_vm0, 1.0, %v505_v48  ;;  %v454_v50 = vsel %vm319_vm1, 1.0, %v505_v48 }
  0x1a   : > { %v324_v51 = vpack.c.bf16 %v454_v50, %v453_v49 }
  0x1d   : > { %334 = vmatpush.bf16.msra.mxu0 %v311_v38 }
  0x21   : > { %335 = vmatpush.bf16.msra.mxu0 %v310_v44 }
  0x25   : > { %336 = vmatpush.bf16.msra.mxu0 %v309_v47 }
  0x28   : > { %455 = vmatmul.msk.bf16.vlgmr.msra.gmra.mxu0 %vm325_vm2, %v324_v51 }
  0xa5   : > { %v338_v53 = vpop.f32.mrf.mxu0 }
  0xa6   : > { %v343_v54 = vmax.f32 %v338_v53, 1.0 }
  0xa8   : > { %493 = vrcp.f32 %v343_v54 }
  0xad   : > { %v340_v55 = vpop.f32.mrf.mxu0 }
  0xae   : > { %v494_v56 = vpop.eup %493  ;;  %v344_v57 = vmax.f32 %v340_v55, 1.0 }
  0xaf   : > { %349 = vperm.xlu0 %490, %v494_v56  }
  0xb0   : > { %495 = vrcp.f32 %v344_v57 }
  0xb6   : > { %v496_v58 = vpop.eup %495 }
  0xb7   : > { %354 = vperm.xlu0 %490, %v496_v58  }
 0x121   : > { %v350_v60 = vpop.permute.xlu0 %349 }
 0x122   : > { %v357_v61 = vmul.f32 %v350_v60, %v338_v53 }
 0x124   : > { %v361_v62 = vadd.f32 %v359_v59, %v357_v61 }
 0x126   : > { %364 = vst.msk [vmem:[%s258_s12] sm:$0xff] %vm363_vm3, %v361_v62 }
 0x129   : > { %v355_v0 = vpop.permute.xlu0 %354 }
 0x12a   : > { %v358_v1 = vmul.f32 %v355_v0, %v340_v55 }
 0x12c   : > { %v362_v2 = vadd.f32 %v360_v63, %v358_v1 }
 0x12e   : > { %365 = vst.msk [vmem:[%s258_s12 + $0x8] sm:$0xff] %vm363_vm3, %v362_v2 }
 0x12f PF: > { %s15_s18 = sadd.s32 1, %s503_s18  }
 0x130   : > { %p12_p4 = scmp.ge.s32.totalorder %s15_s18, 4  }
 0x132   :  { %14 = sbr.rel (!%p12_p4) target bundleno = 1 (0x1), region = 76 }

// kernel: model_forward.9
= control target key start
LH: loop header
LB: loop body
LE: loop exit
PB: predicated region body
PF: predicated region fallthrough
CT: control target
= control target key end

     0   :  { %s2520_s0 = inlined_call_operand.vmem [shape: f32[2,16,32], index: 0, kind: input, shape index: {}]   ;;  %s2521_s1 = inlined_call_operand.vmem [shape: f32[2,1,32], index: 1, kind: input, shape index: {}]   ;;  %s2522_s2 = inlined_call_operand.vmem [shape: f32[2,1,32], index: 2, kind: input, shape index: {}]   ;;  %s2523_s3 = inlined_call_operand.vmem [shape: bf16[2,32,96], index: 3, kind: input, shape index: {}]   ;;  %s2524_s4 = inlined_call_operand.vmem [shape: f32[2,1,96], index: 4, kind: input, shape index: {}]   ;;  %s2525_s5 = inlined_call_operand.vmem [shape: bf16[2,32,32], index: 5, kind: input, shape index: {}]   ;;  %s2526_s6 = inlined_call_operand.vmem [shape: f32[2,1,32], index: 6, kind: input, shape index: {}]   ;;  %s2527_s7 = inlined_call_operand.vmem [shape: f32[2,1,32], index: 7, kind: input, shape index: {}]   ;;  %s2528_s8 = inlined_call_operand.vmem [shape: f32[2,1,32], index: 8, kind: input, shape index: {}]   ;;  %s2529_s9 = inlined_call_operand.vmem [shape: bf16[2,32,128], index: 9, kind: input, shape index: {}]   ;;  %s2530_s10 = inlined_call_operand.vmem [shape: f32[2,1,128], index: 10, kind: input, shape index: {}]   ;;  %s2531_s11 = inlined_call_operand.vmem [shape: bf16[2,128,32], index: 11, kind: input, shape index: {}]   ;;  %s2532_s12 = inlined_call_operand.vmem [shape: f32[2,1,32], index: 12, kind: input, shape index: {}]   ;;  %s2533_s13 = inlined_call_operand.vmem [shape: f32[1,32], index: 13, kind: input, shape index: {}]   ;;  %s2534_s14 = inlined_call_operand.vmem [shape: f32[1,32], index: 14, kind: input, shape index: {}]   ;;  %s2535_s15 = inlined_call_operand.vmem [shape: bf16[32,10], index: 15, kind: input, shape index: {}]   ;;  %s2536_s16 = inlined_call_operand.vmem [shape: f32[1,10], index: 16, kind: input, shape index: {}]   ;;  %s2537_s17 = inlined_call_operand.hbm [shape: f32[2,1,10], index: 17, kind: output, shape index: {}]  }
   0x1   :  { %2552 = sst [smem:[#allocation19_spill]] %s2520_s0 }
   0x2   :  { %2553 = sst [smem:[#allocation20_spill]] %s2521_s1 }
   0x3   :  { %2554 = sst [smem:[#allocation21_spill]] %s2523_s3 }
   0x4   :  { %2555 = sst [smem:[#allocation22_spill]] %s2525_s5 }
   0x5   :  { %2556 = sst [smem:[#allocation23_spill]] %s2533_s13 }
   0x6   :  { %2557 = sst [smem:[#allocation24_spill]] %s2534_s14 }
   0x7   :  { %2558 = sst [smem:[#allocation25_spill]] %s2535_s15 }
   0x8   :  { %2559 = sst [smem:[#allocation26_spill]] %s2536_s16 }
   0x9   :  { %2560 = sst [smem:[#allocation27_spill]] %s2537_s17 }
   0xa   :  { %22 = vsyncpa [#allocation5], 0 }
   0xb   :  { %24 = vsyncpa [#allocation5 + $0x1], 0  ;;  %s2172_s24 = smov 0   ;;  %s2174_s25 = smov 0  }
   0xc   :  { %s2176_s26 = smov 0   ;;  %s2178_s27 = smov 0  }
   0xd   :  { %s2180_s28 = smov 0   ;;  %s2182_s29 = smov 0  }
   0xe   :  { %s2184_s0 = smov 0   ;;  %s2186_s30 = smov 0  }
   0xf LB: > { %2561 = sst [smem:[#allocation7_spill]] %s2037_s24  ;;  %s1713_s18 = sadd.s32 4294967295, %s2065_s30   ;;  %s2065_s30 = sphi %s2186_s30, %s30_s30   ;;  %s2061_s0 = sphi %s2184_s0, %s2605_s0   ;;  %s2057_s29 = sphi %s2182_s29, %s2604_s29   ;;  %s2053_s28 = sphi %s2180_s28, %s2608_s28   ;;  %s2049_s27 = sphi %s2178_s27, %s2602_s27   ;;  %s2045_s26 = sphi %s2176_s26, %s2601_s26   ;;  %s2041_s25 = sphi %s2174_s25, %s2607_s25   ;;  %s2037_s24 = sphi %s2172_s24, %s2606_s24  }
  0x10   : > { %2562 = sst [smem:[#allocation8_spill]] %s2045_s26  ;;  %s1714_s19 = sadd.s32 4294967294, %s2065_s30  }
  0x11   : > { %2563 = sst [smem:[#allocation9_spill]] %s2049_s27  ;;  %s39_s1 = sadd.s32 1, %s2057_s29 }
  0x12   : > { %2564 = sst [smem:[#allocation10_spill]] %s2053_s28  ;;  %p40_p0 = scmp.ge.s32.totalorder %s39_s1, 2 }
  0x13   : > { %2565 = sst [smem:[#allocation11_spill]] %s2057_s29  ;;  %s42_s20 = sadd.s32 1, %s2061_s0 }
  0x14   : > { %2566 = sst [smem:[#allocation12_spill]] %s2061_s0  ;;  %p481_p1 = scmp.ne.s32.totalorder %s2045_s26, %s2041_s25 }
  0x15   : > { %2567 = sst [smem:[#allocation13_spill]] %s2065_s30  ;;  %p482_p2 = scmp.eq.s32.totalorder %s1713_s18, 3 }
  0x16   : > { %s2610_s1 = smov (%p40_p0, %s39_s1), 0  ;;  %s2612_s20 = smov (!%p40_p0, %s42_s20), %s2061_s0 }
  0x17   : > { %2568 = sst [smem:[#allocation14_spill]] %s2610_s1  ;;  %p2221_p3 = por %p482_p2, %p481_p1 }
  0x18   : > { %p487_p4 = scmp.ne.s32.totalorder %s2041_s25, %s2037_s24  ;;  %p44_p5 = scmp.ge.s32.totalorder %s2612_s20, 2 }
  0x19   : > { %s2569_s21 = scalar_select %p2221_p3, 1, 0 }
  0x1a   : > { %p488_p6 = scmp.eq.s32.totalorder %s1714_s19, 3  ;;  %p1717_p7 = scmp.ge.s32.totalorder %s2065_s30, 1 }
  0x1b   : > { %2570 = sst [smem:[#allocation15_spill]] %s2569_s21  ;;  %p606_p8 = scmp.lt.s32.totalorder %s2065_s30, 5 }
  0x1c   : > { %s2614_s20 = smov (%p44_p5, %s2612_s20), 0  ;;  %p2231_p9 = por %p488_p6, %p487_p4 }
  0x1d   : > { %2571 = sst [smem:[#allocation16_spill]] %s2614_s20  ;;  %p607_p10 = pnand %p1717_p7, %p606_p8 }
  0x1e   : > { %s2572_s22 = scalar_select %p2231_p9, 1, 0 }
  0x1f   : > { %s468_s23 = ssub.s32 %s2061_s0, %s2614_s20  ;;  %s471_s18 = sadd.s32 1, %s2045_s26 }
  0x20   : > { %2573 = sst [smem:[#allocation17_spill]] %s2572_s22  ;;  %p469_p11 = scmp.eq.s32.totalorder %s468_s23, 0 }
  0x21   : > { %610 = sbr.rel (%p607_p10) target bundleno = 2837 (0xb15), region = 88  ;;  %p701_p12 = scmp.lt.s32.totalorder (!%p607_p10), %s2053_s28, 1 }
  0x22   : > { %s2239_s1 = scalar_select %p469_p11, %s2045_s26, %s471_s18  }
  0x23   : > { %p706_p13 = scmp.lt.s32.totalorder (!%p607_p10), %s2049_s27, 1  ;;  %s2575_s0 = sld [smem:[#allocation19_spill]] (!%p607_p10) }
  0x24   : > { %2574 = sst [smem:[#allocation18_spill]] %s2239_s1  ;;  %s2579_s13 = sand.u32 (!%p607_p10), 1, %s2041_s25  }
  0x25   : > { %s2577_s3 = sld [smem:[#allocation21_spill]] (!%p607_p10)  ;;  %s2307_s14 = scalar_lea.vmem (!%p607_p10), [#allocation4], %s2579_s13 }
  0x26   : > { %s702_s29 = scalar_select %p701_p12, %s2053_s28, 1 }
  0x27   : > { %s2246_s24 = scalar_select %p706_p13, %s2049_s27, 1 }
  0x28   : > { %s1808_s23 = sshll.u32 %s702_s29, 4  ;;  %s2578_s5 = sld [smem:[#allocation22_spill]] }
  0x29   : > { %s705_s19 = scalar_lea.vmem %s2575_s0, %s1808_s23  ;;  %s1809_s16 = sshll.u32 %s2246_s24, 4 }
  0x2a   : > { %s733_s30 = scalar_lea.vmem %s2528_s8, %s2246_s24  ;;  %s2289_s29 = scalar_lea.vmem %s2529_s9, %s1809_s16 }
  0x2b   : > { %s2263_s15 = scalar_lea.vmem %s2577_s3, %s1809_s16  ;;  %s741_s20 = scalar_lea.vmem %s2530_s10, %s2246_s24 }
  0x2c   : > { %s749_s17 = scalar_lea.vmem %s2532_s12, %s2246_s24  ;;  %s2580_s3 = sld [smem:[#allocation9_spill]] }
  0x2e   : > { %s2272_s23 = scalar_lea.vmem %s2578_s5, %s1809_s16  ;;  %s1812_s5 = sshll.u32 %s2246_s24, 6 }
  0x2f   : > { %s2303_s28 = scalar_lea.vmem %s2531_s11, %s1812_s5 }
  0x32   : > { %p1728_p0 = scmp.ne.s32.totalorder %s2580_s3, 0 }
  0x34   : > { %754 = sbr.rel (%p1728_p0) target bundleno = 60 (0x3c), region = 92 }
  0x39   : > { %v755_v0 = vld [vmem:[%s705_s19] sm:$0xff]  ;;  %vm757_vm0 = vcmask 261120   ;;  %v756_v1 = vld [vmem:[%s705_s19 + $0x8] sm:$0xff] }
  0x3a   : > { %758 = vst.msk [vmem:[#allocation2] sm:$0xff] %vm757_vm0, %v755_v0 }
  0x3b   : > { %759 = vst.msk [vmem:[#allocation2 + $0x8] sm:$0xff] %vm757_vm0, %v756_v1 }
  0x3c PF: > { %vm764_vm1 = vcmask 261120   ;;  %v2067_v6 = vmov 32.0   ;;  %v1814_v23 = vld [vmem:[%s2263_s15 + $0x8] sm:$0xff]  ;;  %v1813_v25 = vld [vmem:[%s2263_s15] sm:$0xff]  ;;  %s2581_s16 = sld [smem:[#allocation20_spill]]  ;;  %s2583_s0 = scalar_lea.vmem %s2522_s2, %s2246_s24  ;;  %vm873_vm9 = vcmask 64512  }
  0x3d   : > { %1923 = vrcp.f32 %v2067_v6  ;;  %856 = vmatpush.bf16.msra.mxu0 %v1814_v23  ;;  %v1916_v49 = vld [vmem:[%s2583_s0] ss:$0 sm:$0xff]  ;;  %s2584_s21 = scalar_lea.vmem %s2524_s4, %s2246_s24  ;;  %s2068_s22 = smov 64   ;;  %vm896_vm10 = vcmask 130048   ;;  %vm1031_vm11 = vcmask 130112   ;;  %vm1117_vm12 = vcmask 195712  }
  0x3e   : > { %v1917_v55 = vld [vmem:[%s2584_s21] ss:$0 sm:$0xff]  ;;  %s2069_s13 = smov 96   ;;  %s2070_s3 = smov 72   ;;  %vm1203_vm13 = vcmask 261312  }
  0x3f   : > { %s2071_s5 = smov 120   ;;  %s2072_s15 = smov 88  }
  0x40   : > { %s2075_s27 = smov 112   ;;  %s2076_s18 = smov 56  }
  0x41   : > { %v2310_v2 = vld [vmem:[#allocation2] sm:$0xff]  ;;  %857 = vmatpush.bf16.msra.mxu0 %v1813_v25  ;;  %s2077_s0 = smov 48   ;;  %s2078_s26 = smov 40  }
  0x42   : > { %v765_v3 = vsel %vm764_vm1, %v2310_v2, 0.0  ;;  %v2314_v4 = vld [vmem:[#allocation2 + $0x8] sm:$0xff]  ;;  %s2582_s19 = scalar_lea.vmem %s2581_s16, %s2246_s24  ;;  %s2073_s16 = smov 80  }
  0x43   : > { %766 = vadd.xlane.f32.xlu0 %v765_v3  ;;  %v768_v5 = vsel %vm764_vm1, %v2314_v4, 0.0  ;;  %v1924_v7 = vpop.eup %1923  ;;  %v1915_v44 = vld [vmem:[%s2582_s19] ss:$0 sm:$0xff]  ;;  %s2074_s19 = smov 104   ;;  %s2079_s1 = smov 8  }
  0x44   : > { %v772_v8 = vmul.f32 32.0, %v1924_v7  ;;  %vm776_vm2 = vweird.f32 %v1924_v7  ;;  %s2080_s21 = smov 16  }
  0x46   : > { %v773_v9 = vsub.f32 1.0, %v772_v8 }
  0x48   : > { %v774_v10 = vmul.f32 %v1924_v7, %v773_v9 }
  0x4a   : > { %v775_v11 = vadd.f32 %v1924_v7, %v774_v10 }
  0x4b   : > { %769 = vadd.xlane.f32.xlu0 %v768_v5 }
  0x4c   : > { %v2318_v12 = vsel %vm776_vm2, %v1924_v7, %v775_v11 }
  0xb6   : > { %v767_v13 = vpop.xlane.xlu0 %766 }
  0xb7   : > { %v778_v14 = vmul.f32 %v2318_v12, %v767_v13 }
  0xb9   : > { %v780_v15 = vsub.f32 %v2310_v2, %v778_v14 }
  0xbb   : > { %v782_v16 = vmul.f32 %v780_v15, %v780_v15 }
  0xbd   : > { %v784_v17 = vsel %vm764_vm1, %v782_v16, 0.0 }
  0xbe   : > { %785 = vadd.xlane.f32.xlu1 %v784_v17  ;;  %v770_v18 = vpop.xlane.xlu0 %769 }
  0xbf   : > { %v779_v19 = vmul.f32 %v2318_v12, %v770_v18 }
  0xc1   : > { %v781_v20 = vsub.f32 %v2314_v4, %v779_v19 }
  0xc3   : > { %v783_v21 = vmul.f32 %v781_v20, %v781_v20 }
  0xc5   : > { %v787_v22 = vsel %vm764_vm1, %v783_v21, 0.0 }
  0xc6   : > { %788 = vadd.xlane.f32.xlu1 %v787_v22 }
 0x131   : > { %v786_v24 = vpop.xlane.xlu1 %785 }
 0x132   : > { %v790_v26 = vmul.f32 %v786_v24, %v2318_v12 }
 0x134   : > { %v792_v27 = vadd.f32 1e-06, %v790_v26 }
 0x136   : > { %1925 = vrsqrt.f32 %v792_v27  ;;  %vm800_vm4 = vweird.f32 %v792_v27 }
 0x139   : > { %v789_v28 = vpop.xlane.xlu1 %788 }
 0x13a   : > { %v791_v29 = vmul.f32 %v789_v28, %v2318_v12 }
 0x13c   : > { %v1926_v30 = vpop.eup %1925  ;;  %v793_v31 = vadd.f32 1e-06, %v791_v29 }
 0x13d   : > { %v795_v32 = vmul.f32 %v1926_v30, %v792_v27  ;;  %vm801_vm3 = vweird.f32 %v1926_v30 }
 0x13e   : > { %1927 = vrsqrt.f32 %v793_v31  ;;  %vm802_vm5 = vmor %vm800_vm4, %vm801_vm3  ;;  %vm810_vm7 = vweird.f32 %v793_v31 }
 0x13f   : > { %v796_v33 = vmul.f32 %v1926_v30, %v795_v32 }
 0x141   : > { %v797_v34 = vmul.f32 0.5, %v796_v33 }
 0x143   : > { %v798_v35 = vsub.f32 1.5, %v797_v34 }
 0x144   : > { %v1928_v36 = vpop.eup %1927 }
 0x145   : > { %v799_v37 = vmul.f32 %v1926_v30, %v798_v35  ;;  %v805_v38 = vmul.f32 %v1928_v36, %v793_v31  ;;  %vm811_vm6 = vweird.f32 %v1928_v36 }
 0x146   : > { %vm812_vm8 = vmor %vm810_vm7, %vm811_vm6 }
 0x147   : > { %v806_v39 = vmul.f32 %v1928_v36, %v805_v38  ;;  %v803_v40 = vsel %vm802_vm5, %v1926_v30, %v799_v37 }
 0x148   : > { %v814_v43 = vmul.f32 %v803_v40, %v780_v15 }
 0x149   : > { %v807_v41 = vmul.f32 0.5, %v806_v39 }
 0x14a   : > { %v819_v48 = vmul.f32 %v1915_v44, %v814_v43 }
 0x14b   : > { %v808_v42 = vsub.f32 1.5, %v807_v41 }
 0x14c   : > { %v824_v51 = vadd.f32 %v1916_v49, %v819_v48 }
 0x14d   : > { %v809_v45 = vmul.f32 %v1928_v36, %v808_v42 }
 0x14f   : > { %v813_v46 = vsel %vm812_vm8, %v1928_v36, %v809_v45 }
 0x150   : > { %v815_v47 = vmul.f32 %v813_v46, %v781_v20 }
 0x152   : > { %v820_v50 = vmul.f32 %v1915_v44, %v815_v47 }
 0x154   : > { %v825_v52 = vadd.f32 %v1916_v49, %v820_v50 }
 0x156   : > { %v826_v53 = vpack.c.bf16 %v825_v52, %v824_v51 }
 0x158   : > { %1737 = vmatmul.msk.bf16.vlgmr.msra.gmra.mxu0 %vm764_vm1, %v826_v53 }
 0x1d5   : > { %v859_v54 = vpop.f32.mrf.mxu0 }
 0x1d6   : > { %v860_v56 = vadd.f32 %v1917_v55, %v859_v54 }
 0x1d8   : > { %v864_v58 = vpack.c.bf16 %v860_v56, %v860_v56 }
 0x1da   : > { %v868_v61 = vunpack.c.l.b16 %v864_v58 }
 0x1dd   : > { %v861_v57 = vpop.f32.mrf.mxu0 }
 0x1de   : > { %v862_v59 = vadd.f32 %v1917_v55, %v861_v57 }
 0x1e0   : > { %v865_v60 = vpack.c.bf16 %v862_v59, %v862_v59 }
 0x1e2   : > { %v869_v62 = vunpack.c.l.b16 %v865_v60 }
 0x1e4   : > { %v2346_v63 = vpack.c.b16 %v869_v62, %v868_v61 }
 0x1e6   : > { %926 = vrot.lane.b32.xlu1 %v2346_v63, %s2068_s22  ;;  %871 = vrot.lane.b32.xlu2 %v2346_v63, %s2069_s13  ;;  %s2081_s22 = smov 24  }
 0x240   : > { %v872_v0 = vpop.permute.xlu2 %871 }
 0x241   : > { %v878_v1 = vsel %vm873_vm9, %v872_v0, 0 }
 0x242   : > { %887 = vmatpush.bf16.xpose.msra.mxu1 %v878_v1 }
 0x249   : > { %1738 = vmatmul.msk.bf16.vlgmr.msra.gmra.mxu1 %vm873_vm9, %v2346_v63 }
 0x258   : > { %v927_v3 = vpop.permute.xlu1 %926 }
 0x259   : > { %939 = vmatpush.bf16.msra.mxu2 %v927_v3 }
 0x2c6   : > { %v889_v5 = vpop.f32.mrf.mxu1 }
 0x2c7   : > { %v894_v6 = vmul.f32 0.35355338, %v889_v5 }
 0x2c9   : > { %v897_v7 = vsel %vm896_vm10, %v894_v6, -inf }
 0x2ca   : > { %898 = vmax.xlane.f32.xlu2 %v897_v7 }
 0x2ce   : > { %v891_v8 = vpop.f32.mrf.mxu1 }
 0x2cf   : > { %v895_v9 = vmul.f32 0.35355338, %v891_v8 }
 0x2d1   : > { %v900_v10 = vsel %vm896_vm10, %v895_v9, -inf }
 0x2d2   : > { %901 = vmax.xlane.f32.xlu0 %v900_v10 }
 0x2e2   : > { %1122 = vrot.lane.b32.xlu2 %v2346_v63, %s2070_s3 }
 0x33d   : > { %v899_v11 = vpop.xlane.xlu2 %898 }
 0x33e   : > { %v903_v13 = vsub.f32 %v894_v6, %v899_v11 }
 0x340   : > { %v905_v14 = vmul.f32 1.442695, %v903_v13 }
 0x342   : > { %1929 = vpow2.f32 %v905_v14 }
 0x345   : > { %v1123_v15 = vpop.permute.xlu2 %1122  ;;  %v902_v16 = vpop.xlane.xlu0 %901 }
 0x346   : > { %v904_v17 = vsub.f32 %v895_v9, %v902_v16  ;;  %v1128_v18 = vsel %vm873_vm9, %v1123_v15, 0 }
 0x347   : > { %1137 = vmatpush.bf16.xpose.msra.mxu3 %v1128_v18 }
 0x348   : > { %v1930_v19 = vpop.eup %1929  ;;  %v907_v20 = vmul.f32 1.442695, %v904_v17 }
 0x349   : > { %v909_v21 = vsel %vm896_vm10, %v1930_v19, 0.0 }
 0x34a   : > { %1931 = vpow2.f32 %v907_v20  ;;  %910 = vadd.xlane.f32.xlu1 %v909_v21 }
 0x350   : > { %v1932_v22 = vpop.eup %1931 }
 0x351   : > { %v912_v23 = vsel %vm896_vm10, %v1932_v22, 0.0 }
 0x352   : > { %913 = vadd.xlane.f32.xlu0 %v912_v23 }
 0x363   : > { %948 = vrot.lane.b32.xlu1 %v2346_v63, %s2071_s5  ;;  %s2585_s5 = scalar_lea.vmem %s2526_s6, %s2246_s24 }
 0x366   : > { %950 = vrot.lane.b32.xlu0 %v2346_v63, %s2072_s15  ;;  %s2586_s15 = scalar_lea.vmem %s2527_s7, %s2246_s24 }
 0x36b   : > { %1036 = vrot.lane.b32.xlu1 %v2346_v63, %s2073_s16 }
 0x36e   : > { %1120 = vrot.lane.b32.xlu0 %v2346_v63, %s2074_s19 }
 0x376   : > { %1034 = vrot.lane.b32.xlu0 %v2346_v63, %s2075_s27 }
 0x3bd   : > { %v911_v24 = vpop.xlane.xlu1 %910 }
 0x3be   : > { %1933 = vrcp.f32 %v911_v24 }
 0x3c4   : > { %v1934_v26 = vpop.eup %1933 }
 0x3c5   : > { %v914_v25 = vpop.xlane.xlu0 %913  ;;  %v917_v27 = vmul.f32 %v1934_v26, %v1930_v19 }
 0x3c6   : > { %1935 = vrcp.f32 %v914_v25 }
 0x3c7   : > { %v919_v30 = vpack.c.bf16 %v917_v27, %v917_v27 }
 0x3c9   : > { %v923_v32 = vunpack.c.l.b16 %v919_v30 }
 0x3cc   : > { %v1936_v28 = vpop.eup %1935 }
 0x3cd   : > { %v918_v29 = vmul.f32 %v1936_v28, %v1932_v22 }
 0x3cf   : > { %v920_v31 = vpack.c.bf16 %v918_v29, %v918_v29 }
 0x3d1   : > { %v924_v33 = vunpack.c.l.b16 %v920_v31 }
 0x3d3   : > { %v925_v34 = vpack.c.b16 %v924_v33, %v923_v32 }
 0x3d5   : > { %v949_v35 = vpop.permute.xlu1 %948  ;;  %1739 = vmatmul.msk.bf16.vlgmr.msra.gmra.mxu2 %vm896_vm10, %v925_v34 }
 0x3d8   : > { %v951_v36 = vpop.permute.xlu0 %950 }
 0x3d9   : > { %v956_v37 = vsel %vm873_vm9, %v951_v36, 0 }
 0x3da   : > { %965 = vmatpush.bf16.xpose.msrb.mxu2 %v956_v37 }
 0x3dd   : > { %v1037_v38 = vpop.permute.xlu1 %1036 }
 0x3de   : > { %v1042_v39 = vsel %vm873_vm9, %v1037_v38, 0 }
 0x3df   : > { %1051 = vmatpush.bf16.xpose.msrb.mxu0 %v1042_v39 }
 0x3e0   : > { %v1121_v40 = vpop.permute.xlu0 %1120 }
 0x3e1   : > { %1744 = vmatmul.msk.bf16.vlgmr.msra.gmra.mxu3 %vm873_vm9, %v1121_v40 }
 0x3e5   : > { %1740 = vmatmul.msk.bf16.vlgmr.msrb.gmra.mxu2 %vm873_vm9, %v949_v35 }
 0x3e8   : > { %v1035_v41 = vpop.permute.xlu0 %1034 }
 0x3e9   : > { %1742 = vmatmul.msk.bf16.vlgmr.msrb.gmra.mxu0 %vm873_vm9, %v1035_v41 }
 0x458   : > { %v941_v42 = vpop.f32.mrf.mxu2 }
 0x459   : > { %946 = vst.msk [vmem:[#allocation3] sm:$0xff] %vm873_vm9, %v941_v42 }
 0x460   : > { %v943_v43 = vpop.f32.mrf.mxu2 }
 0x461   : > { %947 = vst.msk [vmem:[#allocation3 + $0x8] sm:$0xff] %vm873_vm9, %v943_v43 }
 0x464   : > { %v1139_v44 = vpop.f32.mrf.mxu3 }
 0x465   : > { %v1144_v45 = vmul.f32 0.35355338, %v1139_v44 }
 0x466   : > { %v1053_v46 = vpop.f32.mrf.mxu0 }
 0x467   : > { %v1146_v47 = vsel %vm896_vm10, %v1144_v45, -inf  ;;  %v1058_v60 = vmul.f32 0.35355338, %v1053_v46 }
 0x468   : > { %v967_v48 = vpop.f32.mrf.mxu2  ;;  %1147 = vmax.xlane.f32.xlu2 %v1146_v47 }
 0x469   : > { %v972_v49 = vmul.f32 0.35355338, %v967_v48  ;;  %v1060_v61 = vsel %vm896_vm10, %v1058_v60, -inf }
 0x46b   : > { %v974_v50 = vsel %vm896_vm10, %v972_v49, -inf }
 0x46c   : > { %975 = vmax.xlane.f32.xlu1 %v974_v50  ;;  %v1141_v51 = vpop.f32.mrf.mxu3 }
 0x46d   : > { %v1145_v53 = vmul.f32 0.35355338, %v1141_v51 }
 0x46e   : > { %v1055_v52 = vpop.f32.mrf.mxu0 }
 0x46f   : > { %v1059_v54 = vmul.f32 0.35355338, %v1055_v52  ;;  %v1149_v59 = vsel %vm896_vm10, %v1145_v53, -inf }
 0x470   : > { %v969_v55 = vpop.f32.mrf.mxu2 }
 0x471   : > { %v973_v56 = vmul.f32 0.35355338, %v969_v55  ;;  %v1063_v57 = vsel %vm896_vm10, %v1059_v54, -inf }
 0x472   : > { %1064 = vmax.xlane.f32.xlu2 %v1063_v57 }
 0x473   : > { %v977_v58 = vsel %vm896_vm10, %v973_v56, -inf }
 0x474   : > { %978 = vmax.xlane.f32.xlu0 %v977_v58  ;;  %1150 = vmax.xlane.f32.xlu1 %v1149_v59 }
 0x47c   : > { %1061 = vmax.xlane.f32.xlu0 %v1060_v61 }
 0x48a   : > { %1003 = vrot.lane.b32.xlu2 %v2346_v63, %s2076_s18  ;;  %s2587_s18 = sld [smem:[#allocation9_spill]] }
 0x490   : > { %p1796_p1 = scmp.ne.s32.totalorder %s2587_s18, 1 }
 0x491   : > { %s2590_s3 = sld [smem:[#allocation23_spill]] (!%p1796_p1) }
 0x492   : > { %s2592_s19 = sld [smem:[#allocation26_spill]] (!%p1796_p1) }
 0x4db   : > { %v1148_v62 = vpop.xlane.xlu2 %1147 }
 0x4dc   : > { %v1152_v0 = vsub.f32 %v1144_v45, %v1148_v62 }
 0x4de   : > { %v1154_v1 = vmul.f32 1.442695, %v1152_v0 }
 0x4df   : > { %v976_v3 = vpop.xlane.xlu1 %975 }
 0x4e0   : > { %1937 = vpow2.f32 %v1154_v1  ;;  %v980_v18 = vsub.f32 %v972_v49, %v976_v3 }
 0x4e2   : > { %v982_v23 = vmul.f32 1.442695, %v980_v18 }
 0x4e5   : > { %v1065_v5 = vpop.xlane.xlu2 %1064 }
 0x4e6   : > { %v2379_v6 = vpop.eup %1937  ;;  %v1067_v11 = vsub.f32 %v1059_v54, %v1065_v5 }
 0x4e7   : > { %v1151_v7 = vpop.xlane.xlu1 %1150  ;;  %v979_v8 = vpop.xlane.xlu0 %978  ;;  %v1158_v9 = vsel %vm896_vm10, %v2379_v6, 0.0 }
 0x4e8   : > { %v1153_v10 = vsub.f32 %v1145_v53, %v1151_v7  ;;  %1159 = vadd.xlane.f32.xlu1 %v1158_v9  ;;  %v1070_v15 = vmul.f32 1.442695, %v1067_v11  ;;  %v981_v20 = vsub.f32 %v973_v56, %v979_v8 }
 0x4ea   : > { %v1156_v13 = vmul.f32 1.442695, %v1153_v10  ;;  %v984_v24 = vmul.f32 1.442695, %v981_v20 }
 0x4ec   : > { %1939 = vpow2.f32 %v1156_v13 }
 0x4ed   : > { %v1004_v14 = vpop.permute.xlu2 %1003  ;;  %1941 = vpow2.f32 %v1070_v15 }
 0x4ee   : > { %1016 = vmatpush.bf16.msra.mxu2 %v1004_v14 }
 0x4ef   : > { %v1062_v16 = vpop.xlane.xlu0 %1061 }
 0x4f0   : > { %v1066_v17 = vsub.f32 %v1058_v60, %v1062_v16  ;;  %v1816_v16 = vld [vmem:[%s2272_s23 + $0x8] sm:$0xff] }
 0x4f1   : > { %1238 = vmatpush.bf16.msra.mxu0 %v1816_v16  ;;  %v1821_v16 = vld [vmem:[%s2303_s28 + $0x10] sm:$0xff] }
 0x4f2   : > { %v1940_v19 = vpop.eup %1939  ;;  %v1068_v21 = vmul.f32 1.442695, %v1066_v17  ;;  %v1815_v17 = vld [vmem:[%s2272_s23] sm:$0xff] }
 0x4f3   : > { %v1161_v22 = vsel %vm896_vm10, %v1940_v19, 0.0  ;;  %v1942_v25 = vpop.eup %1941 }
 0x4f4   : > { %1943 = vpow2.f32 %v1068_v21  ;;  %1162 = vadd.xlane.f32.xlu0 %v1161_v22  ;;  %v1075_v27 = vsel %vm896_vm10, %v1942_v25, 0.0 }
 0x4f5   : > { %1945 = vpow2.f32 %v982_v23  ;;  %1239 = vmatpush.bf16.msra.mxu0 %v1815_v17  ;;  %v1820_v17 = vld [vmem:[%s2303_s28 + $0x8] sm:$0xff] }
 0x4f6   : > { %1947 = vpow2.f32 %v984_v24  ;;  %v1918_v24 = vld [vmem:[%s2585_s5] ss:$0 sm:$0xff] }
 0x4fa   : > { %v1944_v26 = vpop.eup %1943 }
 0x4fb   : > { %v1072_v28 = vsel %vm896_vm10, %v1944_v26, 0.0  ;;  %v1946_v29 = vpop.eup %1945 }
 0x4fc   : > { %1076 = vadd.xlane.f32.xlu0 %v1075_v27  ;;  %1073 = vadd.xlane.f32.xlu1 %v1072_v28  ;;  %v1948_v30 = vpop.eup %1947  ;;  %v986_v32 = vsel %vm896_vm10, %v1946_v29, 0.0 }
 0x4fd   : > { %v989_v31 = vsel %vm896_vm10, %v1948_v30, 0.0 }
 0x504   : > { %990 = vadd.xlane.f32.xlu0 %v989_v31  ;;  %987 = vadd.xlane.f32.xlu1 %v986_v32 }
 0x518   : > { %1089 = vrot.lane.b32.xlu0 %v2346_v63, %s2077_s0  ;;  %s2588_s0 = sld [smem:[#allocation25_spill]] (!%p1796_p1) }
 0x51d   : > { %1175 = vrot.lane.b32.xlu1 %v2346_v63, %s2078_s26 }
 0x55b   : > { %v1160_v33 = vpop.xlane.xlu1 %1159 }
 0x567   : > { %v1163_v34 = vpop.xlane.xlu0 %1162 }
 0x56f   : > { %v1074_v35 = vpop.xlane.xlu1 %1073  ;;  %v1077_v36 = vpop.xlane.xlu0 %1076 }
 0x570   : > { %1949 = vrcp.f32 %v1074_v35 }
 0x571   : > { %1951 = vrcp.f32 %v1077_v36 }
 0x576   : > { %v1950_v39 = vpop.eup %1949 }
 0x577   : > { %v988_v37 = vpop.xlane.xlu1 %987  ;;  %v991_v38 = vpop.xlane.xlu0 %990  ;;  %v1080_v44 = vmul.f32 %v1950_v39, %v1944_v26 }
 0x578   : > { %1953 = vrcp.f32 %v988_v37  ;;  %v1952_v40 = vpop.eup %1951 }
 0x579   : > { %1955 = vrcp.f32 %v991_v38  ;;  %v1081_v45 = vmul.f32 %v1952_v40, %v1942_v25  ;;  %v1082_v49 = vpack.c.bf16 %v1080_v44, %v1080_v44  ;;  %v1817_v44 = vld [vmem:[%s2289_s29] sm:$0xff] }
 0x57a   : > { %1957 = vrcp.f32 %v1163_v34 }
 0x57b   : > { %1959 = vrcp.f32 %v1160_v33  ;;  %v1083_v50 = vpack.c.bf16 %v1081_v45, %v1081_v45  ;;  %v1086_v54 = vunpack.c.l.b16 %v1082_v49 }
 0x57d   : > { %v1087_v55 = vunpack.c.l.b16 %v1083_v50 }
 0x57e   : > { %v1954_v41 = vpop.eup %1953 }
 0x57f   : > { %v1956_v42 = vpop.eup %1955  ;;  %v994_v43 = vmul.f32 %v1954_v41, %v1946_v29  ;;  %v1088_v60 = vpack.c.b16 %v1087_v55, %v1086_v54  ;;  %v1818_v41 = vld [vmem:[%s2289_s29 + $0x8] sm:$0xff]  ;;  %s2591_s29 = sld [smem:[#allocation24_spill]] (!%p1796_p1) }
 0x580   : > { %v995_v46 = vmul.f32 %v1956_v42, %v1948_v30  ;;  %v1958_v53 = vpop.eup %1957 }
 0x581   : > { %v996_v63 = vpack.c.bf16 %v994_v43, %v994_v43  ;;  %v1960_v56 = vpop.eup %1959  ;;  %v1167_v57 = vmul.f32 %v1958_v53, %v1940_v19 }
 0x582   : > { %v997_v47 = vpack.c.bf16 %v995_v46, %v995_v46  ;;  %v1166_v59 = vmul.f32 %v1960_v56, %v2379_v6 }
 0x583   : > { %v1000_v48 = vunpack.c.l.b16 %v996_v63  ;;  %v1169_v61 = vpack.c.bf16 %v1167_v57, %v1167_v57 }
 0x584   : > { %v1001_v51 = vunpack.c.l.b16 %v997_v47  ;;  %v1168_v0 = vpack.c.bf16 %v1166_v59, %v1166_v59 }
 0x585   : > { %v1173_v1 = vunpack.c.l.b16 %v1169_v61 }
 0x586   : > { %v1002_v52 = vpack.c.b16 %v1001_v51, %v1000_v48  ;;  %v1172_v3 = vunpack.c.l.b16 %v1168_v0 }
 0x588   : > { %1741 = vmatmul.msk.bf16.vlgmr.msra.gmra.mxu2 %vm896_vm10, %v1002_v52  ;;  %v1174_v5 = vpack.c.b16 %v1173_v1, %v1172_v3  ;;  %v1920_v1 = vld [vmem:[%s733_s30] ss:$0 sm:$0xff] }
 0x58a   : > { %v1090_v58 = vpop.permute.xlu0 %1089 }
 0x58b   : > { %1102 = vmatpush.bf16.msrb.mxu1 %v1090_v58 }
 0x58e   : > { %1743 = vmatmul.msk.bf16.vlgmr.msrb.gmra.mxu1 %vm896_vm10, %v1088_v60  ;;  %v1919_v60 = vld [vmem:[%s2586_s15] ss:$0 sm:$0xff] }
 0x58f   : > { %v1176_v62 = vpop.permute.xlu1 %1175  ;;  %1334 = vmatpush.bf16.msra.mxu1 %v1818_v41 }
 0x590   : > { %1188 = vmatpush.bf16.msrb.mxu2 %v1176_v62 }
 0x593   : > { %1335 = vmatpush.bf16.msra.mxu1 %v1817_v44 }
 0x598   : > { %1745 = vmatmul.msk.bf16.vlgmr.msrb.gmra.mxu2 %vm896_vm10, %v1174_v5 }
 0x60b   : > { %v1018_v7 = vpop.f32.mrf.mxu2  ;;  %v1104_v8 = vpop.f32.mrf.mxu1 }
 0x60c   : > { %1025 = vrot.lane.b32.xlu2 %v1018_v7, %s2079_s1  ;;  %1111 = vrot.lane.b32.xlu0 %v1104_v8, %s2080_s21 }
 0x613   : > { %v1020_v9 = vpop.f32.mrf.mxu2  ;;  %v1106_v6 = vpop.f32.mrf.mxu1 }
 0x614   : > { %1027 = vrot.lane.b32.xlu2 %v1020_v9, %s2079_s1  ;;  %s2589_s1 = smov (!%p1796_p1), %s2588_s0 }
 0x61b   : > { %v1190_v10 = vpop.f32.mrf.mxu2 }
 0x61c   : > { %1197 = vrot.lane.b32.xlu1 %v1190_v10, %s2081_s22  ;;  %1113 = vrot.lane.b32.xlu2 %v1106_v6, %s2080_s21  ;;  %v1826_v10 = vld [vmem:[%s2303_s28 + $0x38] sm:$0xff] }
 0x61d   : > { %1429 = vmatpush.bf16.msrb.mxu3 %v1826_v10 }
 0x623   : > { %v1192_v11 = vpop.f32.mrf.mxu2 }
 0x624   : > { %1199 = vrot.lane.b32.xlu0 %v1192_v11, %s2081_s22  ;;  %v1825_v11 = vld [vmem:[%s2303_s28 + $0x30] sm:$0xff] }
 0x625   : > { %1430 = vmatpush.bf16.msrb.mxu3 %v1825_v11 }
 0x666   : > { %v1026_v13 = vpop.permute.xlu2 %1025 }
 0x667   : > { %1032 = vst.msk [vmem:[#allocation3] sm:$0xff] %vm1031_vm11, %v1026_v13  ;;  %v1824_v13 = vld [vmem:[%s2303_s28 + $0x28] sm:$0xff] }
 0x668   : > { %1431 = vmatpush.bf16.msrb.mxu3 %v1824_v13 }
 0x66e   : > { %v1028_v14 = vpop.permute.xlu2 %1027 }
 0x66f   : > { %1033 = vst.msk [vmem:[#allocation3 + $0x8] sm:$0xff] %vm1031_vm11, %v1028_v14  ;;  %v1823_v14 = vld [vmem:[%s2303_s28 + $0x20] sm:$0xff] }
 0x670   : > { %1432 = vmatpush.bf16.msrb.mxu3 %v1823_v14 }
 0x676   : > { %v1114_v15 = vpop.permute.xlu2 %1113 }
 0x677   : > { %1119 = vst.msk [vmem:[#allocation3 + $0x8] sm:$0xff] %vm1117_vm12, %v1114_v15  ;;  %v1822_v15 = vld [vmem:[%s2303_s28 + $0x18] sm:$0xff] }
 0x678   : > { %1433 = vmatpush.bf16.msrb.mxu3 %v1822_v15 }
 0x67c   : > { %1434 = vmatpush.bf16.msrb.mxu3 %v1821_v16 }
 0x67e   : > { %v1112_v18 = vpop.permute.xlu0 %1111 }
 0x67f   : > { %1118 = vst.msk [vmem:[#allocation3] sm:$0xff] %vm1117_vm12, %v1112_v18  ;;  %v1921_v18 = vld [vmem:[%s741_s20] ss:$0 sm:$0xff] }
 0x680   : > { %1435 = vmatpush.bf16.msrb.mxu3 %v1820_v17 }
 0x68e   : > { %v1198_v19 = vpop.permute.xlu1 %1197 }
 0x68f   : > { %1204 = vst.msk [vmem:[#allocation3] sm:$0xff] %vm1203_vm13, %v1198_v19  ;;  %v1819_v19 = vld [vmem:[%s2303_s28] sm:$0xff] }
 0x690   : > { %1436 = vmatpush.bf16.msrb.mxu3 %v1819_v19 }
 0x696   : > { %v1200_v20 = vpop.permute.xlu0 %1199  ;;  %v1206_v21 = vld [vmem:[#allocation3] sm:$0xff] }
 0x697   : > { %1205 = vst.msk [vmem:[#allocation3 + $0x8] sm:$0xff] %vm1203_vm13, %v1200_v20 }
 0x69e   : > { %v1207_v22 = vld [vmem:[#allocation3 + $0x8] sm:$0xff] }
 0x69f   : > { %v1208_v23 = vpack.c.bf16 %v1207_v22, %v1206_v21 }
 0x6a1   : > { %1754 = vmatmul.msk.bf16.vlgmr.msra.gmra.mxu0 %vm764_vm1, %v1208_v23 }
 0x71e   : > { %v1241_v25 = vpop.f32.mrf.mxu0 }
 0x71f   : > { %v1242_v26 = vadd.f32 %v1918_v24, %v1241_v25 }
 0x721   : > { %v2403_v27 = vadd.f32 %v1242_v26, %v2310_v2 }
 0x723   : > { %v1250_v28 = vsel %vm764_vm1, %v2403_v27, 0.0 }
 0x724   : > { %1251 = vadd.xlane.f32.xlu2 %v1250_v28 }
 0x726   : > { %v1243_v29 = vpop.f32.mrf.mxu0 }
 0x727   : > { %v1244_v30 = vadd.f32 %v1918_v24, %v1243_v29 }
 0x729   : > { %v2408_v31 = vadd.f32 %v1244_v30, %v2314_v4 }
 0x72b   : > { %v1253_v32 = vsel %vm764_vm1, %v2408_v31, 0.0 }
 0x72c   : > { %1254 = vadd.xlane.f32.xlu1 %v1253_v32 }
 0x797   : > { %v1252_v33 = vpop.xlane.xlu2 %1251 }
 0x798   : > { %v1256_v34 = vmul.f32 %v1252_v33, %v2318_v12 }
 0x79a   : > { %v1258_v2 = vsub.f32 %v2403_v27, %v1256_v34 }
 0x79c   : > { %v1260_v35 = vmul.f32 %v1258_v2, %v1258_v2 }
 0x79e   : > { %v1262_v36 = vsel %vm764_vm1, %v1260_v35, 0.0 }
 0x79f   : > { %v1255_v37 = vpop.xlane.xlu1 %1254  ;;  %1263 = vadd.xlane.f32.xlu0 %v1262_v36 }
 0x7a0   : > { %v1257_v38 = vmul.f32 %v1255_v37, %v2318_v12 }
 0x7a2   : > { %v1259_v4 = vsub.f32 %v2408_v31, %v1257_v38 }
 0x7a4   : > { %v1261_v39 = vmul.f32 %v1259_v4, %v1259_v4 }
 0x7a6   : > { %v1265_v40 = vsel %vm764_vm1, %v1261_v39, 0.0 }
 0x7a7   : > { %1266 = vadd.xlane.f32.xlu2 %v1265_v40 }
 0x812   : > { %v1264_v42 = vpop.xlane.xlu0 %1263 }
 0x813   : > { %v1268_v43 = vmul.f32 %v1264_v42, %v2318_v12 }
 0x815   : > { %v1270_v45 = vadd.f32 1e-06, %v1268_v43  ;;  %v1922_v43 = vld [vmem:[%s749_s17] ss:$0 sm:$0xff] }
 0x817   : > { %1961 = vrsqrt.f32 %v1270_v45  ;;  %vm1278_vm15 = vweird.f32 %v1270_v45 }
 0x81a   : > { %v1267_v46 = vpop.xlane.xlu2 %1266 }
 0x81b   : > { %v1269_v63 = vmul.f32 %v1267_v46, %v2318_v12 }
 0x81d   : > { %v1962_v47 = vpop.eup %1961  ;;  %v1271_v48 = vadd.f32 1e-06, %v1269_v63 }
 0x81e   : > { %v1273_v49 = vmul.f32 %v1962_v47, %v1270_v45  ;;  %vm1279_vm14 = vweird.f32 %v1962_v47 }
 0x81f   : > { %1963 = vrsqrt.f32 %v1271_v48  ;;  %vm1280_vm0 = vmor %vm1278_vm15, %vm1279_vm14  ;;  %vm1288_vm3 = vweird.f32 %v1271_v48 }
 0x820   : > { %v1274_v50 = vmul.f32 %v1962_v47, %v1273_v49 }
 0x822   : > { %v1275_v51 = vmul.f32 0.5, %v1274_v50 }
 0x824   : > { %v1276_v52 = vsub.f32 1.5, %v1275_v51 }
 0x825   : > { %v1964_v53 = vpop.eup %1963 }
 0x826   : > { %v1277_v54 = vmul.f32 %v1962_v47, %v1276_v52  ;;  %v1283_v55 = vmul.f32 %v1964_v53, %v1271_v48  ;;  %vm1289_vm2 = vweird.f32 %v1964_v53 }
 0x827   : > { %vm1290_vm4 = vmor %vm1288_vm3, %vm1289_vm2 }
 0x828   : > { %v1284_v56 = vmul.f32 %v1964_v53, %v1283_v55  ;;  %v1281_v57 = vsel %vm1280_vm0, %v1962_v47, %v1277_v54 }
 0x829   : > { %v1292_v61 = vmul.f32 %v1281_v57, %v1258_v2 }
 0x82a   : > { %v1285_v58 = vmul.f32 0.5, %v1284_v56 }
 0x82b   : > { %v1297_v3 = vmul.f32 %v1919_v60, %v1292_v61 }
 0x82c   : > { %v1286_v59 = vsub.f32 1.5, %v1285_v58 }
 0x82d   : > { %v1302_v8 = vadd.f32 %v1920_v1, %v1297_v3 }
 0x82e   : > { %v1287_v62 = vmul.f32 %v1964_v53, %v1286_v59 }
 0x830   : > { %v1291_v0 = vsel %vm1290_vm4, %v1964_v53, %v1287_v62 }
 0x831   : > { %v1293_v5 = vmul.f32 %v1291_v0, %v1259_v4 }
 0x833   : > { %v1298_v7 = vmul.f32 %v1919_v60, %v1293_v5 }
 0x835   : > { %v1303_v9 = vadd.f32 %v1920_v1, %v1298_v7 }
 0x837   : > { %v1304_v6 = vpack.c.bf16 %v1303_v9, %v1302_v8 }
 0x839   : > { %1763 = vmatmul.msk.bf16.vlgmr.msra.gmra.mxu1 %vm764_vm1, %v1304_v6 }
 0x8b6   : > { %v1337_v20 = vpop.f32.mrf.mxu1 }
 0x8b7   : > { %v1338_v21 = vadd.f32 %v1921_v18, %v1337_v20 }
 0x8b9   : > { %v1342_v22 = vmul.f32 %v1338_v21, %v1338_v21 }
 0x8bb   : > { %v1344_v23 = vmul.f32 %v1342_v22, %v1338_v21 }
 0x8bd   : > { %v1346_v24 = vmul.f32 0.044715, %v1344_v23 }
 0x8be   : > { %v1339_v25 = vpop.f32.mrf.mxu1 }
 0x8bf   : > { %v1348_v26 = vadd.f32 %v1346_v24, %v1338_v21  ;;  %v1340_v28 = vadd.f32 %v1921_v18, %v1339_v25 }
 0x8c1   : > { %v1350_v29 = vmul.f32 0.7978846, %v1348_v26  ;;  %v1343_v30 = vmul.f32 %v1340_v28, %v1340_v28 }
 0x8c3   : > { %v1345_v32 = vmul.f32 %v1343_v30, %v1340_v28  ;;  %1965 = vtanh.f32 %v1350_v29 }
 0x8c5   : > { %v1347_v33 = vmul.f32 0.044715, %v1345_v32 }
 0x8c7   : > { %v1349_v34 = vadd.f32 %v1347_v33, %v1340_v28 }
 0x8c9   : > { %v1351_v2 = vmul.f32 0.7978846, %v1349_v34  ;;  %v1966_v35 = vpop.eup %1965 }
 0x8ca   : > { %v1354_v36 = vadd.f32 1.0, %v1966_v35 }
 0x8cb   : > { %1967 = vtanh.f32 %v1351_v2 }
 0x8cc   : > { %v1356_v4 = vmul.f32 0.5, %v1354_v36 }
 0x8ce   : > { %v1358_v40 = vmul.f32 %v1356_v4, %v1338_v21 }
 0x8d1   : > { %v1968_v37 = vpop.eup %1967 }
 0x8d2   : > { %v1355_v38 = vadd.f32 1.0, %v1968_v37 }
 0x8d4   : > { %v1357_v39 = vmul.f32 0.5, %v1355_v38 }
 0x8d6   : > { %v1359_v41 = vmul.f32 %v1357_v39, %v1340_v28 }
 0x8d8   : > { %v1360_v42 = vpack.c.bf16 %v1359_v41, %v1358_v40 }
 0x8da   : > { %1437 = vmatmul.bf16.vlgmr.msrb.gmra.mxu3 %v1360_v42 }
 0x95d   : > { %v1438_v44 = vpop.f32.mrf.mxu3 }
 0x95e   : > { %v1439_v45 = vadd.f32 %v1922_v43, %v1438_v44 }
 0x960   : > { %v1443_v46 = vadd.f32 %v1439_v45, %v2403_v27 }
 0x962   : > { %1445 = vst.msk [vmem:[#allocation2] sm:$0xff] %vm764_vm1, %v1443_v46 }
 0x965   : > { %v1440_v63 = vpop.f32.mrf.mxu3 }
 0x966   : > { %v1441_v47 = vadd.f32 %v1922_v43, %v1440_v63  ;;  %1450 = sbr.rel (%p1796_p1) target bundleno = 2816 (0xb00), region = 96 }
 0x968   : > { %v1444_v48 = vadd.f32 %v1441_v47, %v2408_v31 }
 0x96a   : > { %1446 = vst.msk [vmem:[#allocation2 + $0x8] sm:$0xff] %vm764_vm1, %v1444_v48 }
 0x96b   : > { %vm1453_vm5 = vcmask 253952   ;;  %v1828_v54 = vld [vmem:[%s2588_s0 + $0x8] sm:$0xff]  ;;  %v1827_v31 = vld [vmem:[%s2589_s1] sm:$0xff]  ;;  %vm1512_vm9 = vcmask 73728  }
 0x96c   : > { %v1454_v49 = vsel %vm1453_vm5, %v1443_v46, 0.0  ;;  %1505 = vmatpush.bf16.msra.mxu0 %v1828_v54  ;;  %v1451_v1 = vld [vmem:[%s2590_s3] sm:$0x1] }
 0x96d   : > { %1455 = vadd.xlane.f32.xlu0 %v1454_v49  ;;  %v1483_v6 = vld [vmem:[%s2592_s19] sm:$0x1] }
 0x970   : > { %1506 = vmatpush.bf16.msra.mxu0 %v1827_v31 }
 0x9e0   : > { %v1456_v50 = vpop.xlane.xlu0 %1455 }
 0x9e1   : > { %v1457_v51 = vmul.f32 %v1456_v50, %v2318_v12 }
 0x9e3   : > { %v1458_v52 = vsub.f32 %v1443_v46, %v1457_v51 }
 0x9e5   : > { %v1459_v53 = vmul.f32 %v1458_v52, %v1458_v52 }
 0x9e7   : > { %v1460_v27 = vsel %vm1453_vm5, %v1459_v53, 0.0 }
 0x9e8   : > { %1461 = vadd.xlane.f32.xlu0 %v1460_v27 }
 0xa5b   : > { %v1462_v55 = vpop.xlane.xlu0 %1461 }
 0xa5c   : > { %v1463_v56 = vmul.f32 %v1462_v55, %v2318_v12  ;;  %v1452_v12 = vld [vmem:[%s2591_s29] sm:$0x1] }
 0xa5e   : > { %v1464_v57 = vadd.f32 1e-06, %v1463_v56 }
 0xa60   : > { %1969 = vrsqrt.f32 %v1464_v57  ;;  %vm1471_vm7 = vweird.f32 %v1464_v57 }
 0xa66   : > { %v1970_v58 = vpop.eup %1969 }
 0xa67   : > { %v1466_v59 = vmul.f32 %v1970_v58, %v1464_v57  ;;  %vm1472_vm6 = vweird.f32 %v1970_v58 }
 0xa68   : > { %vm1473_vm8 = vmor %vm1471_vm7, %vm1472_vm6 }
 0xa69   : > { %v1467_v60 = vmul.f32 %v1970_v58, %v1466_v59 }
 0xa6b   : > { %v1468_v61 = vmul.f32 0.5, %v1467_v60 }
 0xa6d   : > { %v1469_v62 = vsub.f32 1.5, %v1468_v61 }
 0xa6f   : > { %v1470_v0 = vmul.f32 %v1970_v58, %v1469_v62 }
 0xa71   : > { %v1474_v3 = vsel %vm1473_vm8, %v1970_v58, %v1470_v0 }
 0xa72   : > { %v1475_v5 = vmul.f32 %v1474_v3, %v1458_v52 }
 0xa74   : > { %v1476_v7 = vmul.f32 %v1475_v5, %v1451_v1 }
 0xa76   : > { %v1477_v8 = vadd.f32 %v1476_v7, %v1452_v12 }
 0xa78   : > { %v1478_v9 = vpack.c.bf16 %v1477_v8, %v1477_v8 }
 0xa7a   : > { %1805 = vmatmul.msk.bf16.vlgmr.msra.gmra.mxu0 %vm764_vm1, %v1478_v9 }
 0xaf7   : > { %v1508_v10 = vpop.f32.mrf.mxu0 }
 0xaf8   : > { %v1509_v11 = vadd.f32 %v1508_v10, %v1483_v6 }
 0xafa   : > { %1513 = vst.msk [vmem:[%s2307_s14] sm:$0x1] %vm1512_vm9, %v1509_v11 }
 0xaff   : > { %v1510_v13 = vpop.f32.mrf.mxu0 }
 0xb00 PF: > { %s2593_s30 = sld [smem:[#allocation10_spill]]  ;;  %s1525_s17 = sshll.u32 %s2307_s14, 4  ;;  %s1526_s17 = int_to_ptr.vmem [resolvable:$true] %s1525_s17 }
 0xb01   : > { %s2594_s20 = sld [smem:[#allocation27_spill]]  ;;  %s2596_s26 = sand.u32 1, %s2041_s25  }
 0xb02   : > { %s1515_s21 = scalar_lea.sflag [#allocation5], %s2596_s26 }
 0xb07   : > { %s1523_s24 = scalar_lea.hbm %s2594_s20, %s2593_s30  ;;  %s1991_s23 = scalar_lea.hbm %s2594_s20, 2 }
 0xb08   : > { %s1527_s0 = sshll.u32 %s1523_s24, 4  ;;  %s1528_s0 = int_to_ptr.hbm [resolvable:$true] %s1527_s0 }
 0xb09   : > { %s1985_s22 = sshra.s32 %s1528_s0, 4  ;;  %s1986_s22 = int_to_ptr.hbm [resolvable:$true] %s1985_s22 }
 0xb0a   : > { %s1987_s13 = scalar_lea.hbm %s1986_s22, 1  ;;  %p1992_p6 = scmp.lt.s32.totalorder %s1986_s22, %s2594_s20 }
 0xb0b   : > { %p1988_p2 = scmp.ne.s32.totalorder %s1986_s22, %s1987_s13  ;;  %p1993_p7 = scmp.lt.s32.totalorder %s1991_s23, %s1987_s13 }
 0xb0d   : > { %p1989_p4 = pnand %p1988_p2, %p2221_p3  ;;  %p1994_p8 = por %p1993_p7, %p1992_p6 }
 0xb0f   : > { %p1990_p5 = pneg %p1989_p4 }
 0xb11   : > { %p1995_p10 = pnand %p1994_p8, %p1990_p5 }
 0xb13   : > { %1998 = shalt.err (!%p1995_p10)
}
 0xb14   : > { %1829 = dma.vmem_to_hbm [thread:$0]  (%p2221_p3), %s1526_s17, 16, %s1528_s0, %s1515_s21  }
 0xb15 PF: > { %s2597_s14 = sld [smem:[#allocation13_spill]] }
 0xb16   : > { %s2598_s16 = sld [smem:[#allocation7_spill]] }
 0xb1b   : > { %p1835_p11 = scmp.ge.s32.totalorder %s2597_s14, 2 }
 0xb1c   : > { %s1539_s30 = sand.u32 1, %s2598_s16  }
 0xb1d   : > { %p1832_p12 = pnand %p1835_p11, %p2231_p9  ;;  %s1540_s27 = scalar_lea.sflag [#allocation5], %s1539_s30 }
 0xb1f   : > { %p1833_p13 = pneg %p1832_p12 }
 0xb21   : > { %2032 = dma.done.wait (%p1833_p13), %s1540_s27, 16  }
 0xb22   : > { %2034 = vsyncadd (%p1833_p13), %s1540_s27, 4294967280  ;;  %s30_s30 = sadd.s32 1, %s2597_s14   ;;  %s2600_s28 = sld [smem:[#allocation8_spill]] }
 0xb23   : > { %p27_p0 = scmp.ge.s32.totalorder %s30_s30, 6   ;;  %s2601_s26 = sld [smem:[#allocation18_spill]] }
 0xb24   : > { %s2602_s27 = sld [smem:[#allocation11_spill]]  ;;  %s2606_s24 = smov %s2041_s25 }
 0xb25   : > { %s2603_s18 = sld [smem:[#allocation12_spill]] }
 0xb26   : > { %s2604_s29 = sld [smem:[#allocation14_spill]] }
 0xb27   : > { %s2605_s0 = sld [smem:[#allocation16_spill]]  ;;  %29 = sbr.rel (!%p27_p0) target bundleno = 15 (0xf), region = 167 }
 0xb28   : > { %s2607_s25 = smov %s2600_s28 }
 0xb2b   : > { %s2608_s28 = smov %s2603_s18 }
 0xb2c   :  { %1545 = vsyncpa [#allocation5], 1 }
 0xb2d   :  { %1547 = vsyncpa [#allocation5 + $0x1], 1 }

</bundles_post_ra>
